<compile_context>
chip_gen: v7x
topology: tpu7x:2x2x1
jax: 0.10.0
libtpu: 0.0.40
codegen_flags: <defaults>
</compile_context>

<pallas_src>
import functools
import math

import jax
import jax.numpy as jnp
from jax.experimental import pallas as pl
from jax.experimental.pallas import tpu as pltpu

NEG = -1e30  # finite stand-in for float('-inf'); keeps fully-masked rows NaN-free

_PARALLEL = pltpu.CompilerParams(dimension_semantics=("parallel",))


# ----------------------------- in-kernel helpers -----------------------------

def _ln(x, g, b):
    """LayerNorm over last dim, f32 math, eps=1e-5 (nn.LayerNorm default)."""
    mu = jnp.mean(x, axis=-1, keepdims=True)
    var = jnp.mean(jnp.square(x - mu), axis=-1, keepdims=True)
    return (x - mu) * jax.lax.rsqrt(var + 1e-5) * g + b


def _mm(x, w_ref, b_ref):
    return jnp.dot(x, w_ref[...], preferred_element_type=jnp.float32) + b_ref[...]


def _heads_attention(q, k, v, mask, nhead):
    """q: [Lq, E], k/v: [Lk, E], mask: [Lq, Lk] additive.

    The 1/sqrt(Dh) scale is folded into the Q projection weights, so no scale
    multiply here. Heads are a small static unrolled loop over lane slices.
    """
    _, E = q.shape
    Dh = E // nhead
    outs = []
    for h in range(nhead):
        sl = slice(h * Dh, (h + 1) * Dh)
        qh, kh, vh = q[:, sl], k[:, sl], v[:, sl]
        # scores = q @ k^T  (contract last dims; no explicit transpose needed)
        s = jax.lax.dot_general(qh, kh, (((1,), (1,)), ((), ())),
                                preferred_element_type=jnp.float32) + mask
        s = s - jnp.max(s, axis=-1, keepdims=True)
        p = jnp.exp(s)
        p = p * pl.reciprocal(jnp.sum(p, axis=-1, keepdims=True), approx=True)
        outs.append(jnp.dot(p, vh, preferred_element_type=jnp.float32))
    return jnp.concatenate(outs, axis=-1)


# --------------------------------- kernels ---------------------------------

def _enc_layer_kernel(x_ref, mask_ref,
                      wqkv_ref, bqkv_ref, wo_ref, bo_ref,
                      ln1g_ref, ln1b_ref,
                      w1_ref, b1_ref, w2_ref, b2_ref,
                      ln2g_ref, ln2b_ref,
                      o_ref, *, nhead):
    x = x_ref[0].astype(jnp.float32)                       # [L, E]
    E = x.shape[-1]
    qkv = _mm(x, wqkv_ref, bqkv_ref)                        # fused Q|K|V: [L, 3E]
    attn = _heads_attention(qkv[:, :E], qkv[:, E:2 * E], qkv[:, 2 * E:],
                            mask_ref[0], nhead)
    attn = _mm(attn, wo_ref, bo_ref)
    x = _ln(x + attn, ln1g_ref[...], ln1b_ref[...])         # post-norm
    ff = jnp.maximum(_mm(x, w1_ref, b1_ref), 0.0)           # fused FFN (relu)
    ff = _mm(ff, w2_ref, b2_ref)
    o_ref[0] = _ln(x + ff, ln2g_ref[...], ln2b_ref[...]).astype(o_ref.dtype)


def _dec_layer_kernel(x_ref, mem_ref, smask_ref, cmask_ref,
                      sa_wqkv_ref, sa_bqkv_ref, sa_wo_ref, sa_bo_ref,
                      ln1g_ref, ln1b_ref,
                      ca_wq_ref, ca_bq_ref, ca_wkv_ref, ca_bkv_ref,
                      ca_wo_ref, ca_bo_ref,
                      ln2g_ref, ln2b_ref,
                      w1_ref, b1_ref, w2_ref, b2_ref,
                      ln3g_ref, ln3b_ref,
                      o_ref, *, nhead):
    x = x_ref[0].astype(jnp.float32)                        # [La, E]
    mem = mem_ref[0].astype(jnp.float32)                    # [Lq, E]
    E = x.shape[-1]

    # --- masked self-attention ---
    qkv = _mm(x, sa_wqkv_ref, sa_bqkv_ref)                  # [La, 3E]
    sa = _heads_attention(qkv[:, :E], qkv[:, E:2 * E], qkv[:, 2 * E:],
                          smask_ref[0], nhead)
    sa = _mm(sa, sa_wo_ref, sa_bo_ref)
    x = _ln(x + sa, ln1g_ref[...], ln1b_ref[...])

    # --- cross-attention over encoder memory ---
    q = _mm(x, ca_wq_ref, ca_bq_ref)                        # [La, E]
    kv = _mm(mem, ca_wkv_ref, ca_bkv_ref)                   # fused K|V: [Lq, 2E]
    ca = _heads_attention(q, kv[:, :E], kv[:, E:], cmask_ref[0], nhead)
    ca = _mm(ca, ca_wo_ref, ca_bo_ref)
    x = _ln(x + ca, ln2g_ref[...], ln2b_ref[...])

    # --- FFN ---
    ff = jnp.maximum(_mm(x, w1_ref, b1_ref), 0.0)
    ff = _mm(ff, w2_ref, b2_ref)
    o_ref[0] = _ln(x + ff, ln3g_ref[...], ln3b_ref[...]).astype(o_ref.dtype)


def _ln_kernel(x_ref, g_ref, b_ref, o_ref):
    o_ref[0] = _ln(x_ref[0].astype(jnp.float32),
                   g_ref[...], b_ref[...]).astype(o_ref.dtype)


def _ln_proj_kernel(x_ref, g_ref, b_ref, w_ref, bw_ref, o_ref):
    x = _ln(x_ref[0].astype(jnp.float32), g_ref[...], b_ref[...])
    o_ref[0] = _mm(x, w_ref, bw_ref).astype(o_ref.dtype)    # lane-dense (padded V)


# --------------------------------- wrappers ---------------------------------

def _batch_spec(*dims):
    nd = len(dims)
    return pl.BlockSpec((1,) + tuple(dims), lambda b: (b,) + (0,) * nd)


def _const_spec(arr):
    nd = arr.ndim
    return pl.BlockSpec(arr.shape, lambda b: (0,) * nd)


def _encoder_layer(x, mask, lp, nhead):
    B, L, E = x.shape
    weights = [lp['wqkv'], lp['bqkv'], lp['wo'], lp['bo'],
               lp['ln1_g'], lp['ln1_b'],
               lp['w1'], lp['b1'], lp['w2'], lp['b2'],
               lp['ln2_g'], lp['ln2_b']]
    return pl.pallas_call(
        functools.partial(_enc_layer_kernel, nhead=nhead),
        out_shape=jax.ShapeDtypeStruct((B, L, E), jnp.float32),
        grid=(B,),
        in_specs=[_batch_spec(L, E), _batch_spec(L, L)]
                 + [_const_spec(w) for w in weights],
        out_specs=_batch_spec(L, E),
        compiler_params=_PARALLEL,
    )(x, mask, *weights)


def _decoder_layer(x, memory, self_mask, cross_mask, lp, nhead):
    B, La, E = x.shape
    Lq = memory.shape[1]
    weights = [lp['sa_wqkv'], lp['sa_bqkv'], lp['sa_wo'], lp['sa_bo'],
               lp['ln1_g'], lp['ln1_b'],
               lp['ca_wq'], lp['ca_bq'], lp['ca_wkv'], lp['ca_bkv'],
               lp['ca_wo'], lp['ca_bo'],
               lp['ln2_g'], lp['ln2_b'],
               lp['w1'], lp['b1'], lp['w2'], lp['b2'],
               lp['ln3_g'], lp['ln3_b']]
    return pl.pallas_call(
        functools.partial(_dec_layer_kernel, nhead=nhead),
        out_shape=jax.ShapeDtypeStruct((B, La, E), jnp.float32),
        grid=(B,),
        in_specs=[_batch_spec(La, E), _batch_spec(Lq, E),
                  _batch_spec(La, La), _batch_spec(La, Lq)]
                 + [_const_spec(w) for w in weights],
        out_specs=_batch_spec(La, E),
        compiler_params=_PARALLEL,
    )(x, memory, self_mask, cross_mask, *weights)


def _layernorm(x, g, b):
    B, L, E = x.shape
    return pl.pallas_call(
        _ln_kernel,
        out_shape=jax.ShapeDtypeStruct((B, L, E), jnp.float32),
        grid=(B,),
        in_specs=[_batch_spec(L, E), _const_spec(g), _const_spec(b)],
        out_specs=_batch_spec(L, E),
        compiler_params=_PARALLEL,
    )(x, g, b)


def _ln_project(x, g, b, w, bw):
    B, L, E = x.shape
    Vp = w.shape[1]
    return pl.pallas_call(
        _ln_proj_kernel,
        out_shape=jax.ShapeDtypeStruct((B, L, Vp), jnp.float32),
        grid=(B,),
        in_specs=[_batch_spec(L, E), _const_spec(g), _const_spec(b),
                  _const_spec(w), _const_spec(bw)],
        out_specs=_batch_spec(L, Vp),
        compiler_params=_PARALLEL,
    )(x, g, b, w, bw)


# --------------------------------- forward ---------------------------------

def net_forward(params, question, answer, args):
    B, Lq = question.shape
    La = answer.shape[1]
    H, V = args['nhead'], args['vocab_size']
    pad = args['pad_idx']

    # CombineEmbedding is not defined in the reference source; approximated as
    # token embedding + learned positional embedding.
    # TODO(synk): replace with the real CombineEmbedding once its definition is known.
    def embed(ids):
        tok = jnp.take(params['tok_emb'], ids, axis=0)             # [B, L, E]
        pos = params['pos_emb'][:ids.shape[1]][None, :, :]
        return (tok + pos).astype(jnp.float32)

    src = embed(question)                                          # [B, Lq, E]
    tgt = embed(answer)                                            # [B, La, E]

    # Additive masks at [B, Lq, Lk] — not replicated per head.
    kq = jnp.where(question == pad, NEG, 0.0).astype(jnp.float32)  # key pad (question)
    ka = jnp.where(answer == pad, NEG, 0.0).astype(jnp.float32)    # key pad (answer)
    causal = jnp.where(jnp.arange(La)[None, :] > jnp.arange(La)[:, None],
                       NEG, 0.0).astype(jnp.float32)               # [La, La]
    enc_mask = jnp.broadcast_to(kq[:, None, :], (B, Lq, Lq))
    dec_self_mask = ka[:, None, :] + causal[None, :, :]            # [B, La, La]
    dec_cross_mask = jnp.broadcast_to(kq[:, None, :], (B, La, Lq))

    # ----- encoder (one fused kernel per layer) -----
    for lp in params['enc_layers']:
        src = _encoder_layer(src, enc_mask, lp, H)
    memory = _layernorm(src, params['enc_norm_g'], params['enc_norm_b'])

    # ----- decoder (one fused kernel per layer) -----
    for lp in params['dec_layers']:
        tgt = _decoder_layer(tgt, memory, dec_self_mask, dec_cross_mask, lp, H)

    # final LayerNorm fused with the lane-padded vocab projection
    logits_p = _ln_project(tgt, params['dec_norm_g'], params['dec_norm_b'],
                           params['proj_w'], params['proj_b'])     # [B, La, Vp]
    return logits_p[:, :, :V]                                      # [B, La, V]


# -------------------------------- parameters --------------------------------

def init_params(key, args):
    E, F, V = args['d_model'], args['dim_feedforward'], args['vocab_size']
    H = args['nhead']
    scale = 1.0 / math.sqrt(E // H)
    Vp = ((V + 127) // 128) * 128          # lane-dense projection width
    keys = iter(jax.random.split(key, 512))

    def dense(shape, s=0.02):
        return s * jax.random.normal(next(keys), shape, jnp.float32)

    def zeros(n):
        return jnp.zeros((1, n), jnp.float32)

    def ones(n):
        return jnp.ones((1, n), jnp.float32)

    def fused_self_attn():
        wq, wk, wv = dense((E, E)), dense((E, E)), dense((E, E))
        # fold 1/sqrt(Dh) into the Q projection so the kernel skips the scale mul
        return dict(wqkv=jnp.concatenate([wq * scale, wk, wv], axis=1),
                    bqkv=zeros(3 * E), wo=dense((E, E)), bo=zeros(E))

    def enc_layer():
        sa = fused_self_attn()
        return dict(wqkv=sa['wqkv'], bqkv=sa['bqkv'], wo=sa['wo'], bo=sa['bo'],
                    ln1_g=ones(E), ln1_b=zeros(E),
                    w1=dense((E, F)), b1=zeros(F),
                    w2=dense((F, E)), b2=zeros(E),
                    ln2_g=ones(E), ln2_b=zeros(E))

    def dec_layer():
        sa = fused_self_attn()
        wq, wk, wv = dense((E, E)), dense((E, E)), dense((E, E))
        return dict(sa_wqkv=sa['wqkv'], sa_bqkv=sa['bqkv'],
                    sa_wo=sa['wo'], sa_bo=sa['bo'],
                    ln1_g=ones(E), ln1_b=zeros(E),
                    ca_wq=wq * scale, ca_bq=zeros(E),
                    ca_wkv=jnp.concatenate([wk, wv], axis=1), ca_bkv=zeros(2 * E),
                    ca_wo=dense((E, E)), ca_bo=zeros(E),
                    ln2_g=ones(E), ln2_b=zeros(E),
                    w1=dense((E, F)), b1=zeros(F),
                    w2=dense((F, E)), b2=zeros(E),
                    ln3_g=ones(E), ln3_b=zeros(E))

    proj_w = jnp.zeros((E, Vp), jnp.float32).at[:, :V].set(dense((E, V)))

    return dict(
        tok_emb=dense((V, E), 1.0 / math.sqrt(E)),
        pos_emb=dense((args['max_len'], E), 0.02),
        enc_layers=[enc_layer() for _ in range(args['num_encoder_layers'])],
        dec_layers=[dec_layer() for _ in range(args['num_decoder_layers'])],
        enc_norm_g=ones(E), enc_norm_b=zeros(E),
        dec_norm_g=ones(E), dec_norm_b=zeros(E),
        proj_w=proj_w, proj_b=jnp.zeros((1, Vp), jnp.float32),
    )


# ----------------------------------- main -----------------------------------

if __name__ == "__main__":
    args = dict(d_model=32, nhead=4, num_encoder_layers=2, num_decoder_layers=2,
                dim_feedforward=64, vocab_size=50, pad_idx=0, max_len=16)

    key = jax.random.PRNGKey(0)
    pkey, qkey, akey = jax.random.split(key, 3)
    params = init_params(pkey, args)

    B, L = 2, 8
    question = jax.random.randint(qkey, (B, L), 1, args['vocab_size'], dtype=jnp.int32)
    answer = jax.random.randint(akey, (B, L), 1, args['vocab_size'], dtype=jnp.int32)
    # introduce some padding positions (never an all-pad sequence)
    question = question.at[:, -2:].set(args['pad_idx'])
    answer = answer.at[:, -1:].set(args['pad_idx'])

    fwd = jax.jit(functools.partial(net_forward, args=args))
    logits = fwd(params, question, answer)
    jax.block_until_ready(logits)

    assert logits.shape == (B, L, args['vocab_size'])
    assert bool(jnp.all(jnp.isfinite(logits)))
    print("KERNEL_OK")
</pallas_src>

<mosaic_0001>
module attributes {stable_mosaic.version = 11 : i64} {
  func.func @_ln_kernel(%arg0: i32, %arg1: memref<1x8x32xf32, #tpu.memory_space<vmem>>, %arg2: memref<1x32xf32, #tpu.memory_space<vmem>>, %arg3: memref<1x32xf32, #tpu.memory_space<vmem>>, %arg4: memref<1x8x32xf32, #tpu.memory_space<vmem>>) attributes {dimension_semantics = [#tpu.dimension_semantics<parallel>], iteration_bounds = array<i64: 2>, scalar_prefetch = 0 : i64, scratch_operands = 0 : i64, tpu.core_type = #tpu.core_type<tc>, window_params = [{transform_indices = @transform_0, window_bounds = array<i64: 1, 8, 32>}, {pipeline_mode = #tpu.pipeline_mode<synchronous>, transform_indices = @transform_1, window_bounds = array<i64: 1, 32>}, {pipeline_mode = #tpu.pipeline_mode<synchronous>, transform_indices = @transform_2, window_bounds = array<i64: 1, 32>}, {transform_indices = @transform_3, window_bounds = array<i64: 1, 8, 32>}]} {
    %c0 = arith.constant 0 : index
    %c0_0 = arith.constant 0 : index
    %c0_1 = arith.constant 0 : index
    %0 = vector.load %arg1[%c0, %c0_0, %c0_1] : memref<1x8x32xf32, #tpu.memory_space<vmem>>, vector<1x8x32xf32>
    %1 = vector.shape_cast %0 : vector<1x8x32xf32> to vector<8x32xf32>
    %c0_2 = arith.constant 0 : index
    %c0_3 = arith.constant 0 : index
    %2 = vector.load %arg2[%c0_2, %c0_3] : memref<1x32xf32, #tpu.memory_space<vmem>>, vector<1x32xf32>
    %c0_4 = arith.constant 0 : index
    %c0_5 = arith.constant 0 : index
    %3 = vector.load %arg3[%c0_4, %c0_5] : memref<1x32xf32, #tpu.memory_space<vmem>>, vector<1x32xf32>
    %cst = arith.constant dense<0.000000e+00> : vector<8xf32>
    %4 = vector.multi_reduction <add>, %1, %cst [1] : vector<8x32xf32> to vector<8xf32>
    %5 = vector.shape_cast %4 : vector<8xf32> to vector<8x1xf32>
    %cst_6 = arith.constant 3.200000e+01 : f32
    %6 = vector.broadcast %cst_6 : f32 to vector<8x1xf32>
    %7 = arith.divf %5, %6 : vector<8x1xf32>
    %8 = vector.broadcast %7 : vector<8x1xf32> to vector<8x32xf32>
    %9 = arith.subf %1, %8 : vector<8x32xf32>
    %10 = arith.mulf %9, %9 : vector<8x32xf32>
    %cst_7 = arith.constant dense<0.000000e+00> : vector<8xf32>
    %11 = vector.multi_reduction <add>, %10, %cst_7 [1] : vector<8x32xf32> to vector<8xf32>
    %12 = vector.shape_cast %11 : vector<8xf32> to vector<8x1xf32>
    %cst_8 = arith.constant 3.200000e+01 : f32
    %13 = vector.broadcast %cst_8 : f32 to vector<8x1xf32>
    %14 = arith.divf %12, %13 : vector<8x1xf32>
    %15 = vector.broadcast %7 : vector<8x1xf32> to vector<8x32xf32>
    %16 = arith.subf %1, %15 : vector<8x32xf32>
    %cst_9 = arith.constant 9.99999974E-6 : f32
    %17 = vector.broadcast %cst_9 : f32 to vector<8x1xf32>
    %18 = arith.addf %14, %17 : vector<8x1xf32>
    %19 = math.rsqrt %18 : vector<8x1xf32>
    %20 = vector.broadcast %19 : vector<8x1xf32> to vector<8x32xf32>
    %21 = arith.mulf %16, %20 : vector<8x32xf32>
    %22 = vector.broadcast %2 : vector<1x32xf32> to vector<8x32xf32>
    %23 = arith.mulf %21, %22 : vector<8x32xf32>
    %24 = vector.broadcast %3 : vector<1x32xf32> to vector<8x32xf32>
    %25 = arith.addf %23, %24 : vector<8x32xf32>
    %c0_10 = arith.constant 0 : index
    %c0_11 = arith.constant 0 : index
    %c0_12 = arith.constant 0 : index
    %26 = vector.load %arg4[%c0_10, %c0_11, %c0_12] : memref<1x8x32xf32, #tpu.memory_space<vmem>>, vector<1x8x32xf32>
    %27 = vector.shape_cast %26 : vector<1x8x32xf32> to vector<8x32xf32>
    %28 = vector.shape_cast %25 : vector<8x32xf32> to vector<1x8x32xf32>
    tpu.vector_store %arg4[%c0_10, %c0_11, %c0_12], %28 {strides = array<i32>} : memref<1x8x32xf32, #tpu.memory_space<vmem>>, vector<1x8x32xf32>,
    return
  }
  func.func @transform_0(%arg0: i32) -> (i32, i32, i32) {
    %c0_i32 = arith.constant 0 : i32
    %c0_i32_0 = arith.constant 0 : i32
    %c0_i32_1 = arith.constant 0 : i32
    return %arg0, %c0_i32, %c0_i32_0 : i32, i32, i32
  }
  func.func @transform_1(%arg0: i32) -> (i32, i32) {
    %c0_i32 = arith.constant 0 : i32
    %c0_i32_0 = arith.constant 0 : i32
    %c0_i32_1 = arith.constant 0 : i32
    return %c0_i32, %c0_i32_0 : i32, i32
  }
  func.func @transform_2(%arg0: i32) -> (i32, i32) {
    %c0_i32 = arith.constant 0 : i32
    %c0_i32_0 = arith.constant 0 : i32
    %c0_i32_1 = arith.constant 0 : i32
    return %c0_i32, %c0_i32_0 : i32, i32
  }
  func.func @transform_3(%arg0: i32) -> (i32, i32, i32) {
    %c0_i32 = arith.constant 0 : i32
    %c0_i32_0 = arith.constant 0 : i32
    %c0_i32_1 = arith.constant 0 : i32
    return %arg0, %c0_i32, %c0_i32_0 : i32, i32, i32
  }
}

module attributes {stable_mosaic.version = 11 : i64} {
  func.func @_enc_layer_kernel(%arg0: i32, %arg1: memref<1x8x32xf32, #tpu.memory_space<vmem>>, %arg2: memref<1x8x8xf32, #tpu.memory_space<vmem>>, %arg3: memref<32x96xf32, #tpu.memory_space<vmem>>, %arg4: memref<1x96xf32, #tpu.memory_space<vmem>>, %arg5: memref<32x32xf32, #tpu.memory_space<vmem>>, %arg6: memref<1x32xf32, #tpu.memory_space<vmem>>, %arg7: memref<1x32xf32, #tpu.memory_space<vmem>>, %arg8: memref<1x32xf32, #tpu.memory_space<vmem>>, %arg9: memref<32x64xf32, #tpu.memory_space<vmem>>, %arg10: memref<1x64xf32, #tpu.memory_space<vmem>>, %arg11: memref<64x32xf32, #tpu.memory_space<vmem>>, %arg12: memref<1x32xf32, #tpu.memory_space<vmem>>, %arg13: memref<1x32xf32, #tpu.memory_space<vmem>>, %arg14: memref<1x32xf32, #tpu.memory_space<vmem>>, %arg15: memref<1x8x32xf32, #tpu.memory_space<vmem>>) attributes {dimension_semantics = [#tpu.dimension_semantics<parallel>], iteration_bounds = array<i64: 2>, scalar_prefetch = 0 : i64, scratch_operands = 0 : i64, tpu.core_type = #tpu.core_type<tc>, window_params = [{transform_indices = @transform_0, window_bounds = array<i64: 1, 8, 32>}, {transform_indices = @transform_1, window_bounds = array<i64: 1, 8, 8>}, {pipeline_mode = #tpu.pipeline_mode<synchronous>, transform_indices = @transform_2, window_bounds = array<i64: 32, 96>}, {pipeline_mode = #tpu.pipeline_mode<synchronous>, transform_indices = @transform_3, window_bounds = array<i64: 1, 96>}, {pipeline_mode = #tpu.pipeline_mode<synchronous>, transform_indices = @transform_4, window_bounds = array<i64: 32, 32>}, {pipeline_mode = #tpu.pipeline_mode<synchronous>, transform_indices = @transform_5, window_bounds = array<i64: 1, 32>}, {pipeline_mode = #tpu.pipeline_mode<synchronous>, transform_indices = @transform_6, window_bounds = array<i64: 1, 32>}, {pipeline_mode = #tpu.pipeline_mode<synchronous>, transform_indices = @transform_7, window_bounds = array<i64: 1, 32>}, {pipeline_mode = #tpu.pipeline_mode<synchronous>, transform_indices = @transform_8, window_bounds = array<i64: 32, 64>}, {pipeline_mode = #tpu.pipeline_mode<synchronous>, transform_indices = @transform_9, window_bounds = array<i64: 1, 64>}, {pipeline_mode = #tpu.pipeline_mode<synchronous>, transform_indices = @transform_10, window_bounds = array<i64: 64, 32>}, {pipeline_mode = #tpu.pipeline_mode<synchronous>, transform_indices = @transform_11, window_bounds = array<i64: 1, 32>}, {pipeline_mode = #tpu.pipeline_mode<synchronous>, transform_indices = @transform_12, window_bounds = array<i64: 1, 32>}, {pipeline_mode = #tpu.pipeline_mode<synchronous>, transform_indices = @transform_13, window_bounds = array<i64: 1, 32>}, {transform_indices = @transform_14, window_bounds = array<i64: 1, 8, 32>}]} {
    %c0 = arith.constant 0 : index
    %c0_0 = arith.constant 0 : index
    %c0_1 = arith.constant 0 : index
    %0 = vector.load %arg1[%c0, %c0_0, %c0_1] : memref<1x8x32xf32, #tpu.memory_space<vmem>>, vector<1x8x32xf32>
    %1 = vector.shape_cast %0 : vector<1x8x32xf32> to vector<8x32xf32>
    %c0_2 = arith.constant 0 : index
    %c0_3 = arith.constant 0 : index
    %2 = vector.load %arg3[%c0_2, %c0_3] : memref<32x96xf32, #tpu.memory_space<vmem>>, vector<32x96xf32>
    %cst = arith.constant dense<0.000000e+00> : vector<8x96xf32>
    %3 = tpu.matmul %1, %2, %cst {dimension_numbers = #tpu.dot_dimension_numbers<[1], [0], [0], [1], [0, 0, 1, 1], [], []>} : vector<8x32xf32>, vector<32x96xf32>, vector<8x96xf32> -> vector<8x96xf32>
    %c0_4 = arith.constant 0 : index
    %c0_5 = arith.constant 0 : index
    %4 = vector.load %arg4[%c0_4, %c0_5] : memref<1x96xf32, #tpu.memory_space<vmem>>, vector<1x96xf32>
    %5 = vector.broadcast %4 : vector<1x96xf32> to vector<8x96xf32>
    %6 = arith.addf %3, %5 : vector<8x96xf32>
    %7 = vector.extract_strided_slice %6 {offsets = [0, 0], sizes = [8, 32], strides = [1, 1]} : vector<8x96xf32> to vector<8x32xf32>
    %8 = vector.extract_strided_slice %6 {offsets = [0, 32], sizes = [8, 32], strides = [1, 1]} : vector<8x96xf32> to vector<8x32xf32>
    %9 = vector.extract_strided_slice %6 {offsets = [0, 64], sizes = [8, 32], strides = [1, 1]} : vector<8x96xf32> to vector<8x32xf32>
    %c0_6 = arith.constant 0 : index
    %c0_7 = arith.constant 0 : index
    %c0_8 = arith.constant 0 : index
    %10 = vector.load %arg2[%c0_6, %c0_7, %c0_8] : memref<1x8x8xf32, #tpu.memory_space<vmem>>, vector<1x8x8xf32>
    %11 = vector.shape_cast %10 : vector<1x8x8xf32> to vector<8x8xf32>
    %12 = vector.extract_strided_slice %7 {offsets = [0, 0], sizes = [8, 8], strides = [1, 1]} : vector<8x32xf32> to vector<8x8xf32>
    %13 = vector.extract_strided_slice %8 {offsets = [0, 0], sizes = [8, 8], strides = [1, 1]} : vector<8x32xf32> to vector<8x8xf32>
    %14 = vector.extract_strided_slice %9 {offsets = [0, 0], sizes = [8, 8], strides = [1, 1]} : vector<8x32xf32> to vector<8x8xf32>
    %cst_9 = arith.constant dense<0.000000e+00> : vector<8x8xf32>
    %15 = tpu.matmul %12, %13, %cst_9 {dimension_numbers = #tpu.dot_dimension_numbers<[1], [1], [0], [0], [0, 0, 1, 0], [], []>} : vector<8x8xf32>, vector<8x8xf32>, vector<8x8xf32> -> vector<8x8xf32>
    %16 = arith.addf %15, %11 : vector<8x8xf32>
    %cst_10 = arith.constant dense<0xFF800000> : vector<8xf32>
    %17 = vector.multi_reduction <maximumf>, %16, %cst_10 [1] : vector<8x8xf32> to vector<8xf32>
    %18 = vector.shape_cast %17 : vector<8xf32> to vector<8x1xf32>
    %19 = vector.broadcast %18 : vector<8x1xf32> to vector<8x8xf32>
    %20 = arith.subf %16, %19 : vector<8x8xf32>
    %21 = math.exp %20 : vector<8x8xf32>
    %cst_11 = arith.constant dense<0.000000e+00> : vector<8xf32>
    %22 = vector.multi_reduction <add>, %21, %cst_11 [1] : vector<8x8xf32> to vector<8xf32>
    %23 = vector.shape_cast %22 : vector<8xf32> to vector<8x1xf32>
    %24 = tpu.reciprocal %23 {approx = true} : vector<8x1xf32> -> vector<8x1xf32>
    %25 = vector.broadcast %24 : vector<8x1xf32> to vector<8x8xf32>
    %26 = arith.mulf %21, %25 : vector<8x8xf32>
    %cst_12 = arith.constant dense<0.000000e+00> : vector<8x8xf32>
    %27 = tpu.matmul %26, %14, %cst_12 {dimension_numbers = #tpu.dot_dimension_numbers<[1], [0], [0], [1], [0, 0, 1, 1], [], []>} : vector<8x8xf32>, vector<8x8xf32>, vector<8x8xf32> -> vector<8x8xf32>
    %28 = vector.extract_strided_slice %7 {offsets = [0, 8], sizes = [8, 8], strides = [1, 1]} : vector<8x32xf32> to vector<8x8xf32>
    %29 = vector.extract_strided_slice %8 {offsets = [0, 8], sizes = [8, 8], strides = [1, 1]} : vector<8x32xf32> to vector<8x8xf32>
    %30 = vector.extract_strided_slice %9 {offsets = [0, 8], sizes = [8, 8], strides = [1, 1]} : vector<8x32xf32> to vector<8x8xf32>
    %cst_13 = arith.constant dense<0.000000e+00> : vector<8x8xf32>
    %31 = tpu.matmul %28, %29, %cst_13 {dimension_numbers = #tpu.dot_dimension_numbers<[1], [1], [0], [0], [0, 0, 1, 0], [], []>} : vector<8x8xf32>, vector<8x8xf32>, vector<8x8xf32> -> vector<8x8xf32>
    %32 = arith.addf %31, %11 : vector<8x8xf32>
    %cst_14 = arith.constant dense<0xFF800000> : vector<8xf32>
    %33 = vector.multi_reduction <maximumf>, %32, %cst_14 [1] : vector<8x8xf32> to vector<8xf32>
    %34 = vector.shape_cast %33 : vector<8xf32> to vector<8x1xf32>
    %35 = vector.broadcast %34 : vector<8x1xf32> to vector<8x8xf32>
    %36 = arith.subf %32, %35 : vector<8x8xf32>
    %37 = math.exp %36 : vector<8x8xf32>
    %cst_15 = arith.constant dense<0.000000e+00> : vector<8xf32>
    %38 = vector.multi_reduction <add>, %37, %cst_15 [1] : vector<8x8xf32> to vector<8xf32>
    %39 = vector.shape_cast %38 : vector<8xf32> to vector<8x1xf32>
    %40 = tpu.reciprocal %39 {approx = true} : vector<8x1xf32> -> vector<8x1xf32>
    %41 = vector.broadcast %40 : vector<8x1xf32> to vector<8x8xf32>
    %42 = arith.mulf %37, %41 : vector<8x8xf32>
    %cst_16 = arith.constant dense<0.000000e+00> : vector<8x8xf32>
    %43 = tpu.matmul %42, %30, %cst_16 {dimension_numbers = #tpu.dot_dimension_numbers<[1], [0], [0], [1], [0, 0, 1, 1], [], []>} : vector<8x8xf32>, vector<8x8xf32>, vector<8x8xf32> -> vector<8x8xf32>
    %44 = vector.extract_strided_slice %7 {offsets = [0, 16], sizes = [8, 8], strides = [1, 1]} : vector<8x32xf32> to vector<8x8xf32>
    %45 = vector.extract_strided_slice %8 {offsets = [0, 16], sizes = [8, 8], strides = [1, 1]} : vector<8x32xf32> to vector<8x8xf32>
    %46 = vector.extract_strided_slice %9 {offsets = [0, 16], sizes = [8, 8], strides = [1, 1]} : vector<8x32xf32> to vector<8x8xf32>
    %cst_17 = arith.constant dense<0.000000e+00> : vector<8x8xf32>
    %47 = tpu.matmul %44, %45, %cst_17 {dimension_numbers = #tpu.dot_dimension_numbers<[1], [1], [0], [0], [0, 0, 1, 0], [], []>} : vector<8x8xf32>, vector<8x8xf32>, vector<8x8xf32> -> vector<8x8xf32>
    %48 = arith.addf %47, %11 : vector<8x8xf32>
    %cst_18 = arith.constant dense<0xFF800000> : vector<8xf32>
    %49 = vector.multi_reduction <maximumf>, %48, %cst_18 [1] : vector<8x8xf32> to vector<8xf32>
    %50 = vector.shape_cast %49 : vector<8xf32> to vector<8x1xf32>
    %51 = vector.broadcast %50 : vector<8x1xf32> to vector<8x8xf32>
    %52 = arith.subf %48, %51 : vector<8x8xf32>
    %53 = math.exp %52 : vector<8x8xf32>
    %cst_19 = arith.constant dense<0.000000e+00> : vector<8xf32>
    %54 = vector.multi_reduction <add>, %53, %cst_19 [1] : vector<8x8xf32> to vector<8xf32>
    %55 = vector.shape_cast %54 : vector<8xf32> to vector<8x1xf32>
    %56 = tpu.reciprocal %55 {approx = true} : vector<8x1xf32> -> vector<8x1xf32>
    %57 = vector.broadcast %56 : vector<8x1xf32> to vector<8x8xf32>
    %58 = arith.mulf %53, %57 : vector<8x8xf32>
    %cst_20 = arith.constant dense<0.000000e+00> : vector<8x8xf32>
    %59 = tpu.matmul %58, %46, %cst_20 {dimension_numbers = #tpu.dot_dimension_numbers<[1], [0], [0], [1], [0, 0, 1, 1], [], []>} : vector<8x8xf32>, vector<8x8xf32>, vector<8x8xf32> -> vector<8x8xf32>
    %60 = vector.extract_strided_slice %7 {offsets = [0, 24], sizes = [8, 8], strides = [1, 1]} : vector<8x32xf32> to vector<8x8xf32>
    %61 = vector.extract_strided_slice %8 {offsets = [0, 24], sizes = [8, 8], strides = [1, 1]} : vector<8x32xf32> to vector<8x8xf32>
    %62 = vector.extract_strided_slice %9 {offsets = [0, 24], sizes = [8, 8], strides = [1, 1]} : vector<8x32xf32> to vector<8x8xf32>
    %cst_21 = arith.constant dense<0.000000e+00> : vector<8x8xf32>
    %63 = tpu.matmul %60, %61, %cst_21 {dimension_numbers = #tpu.dot_dimension_numbers<[1], [1], [0], [0], [0, 0, 1, 0], [], []>} : vector<8x8xf32>, vector<8x8xf32>, vector<8x8xf32> -> vector<8x8xf32>
    %64 = arith.addf %63, %11 : vector<8x8xf32>
    %cst_22 = arith.constant dense<0xFF800000> : vector<8xf32>
    %65 = vector.multi_reduction <maximumf>, %64, %cst_22 [1] : vector<8x8xf32> to vector<8xf32>
    %66 = vector.shape_cast %65 : vector<8xf32> to vector<8x1xf32>
    %67 = vector.broadcast %66 : vector<8x1xf32> to vector<8x8xf32>
    %68 = arith.subf %64, %67 : vector<8x8xf32>
    %69 = math.exp %68 : vector<8x8xf32>
    %cst_23 = arith.constant dense<0.000000e+00> : vector<8xf32>
    %70 = vector.multi_reduction <add>, %69, %cst_23 [1] : vector<8x8xf32> to vector<8xf32>
    %71 = vector.shape_cast %70 : vector<8xf32> to vector<8x1xf32>
    %72 = tpu.reciprocal %71 {approx = true} : vector<8x1xf32> -> vector<8x1xf32>
    %73 = vector.broadcast %72 : vector<8x1xf32> to vector<8x8xf32>
    %74 = arith.mulf %69, %73 : vector<8x8xf32>
    %cst_24 = arith.constant dense<0.000000e+00> : vector<8x8xf32>
    %75 = tpu.matmul %74, %62, %cst_24 {dimension_numbers = #tpu.dot_dimension_numbers<[1], [0], [0], [1], [0, 0, 1, 1], [], []>} : vector<8x8xf32>, vector<8x8xf32>, vector<8x8xf32> -> vector<8x8xf32>
    %76 = tpu.concatenate %27, %43, %59, %75 in 1 : vector<8x8xf32>, vector<8x8xf32>, vector<8x8xf32>, vector<8x8xf32> -> vector<8x32xf32>
    %c0_25 = arith.constant 0 : index
    %c0_26 = arith.constant 0 : index
    %77 = vector.load %arg5[%c0_25, %c0_26] : memref<32x32xf32, #tpu.memory_space<vmem>>, vector<32x32xf32>
    %cst_27 = arith.constant dense<0.000000e+00> : vector<8x32xf32>
    %78 = tpu.matmul %76, %77, %cst_27 {dimension_numbers = #tpu.dot_dimension_numbers<[1], [0], [0], [1], [0, 0, 1, 1], [], []>} : vector<8x32xf32>, vector<32x32xf32>, vector<8x32xf32> -> vector<8x32xf32>
    %c0_28 = arith.constant 0 : index
    %c0_29 = arith.constant 0 : index
    %79 = vector.load %arg6[%c0_28, %c0_29] : memref<1x32xf32, #tpu.memory_space<vmem>>, vector<1x32xf32>
    %80 = vector.broadcast %79 : vector<1x32xf32> to vector<8x32xf32>
    %81 = arith.addf %78, %80 : vector<8x32xf32>
    %82 = arith.addf %1, %81 : vector<8x32xf32>
    %c0_30 = arith.constant 0 : index
    %c0_31 = arith.constant 0 : index
    %83 = vector.load %arg7[%c0_30, %c0_31] : memref<1x32xf32, #tpu.memory_space<vmem>>, vector<1x32xf32>
    %c0_32 = arith.constant 0 : index
    %c0_33 = arith.constant 0 : index
    %84 = vector.load %arg8[%c0_32, %c0_33] : memref<1x32xf32, #tpu.memory_space<vmem>>, vector<1x32xf32>
    %cst_34 = arith.constant dense<0.000000e+00> : vector<8xf32>
    %85 = vector.multi_reduction <add>, %82, %cst_34 [1] : vector<8x32xf32> to vector<8xf32>
    %86 = vector.shape_cast %85 : vector<8xf32> to vector<8x1xf32>
    %cst_35 = arith.constant 3.200000e+01 : f32
    %87 = vector.broadcast %cst_35 : f32 to vector<8x1xf32>
    %88 = arith.divf %86, %87 : vector<8x1xf32>
    %89 = vector.broadcast %88 : vector<8x1xf32> to vector<8x32xf32>
    %90 = arith.subf %82, %89 : vector<8x32xf32>
    %91 = arith.mulf %90, %90 : vector<8x32xf32>
    %cst_36 = arith.constant dense<0.000000e+00> : vector<8xf32>
    %92 = vector.multi_reduction <add>, %91, %cst_36 [1] : vector<8x32xf32> to vector<8xf32>
    %93 = vector.shape_cast %92 : vector<8xf32> to vector<8x1xf32>
    %cst_37 = arith.constant 3.200000e+01 : f32
    %94 = vector.broadcast %cst_37 : f32 to vector<8x1xf32>
    %95 = arith.divf %93, %94 : vector<8x1xf32>
    %96 = vector.broadcast %88 : vector<8x1xf32> to vector<8x32xf32>
    %97 = arith.subf %82, %96 : vector<8x32xf32>
    %cst_38 = arith.constant 9.99999974E-6 : f32
    %98 = vector.broadcast %cst_38 : f32 to vector<8x1xf32>
    %99 = arith.addf %95, %98 : vector<8x1xf32>
    %100 = math.rsqrt %99 : vector<8x1xf32>
    %101 = vector.broadcast %100 : vector<8x1xf32> to vector<8x32xf32>
    %102 = arith.mulf %97, %101 : vector<8x32xf32>
    %103 = vector.broadcast %83 : vector<1x32xf32> to vector<8x32xf32>
    %104 = arith.mulf %102, %103 : vector<8x32xf32>
    %105 = vector.broadcast %84 : vector<1x32xf32> to vector<8x32xf32>
    %106 = arith.addf %104, %105 : vector<8x32xf32>
    %c0_39 = arith.constant 0 : index
    %c0_40 = arith.constant 0 : index
    %107 = vector.load %arg9[%c0_39, %c0_40] : memref<32x64xf32, #tpu.memory_space<vmem>>, vector<32x64xf32>
    %cst_41 = arith.constant dense<0.000000e+00> : vector<8x64xf32>
    %108 = tpu.matmul %106, %107, %cst_41 {dimension_numbers = #tpu.dot_dimension_numbers<[1], [0], [0], [1], [0, 0, 1, 1], [], []>} : vector<8x32xf32>, vector<32x64xf32>, vector<8x64xf32> -> vector<8x64xf32>
    %c0_42 = arith.constant 0 : index
    %c0_43 = arith.constant 0 : index
    %109 = vector.load %arg10[%c0_42, %c0_43] : memref<1x64xf32, #tpu.memory_space<vmem>>, vector<1x64xf32>
    %110 = vector.broadcast %109 : vector<1x64xf32> to vector<8x64xf32>
    %111 = arith.addf %108, %110 : vector<8x64xf32>
    %cst_44 = arith.constant 0.000000e+00 : f32
    %112 = vector.broadcast %cst_44 : f32 to vector<8x64xf32>
    %113 = arith.maximumf %111, %112 : vector<8x64xf32>
    %c0_45 = arith.constant 0 : index
    %c0_46 = arith.constant 0 : index
    %114 = vector.load %arg11[%c0_45, %c0_46] : memref<64x32xf32, #tpu.memory_space<vmem>>, vector<64x32xf32>
    %cst_47 = arith.constant dense<0.000000e+00> : vector<8x32xf32>
    %115 = tpu.matmul %113, %114, %cst_47 {dimension_numbers = #tpu.dot_dimension_numbers<[1], [0], [0], [1], [0, 0, 1, 1], [], []>} : vector<8x64xf32>, vector<64x32xf32>, vector<8x32xf32> -> vector<8x32xf32>
    %c0_48 = arith.constant 0 : index
    %c0_49 = arith.constant 0 : index
    %116 = vector.load %arg12[%c0_48, %c0_49] : memref<1x32xf32, #tpu.memory_space<vmem>>, vector<1x32xf32>
    %117 = vector.broadcast %116 : vector<1x32xf32> to vector<8x32xf32>
    %118 = arith.addf %115, %117 : vector<8x32xf32>
    %119 = arith.addf %106, %118 : vector<8x32xf32>
    %c0_50 = arith.constant 0 : index
    %c0_51 = arith.constant 0 : index
    %120 = vector.load %arg13[%c0_50, %c0_51] : memref<1x32xf32, #tpu.memory_space<vmem>>, vector<1x32xf32>
    %c0_52 = arith.constant 0 : index
    %c0_53 = arith.constant 0 : index
    %121 = vector.load %arg14[%c0_52, %c0_53] : memref<1x32xf32, #tpu.memory_space<vmem>>, vector<1x32xf32>
    %cst_54 = arith.constant dense<0.000000e+00> : vector<8xf32>
    %122 = vector.multi_reduction <add>, %119, %cst_54 [1] : vector<8x32xf32> to vector<8xf32>
    %123 = vector.shape_cast %122 : vector<8xf32> to vector<8x1xf32>
    %cst_55 = arith.constant 3.200000e+01 : f32
    %124 = vector.broadcast %cst_55 : f32 to vector<8x1xf32>
    %125 = arith.divf %123, %124 : vector<8x1xf32>
    %126 = vector.broadcast %125 : vector<8x1xf32> to vector<8x32xf32>
    %127 = arith.subf %119, %126 : vector<8x32xf32>
    %128 = arith.mulf %127, %127 : vector<8x32xf32>
    %cst_56 = arith.constant dense<0.000000e+00> : vector<8xf32>
    %129 = vector.multi_reduction <add>, %128, %cst_56 [1] : vector<8x32xf32> to vector<8xf32>
    %130 = vector.shape_cast %129 : vector<8xf32> to vector<8x1xf32>
    %cst_57 = arith.constant 3.200000e+01 : f32
    %131 = vector.broadcast %cst_57 : f32 to vector<8x1xf32>
    %132 = arith.divf %130, %131 : vector<8x1xf32>
    %133 = vector.broadcast %125 : vector<8x1xf32> to vector<8x32xf32>
    %134 = arith.subf %119, %133 : vector<8x32xf32>
    %cst_58 = arith.constant 9.99999974E-6 : f32
    %135 = vector.broadcast %cst_58 : f32 to vector<8x1xf32>
    %136 = arith.addf %132, %135 : vector<8x1xf32>
    %137 = math.rsqrt %136 : vector<8x1xf32>
    %138 = vector.broadcast %137 : vector<8x1xf32> to vector<8x32xf32>
    %139 = arith.mulf %134, %138 : vector<8x32xf32>
    %140 = vector.broadcast %120 : vector<1x32xf32> to vector<8x32xf32>
    %141 = arith.mulf %139, %140 : vector<8x32xf32>
    %142 = vector.broadcast %121 : vector<1x32xf32> to vector<8x32xf32>
    %143 = arith.addf %141, %142 : vector<8x32xf32>
    %c0_59 = arith.constant 0 : index
    %c0_60 = arith.constant 0 : index
    %c0_61 = arith.constant 0 : index
    %144 = vector.load %arg15[%c0_59, %c0_60, %c0_61] : memref<1x8x32xf32, #tpu.memory_space<vmem>>, vector<1x8x32xf32>
    %145 = vector.shape_cast %144 : vector<1x8x32xf32> to vector<8x32xf32>
    %146 = vector.shape_cast %143 : vector<8x32xf32> to vector<1x8x32xf32>
    tpu.vector_store %arg15[%c0_59, %c0_60, %c0_61], %146 {strides = array<i32>} : memref<1x8x32xf32, #tpu.memory_space<vmem>>, vector<1x8x32xf32>,
    return
  }
  func.func @transform_0(%arg0: i32) -> (i32, i32, i32) {
    %c0_i32 = arith.constant 0 : i32
    %c0_i32_0 = arith.constant 0 : i32
    %c0_i32_1 = arith.constant 0 : i32
    return %arg0, %c0_i32, %c0_i32_0 : i32, i32, i32
  }
  func.func @transform_1(%arg0: i32) -> (i32, i32, i32) {
    %c0_i32 = arith.constant 0 : i32
    %c0_i32_0 = arith.constant 0 : i32
    %c0_i32_1 = arith.constant 0 : i32
    return %arg0, %c0_i32, %c0_i32_0 : i32, i32, i32
  }
  func.func @transform_2(%arg0: i32) -> (i32, i32) {
    %c0_i32 = arith.constant 0 : i32
    %c0_i32_0 = arith.constant 0 : i32
    %c0_i32_1 = arith.constant 0 : i32
    return %c0_i32, %c0_i32_0 : i32, i32
  }
  func.func @transform_3(%arg0: i32) -> (i32, i32) {
    %c0_i32 = arith.constant 0 : i32
    %c0_i32_0 = arith.constant 0 : i32
    %c0_i32_1 = arith.constant 0 : i32
    return %c0_i32, %c0_i32_0 : i32, i32
  }
  func.func @transform_4(%arg0: i32) -> (i32, i32) {
    %c0_i32 = arith.constant 0 : i32
    %c0_i32_0 = arith.constant 0 : i32
    %c0_i32_1 = arith.constant 0 : i32
    return %c0_i32, %c0_i32_0 : i32, i32
  }
  func.func @transform_5(%arg0: i32) -> (i32, i32) {
    %c0_i32 = arith.constant 0 : i32
    %c0_i32_0 = arith.constant 0 : i32
    %c0_i32_1 = arith.constant 0 : i32
    return %c0_i32, %c0_i32_0 : i32, i32
  }
  func.func @transform_6(%arg0: i32) -> (i32, i32) {
    %c0_i32 = arith.constant 0 : i32
    %c0_i32_0 = arith.constant 0 : i32
    %c0_i32_1 = arith.constant 0 : i32
    return %c0_i32, %c0_i32_0 : i32, i32
  }
  func.func @transform_7(%arg0: i32) -> (i32, i32) {
    %c0_i32 = arith.constant 0 : i32
    %c0_i32_0 = arith.constant 0 : i32
    %c0_i32_1 = arith.constant 0 : i32
    return %c0_i32, %c0_i32_0 : i32, i32
  }
  func.func @transform_8(%arg0: i32) -> (i32, i32) {
    %c0_i32 = arith.constant 0 : i32
    %c0_i32_0 = arith.constant 0 : i32
    %c0_i32_1 = arith.constant 0 : i32
    return %c0_i32, %c0_i32_0 : i32, i32
  }
  func.func @transform_9(%arg0: i32) -> (i32, i32) {
    %c0_i32 = arith.constant 0 : i32
    %c0_i32_0 = arith.constant 0 : i32
    %c0_i32_1 = arith.constant 0 : i32
    return %c0_i32, %c0_i32_0 : i32, i32
  }
  func.func @transform_10(%arg0: i32) -> (i32, i32) {
    %c0_i32 = arith.constant 0 : i32
    %c0_i32_0 = arith.constant 0 : i32
    %c0_i32_1 = arith.constant 0 : i32
    return %c0_i32, %c0_i32_0 : i32, i32
  }
  func.func @transform_11(%arg0: i32) -> (i32, i32) {
    %c0_i32 = arith.constant 0 : i32
    %c0_i32_0 = arith.constant 0 : i32
    %c0_i32_1 = arith.constant 0 : i32
    return %c0_i32, %c0_i32_0 : i32, i32
  }
  func.func @transform_12(%arg0: i32) -> (i32, i32) {
    %c0_i32 = arith.constant 0 : i32
    %c0_i32_0 = arith.constant 0 : i32
    %c0_i32_1 = arith.constant 0 : i32
    return %c0_i32, %c0_i32_0 : i32, i32
  }
  func.func @transform_13(%arg0: i32) -> (i32, i32) {
    %c0_i32 = arith.constant 0 : i32
    %c0_i32_0 = arith.constant 0 : i32
    %c0_i32_1 = arith.constant 0 : i32
    return %c0_i32, %c0_i32_0 : i32, i32
  }
  func.func @transform_14(%arg0: i32) -> (i32, i32, i32) {
    %c0_i32 = arith.constant 0 : i32
    %c0_i32_0 = arith.constant 0 : i32
    %c0_i32_1 = arith.constant 0 : i32
    return %arg0, %c0_i32, %c0_i32_0 : i32, i32, i32
  }
}

module attributes {stable_mosaic.version = 11 : i64} {
  func.func @_dec_layer_kernel(%arg0: i32, %arg1: memref<1x8x32xf32, #tpu.memory_space<vmem>>, %arg2: memref<1x8x32xf32, #tpu.memory_space<vmem>>, %arg3: memref<1x8x8xf32, #tpu.memory_space<vmem>>, %arg4: memref<1x8x8xf32, #tpu.memory_space<vmem>>, %arg5: memref<32x96xf32, #tpu.memory_space<vmem>>, %arg6: memref<1x96xf32, #tpu.memory_space<vmem>>, %arg7: memref<32x32xf32, #tpu.memory_space<vmem>>, %arg8: memref<1x32xf32, #tpu.memory_space<vmem>>, %arg9: memref<1x32xf32, #tpu.memory_space<vmem>>, %arg10: memref<1x32xf32, #tpu.memory_space<vmem>>, %arg11: memref<32x32xf32, #tpu.memory_space<vmem>>, %arg12: memref<1x32xf32, #tpu.memory_space<vmem>>, %arg13: memref<32x64xf32, #tpu.memory_space<vmem>>, %arg14: memref<1x64xf32, #tpu.memory_space<vmem>>, %arg15: memref<32x32xf32, #tpu.memory_space<vmem>>, %arg16: memref<1x32xf32, #tpu.memory_space<vmem>>, %arg17: memref<1x32xf32, #tpu.memory_space<vmem>>, %arg18: memref<1x32xf32, #tpu.memory_space<vmem>>, %arg19: memref<32x64xf32, #tpu.memory_space<vmem>>, %arg20: memref<1x64xf32, #tpu.memory_space<vmem>>, %arg21: memref<64x32xf32, #tpu.memory_space<vmem>>, %arg22: memref<1x32xf32, #tpu.memory_space<vmem>>, %arg23: memref<1x32xf32, #tpu.memory_space<vmem>>, %arg24: memref<1x32xf32, #tpu.memory_space<vmem>>, %arg25: memref<1x8x32xf32, #tpu.memory_space<vmem>>) attributes {dimension_semantics = [#tpu.dimension_semantics<parallel>], iteration_bounds = array<i64: 2>, scalar_prefetch = 0 : i64, scratch_operands = 0 : i64, tpu.core_type = #tpu.core_type<tc>, window_params = [{transform_indices = @transform_0, window_bounds = array<i64: 1, 8, 32>}, {transform_indices = @transform_1, window_bounds = array<i64: 1, 8, 32>}, {transform_indices = @transform_2, window_bounds = array<i64: 1, 8, 8>}, {transform_indices = @transform_3, window_bounds = array<i64: 1, 8, 8>}, {pipeline_mode = #tpu.pipeline_mode<synchronous>, transform_indices = @transform_4, window_bounds = array<i64: 32, 96>}, {pipeline_mode = #tpu.pipeline_mode<synchronous>, transform_indices = @transform_5, window_bounds = array<i64: 1, 96>}, {pipeline_mode = #tpu.pipeline_mode<synchronous>, transform_indices = @transform_6, window_bounds = array<i64: 32, 32>}, {pipeline_mode = #tpu.pipeline_mode<synchronous>, transform_indices = @transform_7, window_bounds = array<i64: 1, 32>}, {pipeline_mode = #tpu.pipeline_mode<synchronous>, transform_indices = @transform_8, window_bounds = array<i64: 1, 32>}, {pipeline_mode = #tpu.pipeline_mode<synchronous>, transform_indices = @transform_9, window_bounds = array<i64: 1, 32>}, {pipeline_mode = #tpu.pipeline_mode<synchronous>, transform_indices = @transform_10, window_bounds = array<i64: 32, 32>}, {pipeline_mode = #tpu.pipeline_mode<synchronous>, transform_indices = @transform_11, window_bounds = array<i64: 1, 32>}, {pipeline_mode = #tpu.pipeline_mode<synchronous>, transform_indices = @transform_12, window_bounds = array<i64: 32, 64>}, {pipeline_mode = #tpu.pipeline_mode<synchronous>, transform_indices = @transform_13, window_bounds = array<i64: 1, 64>}, {pipeline_mode = #tpu.pipeline_mode<synchronous>, transform_indices = @transform_14, window_bounds = array<i64: 32, 32>}, {pipeline_mode = #tpu.pipeline_mode<synchronous>, transform_indices = @transform_15, window_bounds = array<i64: 1, 32>}, {pipeline_mode = #tpu.pipeline_mode<synchronous>, transform_indices = @transform_16, window_bounds = array<i64: 1, 32>}, {pipeline_mode = #tpu.pipeline_mode<synchronous>, transform_indices = @transform_17, window_bounds = array<i64: 1, 32>}, {pipeline_mode = #tpu.pipeline_mode<synchronous>, transform_indices = @transform_18, window_bounds = array<i64: 32, 64>}, {pipeline_mode = #tpu.pipeline_mode<synchronous>, transform_indices = @transform_19, window_bounds = array<i64: 1, 64>}, {pipeline_mode = #tpu.pipeline_mode<synchronous>, transform_indices = @transform_20, window_bounds = array<i64: 64, 32>}, {pipeline_mode = #tpu.pipeline_mode<synchronous>, transform_indices = @transform_21, window_bounds = array<i64: 1, 32>}, {pipeline_mode = #tpu.pipeline_mode<synchronous>, transform_indices = @transform_22, window_bounds = array<i64: 1, 32>}, {pipeline_mode = #tpu.pipeline_mode<synchronous>, transform_indices = @transform_23, window_bounds = array<i64: 1, 32>}, {transform_indices = @transform_24, window_bounds = array<i64: 1, 8, 32>}]} {
    %c0 = arith.constant 0 : index
    %c0_0 = arith.constant 0 : index
    %c0_1 = arith.constant 0 : index
    %0 = vector.load %arg1[%c0, %c0_0, %c0_1] : memref<1x8x32xf32, #tpu.memory_space<vmem>>, vector<1x8x32xf32>
    %1 = vector.shape_cast %0 : vector<1x8x32xf32> to vector<8x32xf32>
    %c0_2 = arith.constant 0 : index
    %c0_3 = arith.constant 0 : index
    %c0_4 = arith.constant 0 : index
    %2 = vector.load %arg2[%c0_2, %c0_3, %c0_4] : memref<1x8x32xf32, #tpu.memory_space<vmem>>, vector<1x8x32xf32>
    %3 = vector.shape_cast %2 : vector<1x8x32xf32> to vector<8x32xf32>
    %c0_5 = arith.constant 0 : index
    %c0_6 = arith.constant 0 : index
    %4 = vector.load %arg5[%c0_5, %c0_6] : memref<32x96xf32, #tpu.memory_space<vmem>>, vector<32x96xf32>
    %cst = arith.constant dense<0.000000e+00> : vector<8x96xf32>
    %5 = tpu.matmul %1, %4, %cst {dimension_numbers = #tpu.dot_dimension_numbers<[1], [0], [0], [1], [0, 0, 1, 1], [], []>} : vector<8x32xf32>, vector<32x96xf32>, vector<8x96xf32> -> vector<8x96xf32>
    %c0_7 = arith.constant 0 : index
    %c0_8 = arith.constant 0 : index
    %6 = vector.load %arg6[%c0_7, %c0_8] : memref<1x96xf32, #tpu.memory_space<vmem>>, vector<1x96xf32>
    %7 = vector.broadcast %6 : vector<1x96xf32> to vector<8x96xf32>
    %8 = arith.addf %5, %7 : vector<8x96xf32>
    %9 = vector.extract_strided_slice %8 {offsets = [0, 0], sizes = [8, 32], strides = [1, 1]} : vector<8x96xf32> to vector<8x32xf32>
    %10 = vector.extract_strided_slice %8 {offsets = [0, 32], sizes = [8, 32], strides = [1, 1]} : vector<8x96xf32> to vector<8x32xf32>
    %11 = vector.extract_strided_slice %8 {offsets = [0, 64], sizes = [8, 32], strides = [1, 1]} : vector<8x96xf32> to vector<8x32xf32>
    %c0_9 = arith.constant 0 : index
    %c0_10 = arith.constant 0 : index
    %c0_11 = arith.constant 0 : index
    %12 = vector.load %arg3[%c0_9, %c0_10, %c0_11] : memref<1x8x8xf32, #tpu.memory_space<vmem>>, vector<1x8x8xf32>
    %13 = vector.shape_cast %12 : vector<1x8x8xf32> to vector<8x8xf32>
    %14 = vector.extract_strided_slice %9 {offsets = [0, 0], sizes = [8, 8], strides = [1, 1]} : vector<8x32xf32> to vector<8x8xf32>
    %15 = vector.extract_strided_slice %10 {offsets = [0, 0], sizes = [8, 8], strides = [1, 1]} : vector<8x32xf32> to vector<8x8xf32>
    %16 = vector.extract_strided_slice %11 {offsets = [0, 0], sizes = [8, 8], strides = [1, 1]} : vector<8x32xf32> to vector<8x8xf32>
    %cst_12 = arith.constant dense<0.000000e+00> : vector<8x8xf32>
    %17 = tpu.matmul %14, %15, %cst_12 {dimension_numbers = #tpu.dot_dimension_numbers<[1], [1], [0], [0], [0, 0, 1, 0], [], []>} : vector<8x8xf32>, vector<8x8xf32>, vector<8x8xf32> -> vector<8x8xf32>
    %18 = arith.addf %17, %13 : vector<8x8xf32>
    %cst_13 = arith.constant dense<0xFF800000> : vector<8xf32>
    %19 = vector.multi_reduction <maximumf>, %18, %cst_13 [1] : vector<8x8xf32> to vector<8xf32>
    %20 = vector.shape_cast %19 : vector<8xf32> to vector<8x1xf32>
    %21 = vector.broadcast %20 : vector<8x1xf32> to vector<8x8xf32>
    %22 = arith.subf %18, %21 : vector<8x8xf32>
    %23 = math.exp %22 : vector<8x8xf32>
    %cst_14 = arith.constant dense<0.000000e+00> : vector<8xf32>
    %24 = vector.multi_reduction <add>, %23, %cst_14 [1] : vector<8x8xf32> to vector<8xf32>
    %25 = vector.shape_cast %24 : vector<8xf32> to vector<8x1xf32>
    %26 = tpu.reciprocal %25 {approx = true} : vector<8x1xf32> -> vector<8x1xf32>
    %27 = vector.broadcast %26 : vector<8x1xf32> to vector<8x8xf32>
    %28 = arith.mulf %23, %27 : vector<8x8xf32>
    %cst_15 = arith.constant dense<0.000000e+00> : vector<8x8xf32>
    %29 = tpu.matmul %28, %16, %cst_15 {dimension_numbers = #tpu.dot_dimension_numbers<[1], [0], [0], [1], [0, 0, 1, 1], [], []>} : vector<8x8xf32>, vector<8x8xf32>, vector<8x8xf32> -> vector<8x8xf32>
    %30 = vector.extract_strided_slice %9 {offsets = [0, 8], sizes = [8, 8], strides = [1, 1]} : vector<8x32xf32> to vector<8x8xf32>
    %31 = vector.extract_strided_slice %10 {offsets = [0, 8], sizes = [8, 8], strides = [1, 1]} : vector<8x32xf32> to vector<8x8xf32>
    %32 = vector.extract_strided_slice %11 {offsets = [0, 8], sizes = [8, 8], strides = [1, 1]} : vector<8x32xf32> to vector<8x8xf32>
    %cst_16 = arith.constant dense<0.000000e+00> : vector<8x8xf32>
    %33 = tpu.matmul %30, %31, %cst_16 {dimension_numbers = #tpu.dot_dimension_numbers<[1], [1], [0], [0], [0, 0, 1, 0], [], []>} : vector<8x8xf32>, vector<8x8xf32>, vector<8x8xf32> -> vector<8x8xf32>
    %34 = arith.addf %33, %13 : vector<8x8xf32>
    %cst_17 = arith.constant dense<0xFF800000> : vector<8xf32>
    %35 = vector.multi_reduction <maximumf>, %34, %cst_17 [1] : vector<8x8xf32> to vector<8xf32>
    %36 = vector.shape_cast %35 : vector<8xf32> to vector<8x1xf32>
    %37 = vector.broadcast %36 : vector<8x1xf32> to vector<8x8xf32>
    %38 = arith.subf %34, %37 : vector<8x8xf32>
    %39 = math.exp %38 : vector<8x8xf32>
    %cst_18 = arith.constant dense<0.000000e+00> : vector<8xf32>
    %40 = vector.multi_reduction <add>, %39, %cst_18 [1] : vector<8x8xf32> to vector<8xf32>
    %41 = vector.shape_cast %40 : vector<8xf32> to vector<8x1xf32>
    %42 = tpu.reciprocal %41 {approx = true} : vector<8x1xf32> -> vector<8x1xf32>
    %43 = vector.broadcast %42 : vector<8x1xf32> to vector<8x8xf32>
    %44 = arith.mulf %39, %43 : vector<8x8xf32>
    %cst_19 = arith.constant dense<0.000000e+00> : vector<8x8xf32>
    %45 = tpu.matmul %44, %32, %cst_19 {dimension_numbers = #tpu.dot_dimension_numbers<[1], [0], [0], [1], [0, 0, 1, 1], [], []>} : vector<8x8xf32>, vector<8x8xf32>, vector<8x8xf32> -> vector<8x8xf32>
    %46 = vector.extract_strided_slice %9 {offsets = [0, 16], sizes = [8, 8], strides = [1, 1]} : vector<8x32xf32> to vector<8x8xf32>
    %47 = vector.extract_strided_slice %10 {offsets = [0, 16], sizes = [8, 8], strides = [1, 1]} : vector<8x32xf32> to vector<8x8xf32>
    %48 = vector.extract_strided_slice %11 {offsets = [0, 16], sizes = [8, 8], strides = [1, 1]} : vector<8x32xf32> to vector<8x8xf32>
    %cst_20 = arith.constant dense<0.000000e+00> : vector<8x8xf32>
    %49 = tpu.matmul %46, %47, %cst_20 {dimension_numbers = #tpu.dot_dimension_numbers<[1], [1], [0], [0], [0, 0, 1, 0], [], []>} : vector<8x8xf32>, vector<8x8xf32>, vector<8x8xf32> -> vector<8x8xf32>
    %50 = arith.addf %49, %13 : vector<8x8xf32>
    %cst_21 = arith.constant dense<0xFF800000> : vector<8xf32>
    %51 = vector.multi_reduction <maximumf>, %50, %cst_21 [1] : vector<8x8xf32> to vector<8xf32>
    %52 = vector.shape_cast %51 : vector<8xf32> to vector<8x1xf32>
    %53 = vector.broadcast %52 : vector<8x1xf32> to vector<8x8xf32>
    %54 = arith.subf %50, %53 : vector<8x8xf32>
    %55 = math.exp %54 : vector<8x8xf32>
    %cst_22 = arith.constant dense<0.000000e+00> : vector<8xf32>
    %56 = vector.multi_reduction <add>, %55, %cst_22 [1] : vector<8x8xf32> to vector<8xf32>
    %57 = vector.shape_cast %56 : vector<8xf32> to vector<8x1xf32>
    %58 = tpu.reciprocal %57 {approx = true} : vector<8x1xf32> -> vector<8x1xf32>
    %59 = vector.broadcast %58 : vector<8x1xf32> to vector<8x8xf32>
    %60 = arith.mulf %55, %59 : vector<8x8xf32>
    %cst_23 = arith.constant dense<0.000000e+00> : vector<8x8xf32>
    %61 = tpu.matmul %60, %48, %cst_23 {dimension_numbers = #tpu.dot_dimension_numbers<[1], [0], [0], [1], [0, 0, 1, 1], [], []>} : vector<8x8xf32>, vector<8x8xf32>, vector<8x8xf32> -> vector<8x8xf32>
    %62 = vector.extract_strided_slice %9 {offsets = [0, 24], sizes = [8, 8], strides = [1, 1]} : vector<8x32xf32> to vector<8x8xf32>
    %63 = vector.extract_strided_slice %10 {offsets = [0, 24], sizes = [8, 8], strides = [1, 1]} : vector<8x32xf32> to vector<8x8xf32>
    %64 = vector.extract_strided_slice %11 {offsets = [0, 24], sizes = [8, 8], strides = [1, 1]} : vector<8x32xf32> to vector<8x8xf32>
    %cst_24 = arith.constant dense<0.000000e+00> : vector<8x8xf32>
    %65 = tpu.matmul %62, %63, %cst_24 {dimension_numbers = #tpu.dot_dimension_numbers<[1], [1], [0], [0], [0, 0, 1, 0], [], []>} : vector<8x8xf32>, vector<8x8xf32>, vector<8x8xf32> -> vector<8x8xf32>
    %66 = arith.addf %65, %13 : vector<8x8xf32>
    %cst_25 = arith.constant dense<0xFF800000> : vector<8xf32>
    %67 = vector.multi_reduction <maximumf>, %66, %cst_25 [1] : vector<8x8xf32> to vector<8xf32>
    %68 = vector.shape_cast %67 : vector<8xf32> to vector<8x1xf32>
    %69 = vector.broadcast %68 : vector<8x1xf32> to vector<8x8xf32>
    %70 = arith.subf %66, %69 : vector<8x8xf32>
    %71 = math.exp %70 : vector<8x8xf32>
    %cst_26 = arith.constant dense<0.000000e+00> : vector<8xf32>
    %72 = vector.multi_reduction <add>, %71, %cst_26 [1] : vector<8x8xf32> to vector<8xf32>
    %73 = vector.shape_cast %72 : vector<8xf32> to vector<8x1xf32>
    %74 = tpu.reciprocal %73 {approx = true} : vector<8x1xf32> -> vector<8x1xf32>
    %75 = vector.broadcast %74 : vector<8x1xf32> to vector<8x8xf32>
    %76 = arith.mulf %71, %75 : vector<8x8xf32>
    %cst_27 = arith.constant dense<0.000000e+00> : vector<8x8xf32>
    %77 = tpu.matmul %76, %64, %cst_27 {dimension_numbers = #tpu.dot_dimension_numbers<[1], [0], [0], [1], [0, 0, 1, 1], [], []>} : vector<8x8xf32>, vector<8x8xf32>, vector<8x8xf32> -> vector<8x8xf32>
    %78 = tpu.concatenate %29, %45, %61, %77 in 1 : vector<8x8xf32>, vector<8x8xf32>, vector<8x8xf32>, vector<8x8xf32> -> vector<8x32xf32>
    %c0_28 = arith.constant 0 : index
    %c0_29 = arith.constant 0 : index
    %79 = vector.load %arg7[%c0_28, %c0_29] : memref<32x32xf32, #tpu.memory_space<vmem>>, vector<32x32xf32>
    %cst_30 = arith.constant dense<0.000000e+00> : vector<8x32xf32>
    %80 = tpu.matmul %78, %79, %cst_30 {dimension_numbers = #tpu.dot_dimension_numbers<[1], [0], [0], [1], [0, 0, 1, 1], [], []>} : vector<8x32xf32>, vector<32x32xf32>, vector<8x32xf32> -> vector<8x32xf32>
    %c0_31 = arith.constant 0 : index
    %c0_32 = arith.constant 0 : index
    %81 = vector.load %arg8[%c0_31, %c0_32] : memref<1x32xf32, #tpu.memory_space<vmem>>, vector<1x32xf32>
    %82 = vector.broadcast %81 : vector<1x32xf32> to vector<8x32xf32>
    %83 = arith.addf %80, %82 : vector<8x32xf32>
    %84 = arith.addf %1, %83 : vector<8x32xf32>
    %c0_33 = arith.constant 0 : index
    %c0_34 = arith.constant 0 : index
    %85 = vector.load %arg9[%c0_33, %c0_34] : memref<1x32xf32, #tpu.memory_space<vmem>>, vector<1x32xf32>
    %c0_35 = arith.constant 0 : index
    %c0_36 = arith.constant 0 : index
    %86 = vector.load %arg10[%c0_35, %c0_36] : memref<1x32xf32, #tpu.memory_space<vmem>>, vector<1x32xf32>
    %cst_37 = arith.constant dense<0.000000e+00> : vector<8xf32>
    %87 = vector.multi_reduction <add>, %84, %cst_37 [1] : vector<8x32xf32> to vector<8xf32>
    %88 = vector.shape_cast %87 : vector<8xf32> to vector<8x1xf32>
    %cst_38 = arith.constant 3.200000e+01 : f32
    %89 = vector.broadcast %cst_38 : f32 to vector<8x1xf32>
    %90 = arith.divf %88, %89 : vector<8x1xf32>
    %91 = vector.broadcast %90 : vector<8x1xf32> to vector<8x32xf32>
    %92 = arith.subf %84, %91 : vector<8x32xf32>
    %93 = arith.mulf %92, %92 : vector<8x32xf32>
    %cst_39 = arith.constant dense<0.000000e+00> : vector<8xf32>
    %94 = vector.multi_reduction <add>, %93, %cst_39 [1] : vector<8x32xf32> to vector<8xf32>
    %95 = vector.shape_cast %94 : vector<8xf32> to vector<8x1xf32>
    %cst_40 = arith.constant 3.200000e+01 : f32
    %96 = vector.broadcast %cst_40 : f32 to vector<8x1xf32>
    %97 = arith.divf %95, %96 : vector<8x1xf32>
    %98 = vector.broadcast %90 : vector<8x1xf32> to vector<8x32xf32>
    %99 = arith.subf %84, %98 : vector<8x32xf32>
    %cst_41 = arith.constant 9.99999974E-6 : f32
    %100 = vector.broadcast %cst_41 : f32 to vector<8x1xf32>
    %101 = arith.addf %97, %100 : vector<8x1xf32>
    %102 = math.rsqrt %101 : vector<8x1xf32>
    %103 = vector.broadcast %102 : vector<8x1xf32> to vector<8x32xf32>
    %104 = arith.mulf %99, %103 : vector<8x32xf32>
    %105 = vector.broadcast %85 : vector<1x32xf32> to vector<8x32xf32>
    %106 = arith.mulf %104, %105 : vector<8x32xf32>
    %107 = vector.broadcast %86 : vector<1x32xf32> to vector<8x32xf32>
    %108 = arith.addf %106, %107 : vector<8x32xf32>
    %c0_42 = arith.constant 0 : index
    %c0_43 = arith.constant 0 : index
    %109 = vector.load %arg11[%c0_42, %c0_43] : memref<32x32xf32, #tpu.memory_space<vmem>>, vector<32x32xf32>
    %cst_44 = arith.constant dense<0.000000e+00> : vector<8x32xf32>
    %110 = tpu.matmul %108, %109, %cst_44 {dimension_numbers = #tpu.dot_dimension_numbers<[1], [0], [0], [1], [0, 0, 1, 1], [], []>} : vector<8x32xf32>, vector<32x32xf32>, vector<8x32xf32> -> vector<8x32xf32>
    %c0_45 = arith.constant 0 : index
    %c0_46 = arith.constant 0 : index
    %111 = vector.load %arg12[%c0_45, %c0_46] : memref<1x32xf32, #tpu.memory_space<vmem>>, vector<1x32xf32>
    %112 = vector.broadcast %111 : vector<1x32xf32> to vector<8x32xf32>
    %113 = arith.addf %110, %112 : vector<8x32xf32>
    %c0_47 = arith.constant 0 : index
    %c0_48 = arith.constant 0 : index
    %114 = vector.load %arg13[%c0_47, %c0_48] : memref<32x64xf32, #tpu.memory_space<vmem>>, vector<32x64xf32>
    %cst_49 = arith.constant dense<0.000000e+00> : vector<8x64xf32>
    %115 = tpu.matmul %3, %114, %cst_49 {dimension_numbers = #tpu.dot_dimension_numbers<[1], [0], [0], [1], [0, 0, 1, 1], [], []>} : vector<8x32xf32>, vector<32x64xf32>, vector<8x64xf32> -> vector<8x64xf32>
    %c0_50 = arith.constant 0 : index
    %c0_51 = arith.constant 0 : index
    %116 = vector.load %arg14[%c0_50, %c0_51] : memref<1x64xf32, #tpu.memory_space<vmem>>, vector<1x64xf32>
    %117 = vector.broadcast %116 : vector<1x64xf32> to vector<8x64xf32>
    %118 = arith.addf %115, %117 : vector<8x64xf32>
    %119 = vector.extract_strided_slice %118 {offsets = [0, 0], sizes = [8, 32], strides = [1, 1]} : vector<8x64xf32> to vector<8x32xf32>
    %120 = vector.extract_strided_slice %118 {offsets = [0, 32], sizes = [8, 32], strides = [1, 1]} : vector<8x64xf32> to vector<8x32xf32>
    %c0_52 = arith.constant 0 : index
    %c0_53 = arith.constant 0 : index
    %c0_54 = arith.constant 0 : index
    %121 = vector.load %arg4[%c0_52, %c0_53, %c0_54] : memref<1x8x8xf32, #tpu.memory_space<vmem>>, vector<1x8x8xf32>
    %122 = vector.shape_cast %121 : vector<1x8x8xf32> to vector<8x8xf32>
    %123 = vector.extract_strided_slice %113 {offsets = [0, 0], sizes = [8, 8], strides = [1, 1]} : vector<8x32xf32> to vector<8x8xf32>
    %124 = vector.extract_strided_slice %119 {offsets = [0, 0], sizes = [8, 8], strides = [1, 1]} : vector<8x32xf32> to vector<8x8xf32>
    %125 = vector.extract_strided_slice %120 {offsets = [0, 0], sizes = [8, 8], strides = [1, 1]} : vector<8x32xf32> to vector<8x8xf32>
    %cst_55 = arith.constant dense<0.000000e+00> : vector<8x8xf32>
    %126 = tpu.matmul %123, %124, %cst_55 {dimension_numbers = #tpu.dot_dimension_numbers<[1], [1], [0], [0], [0, 0, 1, 0], [], []>} : vector<8x8xf32>, vector<8x8xf32>, vector<8x8xf32> -> vector<8x8xf32>
    %127 = arith.addf %126, %122 : vector<8x8xf32>
    %cst_56 = arith.constant dense<0xFF800000> : vector<8xf32>
    %128 = vector.multi_reduction <maximumf>, %127, %cst_56 [1] : vector<8x8xf32> to vector<8xf32>
    %129 = vector.shape_cast %128 : vector<8xf32> to vector<8x1xf32>
    %130 = vector.broadcast %129 : vector<8x1xf32> to vector<8x8xf32>
    %131 = arith.subf %127, %130 : vector<8x8xf32>
    %132 = math.exp %131 : vector<8x8xf32>
    %cst_57 = arith.constant dense<0.000000e+00> : vector<8xf32>
    %133 = vector.multi_reduction <add>, %132, %cst_57 [1] : vector<8x8xf32> to vector<8xf32>
    %134 = vector.shape_cast %133 : vector<8xf32> to vector<8x1xf32>
    %135 = tpu.reciprocal %134 {approx = true} : vector<8x1xf32> -> vector<8x1xf32>
    %136 = vector.broadcast %135 : vector<8x1xf32> to vector<8x8xf32>
    %137 = arith.mulf %132, %136 : vector<8x8xf32>
    %cst_58 = arith.constant dense<0.000000e+00> : vector<8x8xf32>
    %138 = tpu.matmul %137, %125, %cst_58 {dimension_numbers = #tpu.dot_dimension_numbers<[1], [0], [0], [1], [0, 0, 1, 1], [], []>} : vector<8x8xf32>, vector<8x8xf32>, vector<8x8xf32> -> vector<8x8xf32>
    %139 = vector.extract_strided_slice %113 {offsets = [0, 8], sizes = [8, 8], strides = [1, 1]} : vector<8x32xf32> to vector<8x8xf32>
    %140 = vector.extract_strided_slice %119 {offsets = [0, 8], sizes = [8, 8], strides = [1, 1]} : vector<8x32xf32> to vector<8x8xf32>
    %141 = vector.extract_strided_slice %120 {offsets = [0, 8], sizes = [8, 8], strides = [1, 1]} : vector<8x32xf32> to vector<8x8xf32>
    %cst_59 = arith.constant dense<0.000000e+00> : vector<8x8xf32>
    %142 = tpu.matmul %139, %140, %cst_59 {dimension_numbers = #tpu.dot_dimension_numbers<[1], [1], [0], [0], [0, 0, 1, 0], [], []>} : vector<8x8xf32>, vector<8x8xf32>, vector<8x8xf32> -> vector<8x8xf32>
    %143 = arith.addf %142, %122 : vector<8x8xf32>
    %cst_60 = arith.constant dense<0xFF800000> : vector<8xf32>
    %144 = vector.multi_reduction <maximumf>, %143, %cst_60 [1] : vector<8x8xf32> to vector<8xf32>
    %145 = vector.shape_cast %144 : vector<8xf32> to vector<8x1xf32>
    %146 = vector.broadcast %145 : vector<8x1xf32> to vector<8x8xf32>
    %147 = arith.subf %143, %146 : vector<8x8xf32>
    %148 = math.exp %147 : vector<8x8xf32>
    %cst_61 = arith.constant dense<0.000000e+00> : vector<8xf32>
    %149 = vector.multi_reduction <add>, %148, %cst_61 [1] : vector<8x8xf32> to vector<8xf32>
    %150 = vector.shape_cast %149 : vector<8xf32> to vector<8x1xf32>
    %151 = tpu.reciprocal %150 {approx = true} : vector<8x1xf32> -> vector<8x1xf32>
    %152 = vector.broadcast %151 : vector<8x1xf32> to vector<8x8xf32>
    %153 = arith.mulf %148, %152 : vector<8x8xf32>
    %cst_62 = arith.constant dense<0.000000e+00> : vector<8x8xf32>
    %154 = tpu.matmul %153, %141, %cst_62 {dimension_numbers = #tpu.dot_dimension_numbers<[1], [0], [0], [1], [0, 0, 1, 1], [], []>} : vector<8x8xf32>, vector<8x8xf32>, vector<8x8xf32> -> vector<8x8xf32>
    %155 = vector.extract_strided_slice %113 {offsets = [0, 16], sizes = [8, 8], strides = [1, 1]} : vector<8x32xf32> to vector<8x8xf32>
    %156 = vector.extract_strided_slice %119 {offsets = [0, 16], sizes = [8, 8], strides = [1, 1]} : vector<8x32xf32> to vector<8x8xf32>
    %157 = vector.extract_strided_slice %120 {offsets = [0, 16], sizes = [8, 8], strides = [1, 1]} : vector<8x32xf32> to vector<8x8xf32>
    %cst_63 = arith.constant dense<0.000000e+00> : vector<8x8xf32>
    %158 = tpu.matmul %155, %156, %cst_63 {dimension_numbers = #tpu.dot_dimension_numbers<[1], [1], [0], [0], [0, 0, 1, 0], [], []>} : vector<8x8xf32>, vector<8x8xf32>, vector<8x8xf32> -> vector<8x8xf32>
    %159 = arith.addf %158, %122 : vector<8x8xf32>
    %cst_64 = arith.constant dense<0xFF800000> : vector<8xf32>
    %160 = vector.multi_reduction <maximumf>, %159, %cst_64 [1] : vector<8x8xf32> to vector<8xf32>
    %161 = vector.shape_cast %160 : vector<8xf32> to vector<8x1xf32>
    %162 = vector.broadcast %161 : vector<8x1xf32> to vector<8x8xf32>
    %163 = arith.subf %159, %162 : vector<8x8xf32>
    %164 = math.exp %163 : vector<8x8xf32>
    %cst_65 = arith.constant dense<0.000000e+00> : vector<8xf32>
    %165 = vector.multi_reduction <add>, %164, %cst_65 [1] : vector<8x8xf32> to vector<8xf32>
    %166 = vector.shape_cast %165 : vector<8xf32> to vector<8x1xf32>
    %167 = tpu.reciprocal %166 {approx = true} : vector<8x1xf32> -> vector<8x1xf32>
    %168 = vector.broadcast %167 : vector<8x1xf32> to vector<8x8xf32>
    %169 = arith.mulf %164, %168 : vector<8x8xf32>
    %cst_66 = arith.constant dense<0.000000e+00> : vector<8x8xf32>
    %170 = tpu.matmul %169, %157, %cst_66 {dimension_numbers = #tpu.dot_dimension_numbers<[1], [0], [0], [1], [0, 0, 1, 1], [], []>} : vector<8x8xf32>, vector<8x8xf32>, vector<8x8xf32> -> vector<8x8xf32>
    %171 = vector.extract_strided_slice %113 {offsets = [0, 24], sizes = [8, 8], strides = [1, 1]} : vector<8x32xf32> to vector<8x8xf32>
    %172 = vector.extract_strided_slice %119 {offsets = [0, 24], sizes = [8, 8], strides = [1, 1]} : vector<8x32xf32> to vector<8x8xf32>
    %173 = vector.extract_strided_slice %120 {offsets = [0, 24], sizes = [8, 8], strides = [1, 1]} : vector<8x32xf32> to vector<8x8xf32>
    %cst_67 = arith.constant dense<0.000000e+00> : vector<8x8xf32>
    %174 = tpu.matmul %171, %172, %cst_67 {dimension_numbers = #tpu.dot_dimension_numbers<[1], [1], [0], [0], [0, 0, 1, 0], [], []>} : vector<8x8xf32>, vector<8x8xf32>, vector<8x8xf32> -> vector<8x8xf32>
    %175 = arith.addf %174, %122 : vector<8x8xf32>
    %cst_68 = arith.constant dense<0xFF800000> : vector<8xf32>
    %176 = vector.multi_reduction <maximumf>, %175, %cst_68 [1] : vector<8x8xf32> to vector<8xf32>
    %177 = vector.shape_cast %176 : vector<8xf32> to vector<8x1xf32>
    %178 = vector.broadcast %177 : vector<8x1xf32> to vector<8x8xf32>
    %179 = arith.subf %175, %178 : vector<8x8xf32>
    %180 = math.exp %179 : vector<8x8xf32>
    %cst_69 = arith.constant dense<0.000000e+00> : vector<8xf32>
    %181 = vector.multi_reduction <add>, %180, %cst_69 [1] : vector<8x8xf32> to vector<8xf32>
    %182 = vector.shape_cast %181 : vector<8xf32> to vector<8x1xf32>
    %183 = tpu.reciprocal %182 {approx = true} : vector<8x1xf32> -> vector<8x1xf32>
    %184 = vector.broadcast %183 : vector<8x1xf32> to vector<8x8xf32>
    %185 = arith.mulf %180, %184 : vector<8x8xf32>
    %cst_70 = arith.constant dense<0.000000e+00> : vector<8x8xf32>
    %186 = tpu.matmul %185, %173, %cst_70 {dimension_numbers = #tpu.dot_dimension_numbers<[1], [0], [0], [1], [0, 0, 1, 1], [], []>} : vector<8x8xf32>, vector<8x8xf32>, vector<8x8xf32> -> vector<8x8xf32>
    %187 = tpu.concatenate %138, %154, %170, %186 in 1 : vector<8x8xf32>, vector<8x8xf32>, vector<8x8xf32>, vector<8x8xf32> -> vector<8x32xf32>
    %c0_71 = arith.constant 0 : index
    %c0_72 = arith.constant 0 : index
    %188 = vector.load %arg15[%c0_71, %c0_72] : memref<32x32xf32, #tpu.memory_space<vmem>>, vector<32x32xf32>
    %cst_73 = arith.constant dense<0.000000e+00> : vector<8x32xf32>
    %189 = tpu.matmul %187, %188, %cst_73 {dimension_numbers = #tpu.dot_dimension_numbers<[1], [0], [0], [1], [0, 0, 1, 1], [], []>} : vector<8x32xf32>, vector<32x32xf32>, vector<8x32xf32> -> vector<8x32xf32>
    %c0_74 = arith.constant 0 : index
    %c0_75 = arith.constant 0 : index
    %190 = vector.load %arg16[%c0_74, %c0_75] : memref<1x32xf32, #tpu.memory_space<vmem>>, vector<1x32xf32>
    %191 = vector.broadcast %190 : vector<1x32xf32> to vector<8x32xf32>
    %192 = arith.addf %189, %191 : vector<8x32xf32>
    %193 = arith.addf %108, %192 : vector<8x32xf32>
    %c0_76 = arith.constant 0 : index
    %c0_77 = arith.constant 0 : index
    %194 = vector.load %arg17[%c0_76, %c0_77] : memref<1x32xf32, #tpu.memory_space<vmem>>, vector<1x32xf32>
    %c0_78 = arith.constant 0 : index
    %c0_79 = arith.constant 0 : index
    %195 = vector.load %arg18[%c0_78, %c0_79] : memref<1x32xf32, #tpu.memory_space<vmem>>, vector<1x32xf32>
    %cst_80 = arith.constant dense<0.000000e+00> : vector<8xf32>
    %196 = vector.multi_reduction <add>, %193, %cst_80 [1] : vector<8x32xf32> to vector<8xf32>
    %197 = vector.shape_cast %196 : vector<8xf32> to vector<8x1xf32>
    %cst_81 = arith.constant 3.200000e+01 : f32
    %198 = vector.broadcast %cst_81 : f32 to vector<8x1xf32>
    %199 = arith.divf %197, %198 : vector<8x1xf32>
    %200 = vector.broadcast %199 : vector<8x1xf32> to vector<8x32xf32>
    %201 = arith.subf %193, %200 : vector<8x32xf32>
    %202 = arith.mulf %201, %201 : vector<8x32xf32>
    %cst_82 = arith.constant dense<0.000000e+00> : vector<8xf32>
    %203 = vector.multi_reduction <add>, %202, %cst_82 [1] : vector<8x32xf32> to vector<8xf32>
    %204 = vector.shape_cast %203 : vector<8xf32> to vector<8x1xf32>
    %cst_83 = arith.constant 3.200000e+01 : f32
    %205 = vector.broadcast %cst_83 : f32 to vector<8x1xf32>
    %206 = arith.divf %204, %205 : vector<8x1xf32>
    %207 = vector.broadcast %199 : vector<8x1xf32> to vector<8x32xf32>
    %208 = arith.subf %193, %207 : vector<8x32xf32>
    %cst_84 = arith.constant 9.99999974E-6 : f32
    %209 = vector.broadcast %cst_84 : f32 to vector<8x1xf32>
    %210 = arith.addf %206, %209 : vector<8x1xf32>
    %211 = math.rsqrt %210 : vector<8x1xf32>
    %212 = vector.broadcast %211 : vector<8x1xf32> to vector<8x32xf32>
    %213 = arith.mulf %208, %212 : vector<8x32xf32>
    %214 = vector.broadcast %194 : vector<1x32xf32> to vector<8x32xf32>
    %215 = arith.mulf %213, %214 : vector<8x32xf32>
    %216 = vector.broadcast %195 : vector<1x32xf32> to vector<8x32xf32>
    %217 = arith.addf %215, %216 : vector<8x32xf32>
    %c0_85 = arith.constant 0 : index
    %c0_86 = arith.constant 0 : index
    %218 = vector.load %arg19[%c0_85, %c0_86] : memref<32x64xf32, #tpu.memory_space<vmem>>, vector<32x64xf32>
    %cst_87 = arith.constant dense<0.000000e+00> : vector<8x64xf32>
    %219 = tpu.matmul %217, %218, %cst_87 {dimension_numbers = #tpu.dot_dimension_numbers<[1], [0], [0], [1], [0, 0, 1, 1], [], []>} : vector<8x32xf32>, vector<32x64xf32>, vector<8x64xf32> -> vector<8x64xf32>
    %c0_88 = arith.constant 0 : index
    %c0_89 = arith.constant 0 : index
    %220 = vector.load %arg20[%c0_88, %c0_89] : memref<1x64xf32, #tpu.memory_space<vmem>>, vector<1x64xf32>
    %221 = vector.broadcast %220 : vector<1x64xf32> to vector<8x64xf32>
    %222 = arith.addf %219, %221 : vector<8x64xf32>
    %cst_90 = arith.constant 0.000000e+00 : f32
    %223 = vector.broadcast %cst_90 : f32 to vector<8x64xf32>
    %224 = arith.maximumf %222, %223 : vector<8x64xf32>
    %c0_91 = arith.constant 0 : index
    %c0_92 = arith.constant 0 : index
    %225 = vector.load %arg21[%c0_91, %c0_92] : memref<64x32xf32, #tpu.memory_space<vmem>>, vector<64x32xf32>
    %cst_93 = arith.constant dense<0.000000e+00> : vector<8x32xf32>
    %226 = tpu.matmul %224, %225, %cst_93 {dimension_numbers = #tpu.dot_dimension_numbers<[1], [0], [0], [1], [0, 0, 1, 1], [], []>} : vector<8x64xf32>, vector<64x32xf32>, vector<8x32xf32> -> vector<8x32xf32>
    %c0_94 = arith.constant 0 : index
    %c0_95 = arith.constant 0 : index
    %227 = vector.load %arg22[%c0_94, %c0_95] : memref<1x32xf32, #tpu.memory_space<vmem>>, vector<1x32xf32>
    %228 = vector.broadcast %227 : vector<1x32xf32> to vector<8x32xf32>
    %229 = arith.addf %226, %228 : vector<8x32xf32>
    %230 = arith.addf %217, %229 : vector<8x32xf32>
    %c0_96 = arith.constant 0 : index
    %c0_97 = arith.constant 0 : index
    %231 = vector.load %arg23[%c0_96, %c0_97] : memref<1x32xf32, #tpu.memory_space<vmem>>, vector<1x32xf32>
    %c0_98 = arith.constant 0 : index
    %c0_99 = arith.constant 0 : index
    %232 = vector.load %arg24[%c0_98, %c0_99] : memref<1x32xf32, #tpu.memory_space<vmem>>, vector<1x32xf32>
    %cst_100 = arith.constant dense<0.000000e+00> : vector<8xf32>
    %233 = vector.multi_reduction <add>, %230, %cst_100 [1] : vector<8x32xf32> to vector<8xf32>
    %234 = vector.shape_cast %233 : vector<8xf32> to vector<8x1xf32>
    %cst_101 = arith.constant 3.200000e+01 : f32
    %235 = vector.broadcast %cst_101 : f32 to vector<8x1xf32>
    %236 = arith.divf %234, %235 : vector<8x1xf32>
    %237 = vector.broadcast %236 : vector<8x1xf32> to vector<8x32xf32>
    %238 = arith.subf %230, %237 : vector<8x32xf32>
    %239 = arith.mulf %238, %238 : vector<8x32xf32>
    %cst_102 = arith.constant dense<0.000000e+00> : vector<8xf32>
    %240 = vector.multi_reduction <add>, %239, %cst_102 [1] : vector<8x32xf32> to vector<8xf32>
    %241 = vector.shape_cast %240 : vector<8xf32> to vector<8x1xf32>
    %cst_103 = arith.constant 3.200000e+01 : f32
    %242 = vector.broadcast %cst_103 : f32 to vector<8x1xf32>
    %243 = arith.divf %241, %242 : vector<8x1xf32>
    %244 = vector.broadcast %236 : vector<8x1xf32> to vector<8x32xf32>
    %245 = arith.subf %230, %244 : vector<8x32xf32>
    %cst_104 = arith.constant 9.99999974E-6 : f32
    %246 = vector.broadcast %cst_104 : f32 to vector<8x1xf32>
    %247 = arith.addf %243, %246 : vector<8x1xf32>
    %248 = math.rsqrt %247 : vector<8x1xf32>
    %249 = vector.broadcast %248 : vector<8x1xf32> to vector<8x32xf32>
    %250 = arith.mulf %245, %249 : vector<8x32xf32>
    %251 = vector.broadcast %231 : vector<1x32xf32> to vector<8x32xf32>
    %252 = arith.mulf %250, %251 : vector<8x32xf32>
    %253 = vector.broadcast %232 : vector<1x32xf32> to vector<8x32xf32>
    %254 = arith.addf %252, %253 : vector<8x32xf32>
    %c0_105 = arith.constant 0 : index
    %c0_106 = arith.constant 0 : index
    %c0_107 = arith.constant 0 : index
    %255 = vector.load %arg25[%c0_105, %c0_106, %c0_107] : memref<1x8x32xf32, #tpu.memory_space<vmem>>, vector<1x8x32xf32>
    %256 = vector.shape_cast %255 : vector<1x8x32xf32> to vector<8x32xf32>
    %257 = vector.shape_cast %254 : vector<8x32xf32> to vector<1x8x32xf32>
    tpu.vector_store %arg25[%c0_105, %c0_106, %c0_107], %257 {strides = array<i32>} : memref<1x8x32xf32, #tpu.memory_space<vmem>>, vector<1x8x32xf32>,
    return
  }
  func.func @transform_0(%arg0: i32) -> (i32, i32, i32) {
    %c0_i32 = arith.constant 0 : i32
    %c0_i32_0 = arith.constant 0 : i32
    %c0_i32_1 = arith.constant 0 : i32
    return %arg0, %c0_i32, %c0_i32_0 : i32, i32, i32
  }
  func.func @transform_1(%arg0: i32) -> (i32, i32, i32) {
    %c0_i32 = arith.constant 0 : i32
    %c0_i32_0 = arith.constant 0 : i32
    %c0_i32_1 = arith.constant 0 : i32
    return %arg0, %c0_i32, %c0_i32_0 : i32, i32, i32
  }
  func.func @transform_2(%arg0: i32) -> (i32, i32, i32) {
    %c0_i32 = arith.constant 0 : i32
    %c0_i32_0 = arith.constant 0 : i32
    %c0_i32_1 = arith.constant 0 : i32
    return %arg0, %c0_i32, %c0_i32_0 : i32, i32, i32
  }
  func.func @transform_3(%arg0: i32) -> (i32, i32, i32) {
    %c0_i32 = arith.constant 0 : i32
    %c0_i32_0 = arith.constant 0 : i32
    %c0_i32_1 = arith.constant 0 : i32
    return %arg0, %c0_i32, %c0_i32_0 : i32, i32, i32
  }
  func.func @transform_4(%arg0: i32) -> (i32, i32) {
    %c0_i32 = arith.constant 0 : i32
    %c0_i32_0 = arith.constant 0 : i32
    %c0_i32_1 = arith.constant 0 : i32
    return %c0_i32, %c0_i32_0 : i32, i32
  }
  func.func @transform_5(%arg0: i32) -> (i32, i32) {
    %c0_i32 = arith.constant 0 : i32
    %c0_i32_0 = arith.constant 0 : i32
    %c0_i32_1 = arith.constant 0 : i32
    return %c0_i32, %c0_i32_0 : i32, i32
  }
  func.func @transform_6(%arg0: i32) -> (i32, i32) {
    %c0_i32 = arith.constant 0 : i32
    %c0_i32_0 = arith.constant 0 : i32
    %c0_i32_1 = arith.constant 0 : i32
    return %c0_i32, %c0_i32_0 : i32, i32
  }
  func.func @transform_7(%arg0: i32) -> (i32, i32) {
    %c0_i32 = arith.constant 0 : i32
    %c0_i32_0 = arith.constant 0 : i32
    %c0_i32_1 = arith.constant 0 : i32
    return %c0_i32, %c0_i32_0 : i32, i32
  }
  func.func @transform_8(%arg0: i32) -> (i32, i32) {
    %c0_i32 = arith.constant 0 : i32
    %c0_i32_0 = arith.constant 0 : i32
    %c0_i32_1 = arith.constant 0 : i32
    return %c0_i32, %c0_i32_0 : i32, i32
  }
  func.func @transform_9(%arg0: i32) -> (i32, i32) {
    %c0_i32 = arith.constant 0 : i32
    %c0_i32_0 = arith.constant 0 : i32
    %c0_i32_1 = arith.constant 0 : i32
    return %c0_i32, %c0_i32_0 : i32, i32
  }
  func.func @transform_10(%arg0: i32) -> (i32, i32) {
    %c0_i32 = arith.constant 0 : i32
    %c0_i32_0 = arith.constant 0 : i32
    %c0_i32_1 = arith.constant 0 : i32
    return %c0_i32, %c0_i32_0 : i32, i32
  }
  func.func @transform_11(%arg0: i32) -> (i32, i32) {
    %c0_i32 = arith.constant 0 : i32
    %c0_i32_0 = arith.constant 0 : i32
    %c0_i32_1 = arith.constant 0 : i32
    return %c0_i32, %c0_i32_0 : i32, i32
  }
  func.func @transform_12(%arg0: i32) -> (i32, i32) {
    %c0_i32 = arith.constant 0 : i32
    %c0_i32_0 = arith.constant 0 : i32
    %c0_i32_1 = arith.constant 0 : i32
    return %c0_i32, %c0_i32_0 : i32, i32
  }
  func.func @transform_13(%arg0: i32) -> (i32, i32) {
    %c0_i32 = arith.constant 0 : i32
    %c0_i32_0 = arith.constant 0 : i32
    %c0_i32_1 = arith.constant 0 : i32
    return %c0_i32, %c0_i32_0 : i32, i32
  }
  func.func @transform_14(%arg0: i32) -> (i32, i32) {
    %c0_i32 = arith.constant 0 : i32
    %c0_i32_0 = arith.constant 0 : i32
    %c0_i32_1 = arith.constant 0 : i32
    return %c0_i32, %c0_i32_0 : i32, i32
  }
  func.func @transform_15(%arg0: i32) -> (i32, i32) {
    %c0_i32 = arith.constant 0 : i32
    %c0_i32_0 = arith.constant 0 : i32
    %c0_i32_1 = arith.constant 0 : i32
    return %c0_i32, %c0_i32_0 : i32, i32
  }
  func.func @transform_16(%arg0: i32) -> (i32, i32) {
    %c0_i32 = arith.constant 0 : i32
    %c0_i32_0 = arith.constant 0 : i32
    %c0_i32_1 = arith.constant 0 : i32
    return %c0_i32, %c0_i32_0 : i32, i32
  }
  func.func @transform_17(%arg0: i32) -> (i32, i32) {
    %c0_i32 = arith.constant 0 : i32
    %c0_i32_0 = arith.constant 0 : i32
    %c0_i32_1 = arith.constant 0 : i32
    return %c0_i32, %c0_i32_0 : i32, i32
  }
  func.func @transform_18(%arg0: i32) -> (i32, i32) {
    %c0_i32 = arith.constant 0 : i32
    %c0_i32_0 = arith.constant 0 : i32
    %c0_i32_1 = arith.constant 0 : i32
    return %c0_i32, %c0_i32_0 : i32, i32
  }
  func.func @transform_19(%arg0: i32) -> (i32, i32) {
    %c0_i32 = arith.constant 0 : i32
    %c0_i32_0 = arith.constant 0 : i32
    %c0_i32_1 = arith.constant 0 : i32
    return %c0_i32, %c0_i32_0 : i32, i32
  }
  func.func @transform_20(%arg0: i32) -> (i32, i32) {
    %c0_i32 = arith.constant 0 : i32
    %c0_i32_0 = arith.constant 0 : i32
    %c0_i32_1 = arith.constant 0 : i32
    return %c0_i32, %c0_i32_0 : i32, i32
  }
  func.func @transform_21(%arg0: i32) -> (i32, i32) {
    %c0_i32 = arith.constant 0 : i32
    %c0_i32_0 = arith.constant 0 : i32
    %c0_i32_1 = arith.constant 0 : i32
    return %c0_i32, %c0_i32_0 : i32, i32
  }
  func.func @transform_22(%arg0: i32) -> (i32, i32) {
    %c0_i32 = arith.constant 0 : i32
    %c0_i32_0 = arith.constant 0 : i32
    %c0_i32_1 = arith.constant 0 : i32
    return %c0_i32, %c0_i32_0 : i32, i32
  }
  func.func @transform_23(%arg0: i32) -> (i32, i32) {
    %c0_i32 = arith.constant 0 : i32
    %c0_i32_0 = arith.constant 0 : i32
    %c0_i32_1 = arith.constant 0 : i32
    return %c0_i32, %c0_i32_0 : i32, i32
  }
  func.func @transform_24(%arg0: i32) -> (i32, i32, i32) {
    %c0_i32 = arith.constant 0 : i32
    %c0_i32_0 = arith.constant 0 : i32
    %c0_i32_1 = arith.constant 0 : i32
    return %arg0, %c0_i32, %c0_i32_0 : i32, i32, i32
  }
}

module attributes {stable_mosaic.version = 11 : i64} {
  func.func @_dec_layer_kernel(%arg0: i32, %arg1: memref<1x8x32xf32, #tpu.memory_space<vmem>>, %arg2: memref<1x8x32xf32, #tpu.memory_space<vmem>>, %arg3: memref<1x8x8xf32, #tpu.memory_space<vmem>>, %arg4: memref<1x8x8xf32, #tpu.memory_space<vmem>>, %arg5: memref<32x96xf32, #tpu.memory_space<vmem>>, %arg6: memref<1x96xf32, #tpu.memory_space<vmem>>, %arg7: memref<32x32xf32, #tpu.memory_space<vmem>>, %arg8: memref<1x32xf32, #tpu.memory_space<vmem>>, %arg9: memref<1x32xf32, #tpu.memory_space<vmem>>, %arg10: memref<1x32xf32, #tpu.memory_space<vmem>>, %arg11: memref<32x32xf32, #tpu.memory_space<vmem>>, %arg12: memref<1x32xf32, #tpu.memory_space<vmem>>, %arg13: memref<32x64xf32, #tpu.memory_space<vmem>>, %arg14: memref<1x64xf32, #tpu.memory_space<vmem>>, %arg15: memref<32x32xf32, #tpu.memory_space<vmem>>, %arg16: memref<1x32xf32, #tpu.memory_space<vmem>>, %arg17: memref<1x32xf32, #tpu.memory_space<vmem>>, %arg18: memref<1x32xf32, #tpu.memory_space<vmem>>, %arg19: memref<32x64xf32, #tpu.memory_space<vmem>>, %arg20: memref<1x64xf32, #tpu.memory_space<vmem>>, %arg21: memref<64x32xf32, #tpu.memory_space<vmem>>, %arg22: memref<1x32xf32, #tpu.memory_space<vmem>>, %arg23: memref<1x32xf32, #tpu.memory_space<vmem>>, %arg24: memref<1x32xf32, #tpu.memory_space<vmem>>, %arg25: memref<1x8x32xf32, #tpu.memory_space<vmem>>) attributes {dimension_semantics = [#tpu.dimension_semantics<parallel>], iteration_bounds = array<i64: 2>, scalar_prefetch = 0 : i64, scratch_operands = 0 : i64, tpu.core_type = #tpu.core_type<tc>, window_params = [{transform_indices = @transform_0, window_bounds = array<i64: 1, 8, 32>}, {transform_indices = @transform_1, window_bounds = array<i64: 1, 8, 32>}, {transform_indices = @transform_2, window_bounds = array<i64: 1, 8, 8>}, {transform_indices = @transform_3, window_bounds = array<i64: 1, 8, 8>}, {pipeline_mode = #tpu.pipeline_mode<synchronous>, transform_indices = @transform_4, window_bounds = array<i64: 32, 96>}, {pipeline_mode = #tpu.pipeline_mode<synchronous>, transform_indices = @transform_5, window_bounds = array<i64: 1, 96>}, {pipeline_mode = #tpu.pipeline_mode<synchronous>, transform_indices = @transform_6, window_bounds = array<i64: 32, 32>}, {pipeline_mode = #tpu.pipeline_mode<synchronous>, transform_indices = @transform_7, window_bounds = array<i64: 1, 32>}, {pipeline_mode = #tpu.pipeline_mode<synchronous>, transform_indices = @transform_8, window_bounds = array<i64: 1, 32>}, {pipeline_mode = #tpu.pipeline_mode<synchronous>, transform_indices = @transform_9, window_bounds = array<i64: 1, 32>}, {pipeline_mode = #tpu.pipeline_mode<synchronous>, transform_indices = @transform_10, window_bounds = array<i64: 32, 32>}, {pipeline_mode = #tpu.pipeline_mode<synchronous>, transform_indices = @transform_11, window_bounds = array<i64: 1, 32>}, {pipeline_mode = #tpu.pipeline_mode<synchronous>, transform_indices = @transform_12, window_bounds = array<i64: 32, 64>}, {pipeline_mode = #tpu.pipeline_mode<synchronous>, transform_indices = @transform_13, window_bounds = array<i64: 1, 64>}, {pipeline_mode = #tpu.pipeline_mode<synchronous>, transform_indices = @transform_14, window_bounds = array<i64: 32, 32>}, {pipeline_mode = #tpu.pipeline_mode<synchronous>, transform_indices = @transform_15, window_bounds = array<i64: 1, 32>}, {pipeline_mode = #tpu.pipeline_mode<synchronous>, transform_indices = @transform_16, window_bounds = array<i64: 1, 32>}, {pipeline_mode = #tpu.pipeline_mode<synchronous>, transform_indices = @transform_17, window_bounds = array<i64: 1, 32>}, {pipeline_mode = #tpu.pipeline_mode<synchronous>, transform_indices = @transform_18, window_bounds = array<i64: 32, 64>}, {pipeline_mode = #tpu.pipeline_mode<synchronous>, transform_indices = @transform_19, window_bounds = array<i64: 1, 64>}, {pipeline_mode = #tpu.pipeline_mode<synchronous>, transform_indices = @transform_20, window_bounds = array<i64: 64, 32>}, {pipeline_mode = #tpu.pipeline_mode<synchronous>, transform_indices = @transform_21, window_bounds = array<i64: 1, 32>}, {pipeline_mode = #tpu.pipeline_mode<synchronous>, transform_indices = @transform_22, window_bounds = array<i64: 1, 32>}, {pipeline_mode = #tpu.pipeline_mode<synchronous>, transform_indices = @transform_23, window_bounds = array<i64: 1, 32>}, {transform_indices = @transform_24, window_bounds = array<i64: 1, 8, 32>}]} {
    %c0 = arith.constant 0 : index
    %c0_0 = arith.constant 0 : index
    %c0_1 = arith.constant 0 : index
    %0 = vector.load %arg1[%c0, %c0_0, %c0_1] : memref<1x8x32xf32, #tpu.memory_space<vmem>>, vector<1x8x32xf32>
    %1 = vector.shape_cast %0 : vector<1x8x32xf32> to vector<8x32xf32>
    %c0_2 = arith.constant 0 : index
    %c0_3 = arith.constant 0 : index
    %c0_4 = arith.constant 0 : index
    %2 = vector.load %arg2[%c0_2, %c0_3, %c0_4] : memref<1x8x32xf32, #tpu.memory_space<vmem>>, vector<1x8x32xf32>
    %3 = vector.shape_cast %2 : vector<1x8x32xf32> to vector<8x32xf32>
    %c0_5 = arith.constant 0 : index
    %c0_6 = arith.constant 0 : index
    %4 = vector.load %arg5[%c0_5, %c0_6] : memref<32x96xf32, #tpu.memory_space<vmem>>, vector<32x96xf32>
    %cst = arith.constant dense<0.000000e+00> : vector<8x96xf32>
    %5 = tpu.matmul %1, %4, %cst {dimension_numbers = #tpu.dot_dimension_numbers<[1], [0], [0], [1], [0, 0, 1, 1], [], []>} : vector<8x32xf32>, vector<32x96xf32>, vector<8x96xf32> -> vector<8x96xf32>
    %c0_7 = arith.constant 0 : index
    %c0_8 = arith.constant 0 : index
    %6 = vector.load %arg6[%c0_7, %c0_8] : memref<1x96xf32, #tpu.memory_space<vmem>>, vector<1x96xf32>
    %7 = vector.broadcast %6 : vector<1x96xf32> to vector<8x96xf32>
    %8 = arith.addf %5, %7 : vector<8x96xf32>
    %9 = vector.extract_strided_slice %8 {offsets = [0, 0], sizes = [8, 32], strides = [1, 1]} : vector<8x96xf32> to vector<8x32xf32>
    %10 = vector.extract_strided_slice %8 {offsets = [0, 32], sizes = [8, 32], strides = [1, 1]} : vector<8x96xf32> to vector<8x32xf32>
    %11 = vector.extract_strided_slice %8 {offsets = [0, 64], sizes = [8, 32], strides = [1, 1]} : vector<8x96xf32> to vector<8x32xf32>
    %c0_9 = arith.constant 0 : index
    %c0_10 = arith.constant 0 : index
    %c0_11 = arith.constant 0 : index
    %12 = vector.load %arg3[%c0_9, %c0_10, %c0_11] : memref<1x8x8xf32, #tpu.memory_space<vmem>>, vector<1x8x8xf32>
    %13 = vector.shape_cast %12 : vector<1x8x8xf32> to vector<8x8xf32>
    %14 = vector.extract_strided_slice %9 {offsets = [0, 0], sizes = [8, 8], strides = [1, 1]} : vector<8x32xf32> to vector<8x8xf32>
    %15 = vector.extract_strided_slice %10 {offsets = [0, 0], sizes = [8, 8], strides = [1, 1]} : vector<8x32xf32> to vector<8x8xf32>
    %16 = vector.extract_strided_slice %11 {offsets = [0, 0], sizes = [8, 8], strides = [1, 1]} : vector<8x32xf32> to vector<8x8xf32>
    %cst_12 = arith.constant dense<0.000000e+00> : vector<8x8xf32>
    %17 = tpu.matmul %14, %15, %cst_12 {dimension_numbers = #tpu.dot_dimension_numbers<[1], [1], [0], [0], [0, 0, 1, 0], [], []>} : vector<8x8xf32>, vector<8x8xf32>, vector<8x8xf32> -> vector<8x8xf32>
    %18 = arith.addf %17, %13 : vector<8x8xf32>
    %cst_13 = arith.constant dense<0xFF800000> : vector<8xf32>
    %19 = vector.multi_reduction <maximumf>, %18, %cst_13 [1] : vector<8x8xf32> to vector<8xf32>
    %20 = vector.shape_cast %19 : vector<8xf32> to vector<8x1xf32>
    %21 = vector.broadcast %20 : vector<8x1xf32> to vector<8x8xf32>
    %22 = arith.subf %18, %21 : vector<8x8xf32>
    %23 = math.exp %22 : vector<8x8xf32>
    %cst_14 = arith.constant dense<0.000000e+00> : vector<8xf32>
    %24 = vector.multi_reduction <add>, %23, %cst_14 [1] : vector<8x8xf32> to vector<8xf32>
    %25 = vector.shape_cast %24 : vector<8xf32> to vector<8x1xf32>
    %26 = tpu.reciprocal %25 {approx = true} : vector<8x1xf32> -> vector<8x1xf32>
    %27 = vector.broadcast %26 : vector<8x1xf32> to vector<8x8xf32>
    %28 = arith.mulf %23, %27 : vector<8x8xf32>
    %cst_15 = arith.constant dense<0.000000e+00> : vector<8x8xf32>
    %29 = tpu.matmul %28, %16, %cst_15 {dimension_numbers = #tpu.dot_dimension_numbers<[1], [0], [0], [1], [0, 0, 1, 1], [], []>} : vector<8x8xf32>, vector<8x8xf32>, vector<8x8xf32> -> vector<8x8xf32>
    %30 = vector.extract_strided_slice %9 {offsets = [0, 8], sizes = [8, 8], strides = [1, 1]} : vector<8x32xf32> to vector<8x8xf32>
    %31 = vector.extract_strided_slice %10 {offsets = [0, 8], sizes = [8, 8], strides = [1, 1]} : vector<8x32xf32> to vector<8x8xf32>
    %32 = vector.extract_strided_slice %11 {offsets = [0, 8], sizes = [8, 8], strides = [1, 1]} : vector<8x32xf32> to vector<8x8xf32>
    %cst_16 = arith.constant dense<0.000000e+00> : vector<8x8xf32>
    %33 = tpu.matmul %30, %31, %cst_16 {dimension_numbers = #tpu.dot_dimension_numbers<[1], [1], [0], [0], [0, 0, 1, 0], [], []>} : vector<8x8xf32>, vector<8x8xf32>, vector<8x8xf32> -> vector<8x8xf32>
    %34 = arith.addf %33, %13 : vector<8x8xf32>
    %cst_17 = arith.constant dense<0xFF800000> : vector<8xf32>
    %35 = vector.multi_reduction <maximumf>, %34, %cst_17 [1] : vector<8x8xf32> to vector<8xf32>
    %36 = vector.shape_cast %35 : vector<8xf32> to vector<8x1xf32>
    %37 = vector.broadcast %36 : vector<8x1xf32> to vector<8x8xf32>
    %38 = arith.subf %34, %37 : vector<8x8xf32>
    %39 = math.exp %38 : vector<8x8xf32>
    %cst_18 = arith.constant dense<0.000000e+00> : vector<8xf32>
    %40 = vector.multi_reduction <add>, %39, %cst_18 [1] : vector<8x8xf32> to vector<8xf32>
    %41 = vector.shape_cast %40 : vector<8xf32> to vector<8x1xf32>
    %42 = tpu.reciprocal %41 {approx = true} : vector<8x1xf32> -> vector<8x1xf32>
    %43 = vector.broadcast %42 : vector<8x1xf32> to vector<8x8xf32>
    %44 = arith.mulf %39, %43 : vector<8x8xf32>
    %cst_19 = arith.constant dense<0.000000e+00> : vector<8x8xf32>
    %45 = tpu.matmul %44, %32, %cst_19 {dimension_numbers = #tpu.dot_dimension_numbers<[1], [0], [0], [1], [0, 0, 1, 1], [], []>} : vector<8x8xf32>, vector<8x8xf32>, vector<8x8xf32> -> vector<8x8xf32>
    %46 = vector.extract_strided_slice %9 {offsets = [0, 16], sizes = [8, 8], strides = [1, 1]} : vector<8x32xf32> to vector<8x8xf32>
    %47 = vector.extract_strided_slice %10 {offsets = [0, 16], sizes = [8, 8], strides = [1, 1]} : vector<8x32xf32> to vector<8x8xf32>
    %48 = vector.extract_strided_slice %11 {offsets = [0, 16], sizes = [8, 8], strides = [1, 1]} : vector<8x32xf32> to vector<8x8xf32>
    %cst_20 = arith.constant dense<0.000000e+00> : vector<8x8xf32>
    %49 = tpu.matmul %46, %47, %cst_20 {dimension_numbers = #tpu.dot_dimension_numbers<[1], [1], [0], [0], [0, 0, 1, 0], [], []>} : vector<8x8xf32>, vector<8x8xf32>, vector<8x8xf32> -> vector<8x8xf32>
    %50 = arith.addf %49, %13 : vector<8x8xf32>
    %cst_21 = arith.constant dense<0xFF800000> : vector<8xf32>
    %51 = vector.multi_reduction <maximumf>, %50, %cst_21 [1] : vector<8x8xf32> to vector<8xf32>
    %52 = vector.shape_cast %51 : vector<8xf32> to vector<8x1xf32>
    %53 = vector.broadcast %52 : vector<8x1xf32> to vector<8x8xf32>
    %54 = arith.subf %50, %53 : vector<8x8xf32>
    %55 = math.exp %54 : vector<8x8xf32>
    %cst_22 = arith.constant dense<0.000000e+00> : vector<8xf32>
    %56 = vector.multi_reduction <add>, %55, %cst_22 [1] : vector<8x8xf32> to vector<8xf32>
    %57 = vector.shape_cast %56 : vector<8xf32> to vector<8x1xf32>
    %58 = tpu.reciprocal %57 {approx = true} : vector<8x1xf32> -> vector<8x1xf32>
    %59 = vector.broadcast %58 : vector<8x1xf32> to vector<8x8xf32>
    %60 = arith.mulf %55, %59 : vector<8x8xf32>
    %cst_23 = arith.constant dense<0.000000e+00> : vector<8x8xf32>
    %61 = tpu.matmul %60, %48, %cst_23 {dimension_numbers = #tpu.dot_dimension_numbers<[1], [0], [0], [1], [0, 0, 1, 1], [], []>} : vector<8x8xf32>, vector<8x8xf32>, vector<8x8xf32> -> vector<8x8xf32>
    %62 = vector.extract_strided_slice %9 {offsets = [0, 24], sizes = [8, 8], strides = [1, 1]} : vector<8x32xf32> to vector<8x8xf32>
    %63 = vector.extract_strided_slice %10 {offsets = [0, 24], sizes = [8, 8], strides = [1, 1]} : vector<8x32xf32> to vector<8x8xf32>
    %64 = vector.extract_strided_slice %11 {offsets = [0, 24], sizes = [8, 8], strides = [1, 1]} : vector<8x32xf32> to vector<8x8xf32>
    %cst_24 = arith.constant dense<0.000000e+00> : vector<8x8xf32>
    %65 = tpu.matmul %62, %63, %cst_24 {dimension_numbers = #tpu.dot_dimension_numbers<[1], [1], [0], [0], [0, 0, 1, 0], [], []>} : vector<8x8xf32>, vector<8x8xf32>, vector<8x8xf32> -> vector<8x8xf32>
    %66 = arith.addf %65, %13 : vector<8x8xf32>
    %cst_25 = arith.constant dense<0xFF800000> : vector<8xf32>
    %67 = vector.multi_reduction <maximumf>, %66, %cst_25 [1] : vector<8x8xf32> to vector<8xf32>
    %68 = vector.shape_cast %67 : vector<8xf32> to vector<8x1xf32>
    %69 = vector.broadcast %68 : vector<8x1xf32> to vector<8x8xf32>
    %70 = arith.subf %66, %69 : vector<8x8xf32>
    %71 = math.exp %70 : vector<8x8xf32>
    %cst_26 = arith.constant dense<0.000000e+00> : vector<8xf32>
    %72 = vector.multi_reduction <add>, %71, %cst_26 [1] : vector<8x8xf32> to vector<8xf32>
    %73 = vector.shape_cast %72 : vector<8xf32> to vector<8x1xf32>
    %74 = tpu.reciprocal %73 {approx = true} : vector<8x1xf32> -> vector<8x1xf32>
    %75 = vector.broadcast %74 : vector<8x1xf32> to vector<8x8xf32>
    %76 = arith.mulf %71, %75 : vector<8x8xf32>
    %cst_27 = arith.constant dense<0.000000e+00> : vector<8x8xf32>
    %77 = tpu.matmul %76, %64, %cst_27 {dimension_numbers = #tpu.dot_dimension_numbers<[1], [0], [0], [1], [0, 0, 1, 1], [], []>} : vector<8x8xf32>, vector<8x8xf32>, vector<8x8xf32> -> vector<8x8xf32>
    %78 = tpu.concatenate %29, %45, %61, %77 in 1 : vector<8x8xf32>, vector<8x8xf32>, vector<8x8xf32>, vector<8x8xf32> -> vector<8x32xf32>
    %c0_28 = arith.constant 0 : index
    %c0_29 = arith.constant 0 : index
    %79 = vector.load %arg7[%c0_28, %c0_29] : memref<32x32xf32, #tpu.memory_space<vmem>>, vector<32x32xf32>
    %cst_30 = arith.constant dense<0.000000e+00> : vector<8x32xf32>
    %80 = tpu.matmul %78, %79, %cst_30 {dimension_numbers = #tpu.dot_dimension_numbers<[1], [0], [0], [1], [0, 0, 1, 1], [], []>} : vector<8x32xf32>, vector<32x32xf32>, vector<8x32xf32> -> vector<8x32xf32>
    %c0_31 = arith.constant 0 : index
    %c0_32 = arith.constant 0 : index
    %81 = vector.load %arg8[%c0_31, %c0_32] : memref<1x32xf32, #tpu.memory_space<vmem>>, vector<1x32xf32>
    %82 = vector.broadcast %81 : vector<1x32xf32> to vector<8x32xf32>
    %83 = arith.addf %80, %82 : vector<8x32xf32>
    %84 = arith.addf %1, %83 : vector<8x32xf32>
    %c0_33 = arith.constant 0 : index
    %c0_34 = arith.constant 0 : index
    %85 = vector.load %arg9[%c0_33, %c0_34] : memref<1x32xf32, #tpu.memory_space<vmem>>, vector<1x32xf32>
    %c0_35 = arith.constant 0 : index
    %c0_36 = arith.constant 0 : index
    %86 = vector.load %arg10[%c0_35, %c0_36] : memref<1x32xf32, #tpu.memory_space<vmem>>, vector<1x32xf32>
    %cst_37 = arith.constant dense<0.000000e+00> : vector<8xf32>
    %87 = vector.multi_reduction <add>, %84, %cst_37 [1] : vector<8x32xf32> to vector<8xf32>
    %88 = vector.shape_cast %87 : vector<8xf32> to vector<8x1xf32>
    %cst_38 = arith.constant 3.200000e+01 : f32
    %89 = vector.broadcast %cst_38 : f32 to vector<8x1xf32>
    %90 = arith.divf %88, %89 : vector<8x1xf32>
    %91 = vector.broadcast %90 : vector<8x1xf32> to vector<8x32xf32>
    %92 = arith.subf %84, %91 : vector<8x32xf32>
    %93 = arith.mulf %92, %92 : vector<8x32xf32>
    %cst_39 = arith.constant dense<0.000000e+00> : vector<8xf32>
    %94 = vector.multi_reduction <add>, %93, %cst_39 [1] : vector<8x32xf32> to vector<8xf32>
    %95 = vector.shape_cast %94 : vector<8xf32> to vector<8x1xf32>
    %cst_40 = arith.constant 3.200000e+01 : f32
    %96 = vector.broadcast %cst_40 : f32 to vector<8x1xf32>
    %97 = arith.divf %95, %96 : vector<8x1xf32>
    %98 = vector.broadcast %90 : vector<8x1xf32> to vector<8x32xf32>
    %99 = arith.subf %84, %98 : vector<8x32xf32>
    %cst_41 = arith.constant 9.99999974E-6 : f32
    %100 = vector.broadcast %cst_41 : f32 to vector<8x1xf32>
    %101 = arith.addf %97, %100 : vector<8x1xf32>
    %102 = math.rsqrt %101 : vector<8x1xf32>
    %103 = vector.broadcast %102 : vector<8x1xf32> to vector<8x32xf32>
    %104 = arith.mulf %99, %103 : vector<8x32xf32>
    %105 = vector.broadcast %85 : vector<1x32xf32> to vector<8x32xf32>
    %106 = arith.mulf %104, %105 : vector<8x32xf32>
    %107 = vector.broadcast %86 : vector<1x32xf32> to vector<8x32xf32>
    %108 = arith.addf %106, %107 : vector<8x32xf32>
    %c0_42 = arith.constant 0 : index
    %c0_43 = arith.constant 0 : index
    %109 = vector.load %arg11[%c0_42, %c0_43] : memref<32x32xf32, #tpu.memory_space<vmem>>, vector<32x32xf32>
    %cst_44 = arith.constant dense<0.000000e+00> : vector<8x32xf32>
    %110 = tpu.matmul %108, %109, %cst_44 {dimension_numbers = #tpu.dot_dimension_numbers<[1], [0], [0], [1], [0, 0, 1, 1], [], []>} : vector<8x32xf32>, vector<32x32xf32>, vector<8x32xf32> -> vector<8x32xf32>
    %c0_45 = arith.constant 0 : index
    %c0_46 = arith.constant 0 : index
    %111 = vector.load %arg12[%c0_45, %c0_46] : memref<1x32xf32, #tpu.memory_space<vmem>>, vector<1x32xf32>
    %112 = vector.broadcast %111 : vector<1x32xf32> to vector<8x32xf32>
    %113 = arith.addf %110, %112 : vector<8x32xf32>
    %c0_47 = arith.constant 0 : index
    %c0_48 = arith.constant 0 : index
    %114 = vector.load %arg13[%c0_47, %c0_48] : memref<32x64xf32, #tpu.memory_space<vmem>>, vector<32x64xf32>
    %cst_49 = arith.constant dense<0.000000e+00> : vector<8x64xf32>
    %115 = tpu.matmul %3, %114, %cst_49 {dimension_numbers = #tpu.dot_dimension_numbers<[1], [0], [0], [1], [0, 0, 1, 1], [], []>} : vector<8x32xf32>, vector<32x64xf32>, vector<8x64xf32> -> vector<8x64xf32>
    %c0_50 = arith.constant 0 : index
    %c0_51 = arith.constant 0 : index
    %116 = vector.load %arg14[%c0_50, %c0_51] : memref<1x64xf32, #tpu.memory_space<vmem>>, vector<1x64xf32>
    %117 = vector.broadcast %116 : vector<1x64xf32> to vector<8x64xf32>
    %118 = arith.addf %115, %117 : vector<8x64xf32>
    %119 = vector.extract_strided_slice %118 {offsets = [0, 0], sizes = [8, 32], strides = [1, 1]} : vector<8x64xf32> to vector<8x32xf32>
    %120 = vector.extract_strided_slice %118 {offsets = [0, 32], sizes = [8, 32], strides = [1, 1]} : vector<8x64xf32> to vector<8x32xf32>
    %c0_52 = arith.constant 0 : index
    %c0_53 = arith.constant 0 : index
    %c0_54 = arith.constant 0 : index
    %121 = vector.load %arg4[%c0_52, %c0_53, %c0_54] : memref<1x8x8xf32, #tpu.memory_space<vmem>>, vector<1x8x8xf32>
    %122 = vector.shape_cast %121 : vector<1x8x8xf32> to vector<8x8xf32>
    %123 = vector.extract_strided_slice %113 {offsets = [0, 0], sizes = [8, 8], strides = [1, 1]} : vector<8x32xf32> to vector<8x8xf32>
    %124 = vector.extract_strided_slice %119 {offsets = [0, 0], sizes = [8, 8], strides = [1, 1]} : vector<8x32xf32> to vector<8x8xf32>
    %125 = vector.extract_strided_slice %120 {offsets = [0, 0], sizes = [8, 8], strides = [1, 1]} : vector<8x32xf32> to vector<8x8xf32>
    %cst_55 = arith.constant dense<0.000000e+00> : vector<8x8xf32>
    %126 = tpu.matmul %123, %124, %cst_55 {dimension_numbers = #tpu.dot_dimension_numbers<[1], [1], [0], [0], [0, 0, 1, 0], [], []>} : vector<8x8xf32>, vector<8x8xf32>, vector<8x8xf32> -> vector<8x8xf32>
    %127 = arith.addf %126, %122 : vector<8x8xf32>
    %cst_56 = arith.constant dense<0xFF800000> : vector<8xf32>
    %128 = vector.multi_reduction <maximumf>, %127, %cst_56 [1] : vector<8x8xf32> to vector<8xf32>
    %129 = vector.shape_cast %128 : vector<8xf32> to vector<8x1xf32>
    %130 = vector.broadcast %129 : vector<8x1xf32> to vector<8x8xf32>
    %131 = arith.subf %127, %130 : vector<8x8xf32>
    %132 = math.exp %131 : vector<8x8xf32>
    %cst_57 = arith.constant dense<0.000000e+00> : vector<8xf32>
    %133 = vector.multi_reduction <add>, %132, %cst_57 [1] : vector<8x8xf32> to vector<8xf32>
    %134 = vector.shape_cast %133 : vector<8xf32> to vector<8x1xf32>
    %135 = tpu.reciprocal %134 {approx = true} : vector<8x1xf32> -> vector<8x1xf32>
    %136 = vector.broadcast %135 : vector<8x1xf32> to vector<8x8xf32>
    %137 = arith.mulf %132, %136 : vector<8x8xf32>
    %cst_58 = arith.constant dense<0.000000e+00> : vector<8x8xf32>
    %138 = tpu.matmul %137, %125, %cst_58 {dimension_numbers = #tpu.dot_dimension_numbers<[1], [0], [0], [1], [0, 0, 1, 1], [], []>} : vector<8x8xf32>, vector<8x8xf32>, vector<8x8xf32> -> vector<8x8xf32>
    %139 = vector.extract_strided_slice %113 {offsets = [0, 8], sizes = [8, 8], strides = [1, 1]} : vector<8x32xf32> to vector<8x8xf32>
    %140 = vector.extract_strided_slice %119 {offsets = [0, 8], sizes = [8, 8], strides = [1, 1]} : vector<8x32xf32> to vector<8x8xf32>
    %141 = vector.extract_strided_slice %120 {offsets = [0, 8], sizes = [8, 8], strides = [1, 1]} : vector<8x32xf32> to vector<8x8xf32>
    %cst_59 = arith.constant dense<0.000000e+00> : vector<8x8xf32>
    %142 = tpu.matmul %139, %140, %cst_59 {dimension_numbers = #tpu.dot_dimension_numbers<[1], [1], [0], [0], [0, 0, 1, 0], [], []>} : vector<8x8xf32>, vector<8x8xf32>, vector<8x8xf32> -> vector<8x8xf32>
    %143 = arith.addf %142, %122 : vector<8x8xf32>
    %cst_60 = arith.constant dense<0xFF800000> : vector<8xf32>
    %144 = vector.multi_reduction <maximumf>, %143, %cst_60 [1] : vector<8x8xf32> to vector<8xf32>
    %145 = vector.shape_cast %144 : vector<8xf32> to vector<8x1xf32>
    %146 = vector.broadcast %145 : vector<8x1xf32> to vector<8x8xf32>
    %147 = arith.subf %143, %146 : vector<8x8xf32>
    %148 = math.exp %147 : vector<8x8xf32>
    %cst_61 = arith.constant dense<0.000000e+00> : vector<8xf32>
    %149 = vector.multi_reduction <add>, %148, %cst_61 [1] : vector<8x8xf32> to vector<8xf32>
    %150 = vector.shape_cast %149 : vector<8xf32> to vector<8x1xf32>
    %151 = tpu.reciprocal %150 {approx = true} : vector<8x1xf32> -> vector<8x1xf32>
    %152 = vector.broadcast %151 : vector<8x1xf32> to vector<8x8xf32>
    %153 = arith.mulf %148, %152 : vector<8x8xf32>
    %cst_62 = arith.constant dense<0.000000e+00> : vector<8x8xf32>
    %154 = tpu.matmul %153, %141, %cst_62 {dimension_numbers = #tpu.dot_dimension_numbers<[1], [0], [0], [1], [0, 0, 1, 1], [], []>} : vector<8x8xf32>, vector<8x8xf32>, vector<8x8xf32> -> vector<8x8xf32>
    %155 = vector.extract_strided_slice %113 {offsets = [0, 16], sizes = [8, 8], strides = [1, 1]} : vector<8x32xf32> to vector<8x8xf32>
    %156 = vector.extract_strided_slice %119 {offsets = [0, 16], sizes = [8, 8], strides = [1, 1]} : vector<8x32xf32> to vector<8x8xf32>
    %157 = vector.extract_strided_slice %120 {offsets = [0, 16], sizes = [8, 8], strides = [1, 1]} : vector<8x32xf32> to vector<8x8xf32>
    %cst_63 = arith.constant dense<0.000000e+00> : vector<8x8xf32>
    %158 = tpu.matmul %155, %156, %cst_63 {dimension_numbers = #tpu.dot_dimension_numbers<[1], [1], [0], [0], [0, 0, 1, 0], [], []>} : vector<8x8xf32>, vector<8x8xf32>, vector<8x8xf32> -> vector<8x8xf32>
    %159 = arith.addf %158, %122 : vector<8x8xf32>
    %cst_64 = arith.constant dense<0xFF800000> : vector<8xf32>
    %160 = vector.multi_reduction <maximumf>, %159, %cst_64 [1] : vector<8x8xf32> to vector<8xf32>
    %161 = vector.shape_cast %160 : vector<8xf32> to vector<8x1xf32>
    %162 = vector.broadcast %161 : vector<8x1xf32> to vector<8x8xf32>
    %163 = arith.subf %159, %162 : vector<8x8xf32>
    %164 = math.exp %163 : vector<8x8xf32>
    %cst_65 = arith.constant dense<0.000000e+00> : vector<8xf32>
    %165 = vector.multi_reduction <add>, %164, %cst_65 [1] : vector<8x8xf32> to vector<8xf32>
    %166 = vector.shape_cast %165 : vector<8xf32> to vector<8x1xf32>
    %167 = tpu.reciprocal %166 {approx = true} : vector<8x1xf32> -> vector<8x1xf32>
    %168 = vector.broadcast %167 : vector<8x1xf32> to vector<8x8xf32>
    %169 = arith.mulf %164, %168 : vector<8x8xf32>
    %cst_66 = arith.constant dense<0.000000e+00> : vector<8x8xf32>
    %170 = tpu.matmul %169, %157, %cst_66 {dimension_numbers = #tpu.dot_dimension_numbers<[1], [0], [0], [1], [0, 0, 1, 1], [], []>} : vector<8x8xf32>, vector<8x8xf32>, vector<8x8xf32> -> vector<8x8xf32>
    %171 = vector.extract_strided_slice %113 {offsets = [0, 24], sizes = [8, 8], strides = [1, 1]} : vector<8x32xf32> to vector<8x8xf32>
    %172 = vector.extract_strided_slice %119 {offsets = [0, 24], sizes = [8, 8], strides = [1, 1]} : vector<8x32xf32> to vector<8x8xf32>
    %173 = vector.extract_strided_slice %120 {offsets = [0, 24], sizes = [8, 8], strides = [1, 1]} : vector<8x32xf32> to vector<8x8xf32>
    %cst_67 = arith.constant dense<0.000000e+00> : vector<8x8xf32>
    %174 = tpu.matmul %171, %172, %cst_67 {dimension_numbers = #tpu.dot_dimension_numbers<[1], [1], [0], [0], [0, 0, 1, 0], [], []>} : vector<8x8xf32>, vector<8x8xf32>, vector<8x8xf32> -> vector<8x8xf32>
    %175 = arith.addf %174, %122 : vector<8x8xf32>
    %cst_68 = arith.constant dense<0xFF800000> : vector<8xf32>
    %176 = vector.multi_reduction <maximumf>, %175, %cst_68 [1] : vector<8x8xf32> to vector<8xf32>
    %177 = vector.shape_cast %176 : vector<8xf32> to vector<8x1xf32>
    %178 = vector.broadcast %177 : vector<8x1xf32> to vector<8x8xf32>
    %179 = arith.subf %175, %178 : vector<8x8xf32>
    %180 = math.exp %179 : vector<8x8xf32>
    %cst_69 = arith.constant dense<0.000000e+00> : vector<8xf32>
    %181 = vector.multi_reduction <add>, %180, %cst_69 [1] : vector<8x8xf32> to vector<8xf32>
    %182 = vector.shape_cast %181 : vector<8xf32> to vector<8x1xf32>
    %183 = tpu.reciprocal %182 {approx = true} : vector<8x1xf32> -> vector<8x1xf32>
    %184 = vector.broadcast %183 : vector<8x1xf32> to vector<8x8xf32>
    %185 = arith.mulf %180, %184 : vector<8x8xf32>
    %cst_70 = arith.constant dense<0.000000e+00> : vector<8x8xf32>
    %186 = tpu.matmul %185, %173, %cst_70 {dimension_numbers = #tpu.dot_dimension_numbers<[1], [0], [0], [1], [0, 0, 1, 1], [], []>} : vector<8x8xf32>, vector<8x8xf32>, vector<8x8xf32> -> vector<8x8xf32>
    %187 = tpu.concatenate %138, %154, %170, %186 in 1 : vector<8x8xf32>, vector<8x8xf32>, vector<8x8xf32>, vector<8x8xf32> -> vector<8x32xf32>
    %c0_71 = arith.constant 0 : index
    %c0_72 = arith.constant 0 : index
    %188 = vector.load %arg15[%c0_71, %c0_72] : memref<32x32xf32, #tpu.memory_space<vmem>>, vector<32x32xf32>
    %cst_73 = arith.constant dense<0.000000e+00> : vector<8x32xf32>
    %189 = tpu.matmul %187, %188, %cst_73 {dimension_numbers = #tpu.dot_dimension_numbers<[1], [0], [0], [1], [0, 0, 1, 1], [], []>} : vector<8x32xf32>, vector<32x32xf32>, vector<8x32xf32> -> vector<8x32xf32>
    %c0_74 = arith.constant 0 : index
    %c0_75 = arith.constant 0 : index
    %190 = vector.load %arg16[%c0_74, %c0_75] : memref<1x32xf32, #tpu.memory_space<vmem>>, vector<1x32xf32>
    %191 = vector.broadcast %190 : vector<1x32xf32> to vector<8x32xf32>
    %192 = arith.addf %189, %191 : vector<8x32xf32>
    %193 = arith.addf %108, %192 : vector<8x32xf32>
    %c0_76 = arith.constant 0 : index
    %c0_77 = arith.constant 0 : index
    %194 = vector.load %arg17[%c0_76, %c0_77] : memref<1x32xf32, #tpu.memory_space<vmem>>, vector<1x32xf32>
    %c0_78 = arith.constant 0 : index
    %c0_79 = arith.constant 0 : index
    %195 = vector.load %arg18[%c0_78, %c0_79] : memref<1x32xf32, #tpu.memory_space<vmem>>, vector<1x32xf32>
    %cst_80 = arith.constant dense<0.000000e+00> : vector<8xf32>
    %196 = vector.multi_reduction <add>, %193, %cst_80 [1] : vector<8x32xf32> to vector<8xf32>
    %197 = vector.shape_cast %196 : vector<8xf32> to vector<8x1xf32>
    %cst_81 = arith.constant 3.200000e+01 : f32
    %198 = vector.broadcast %cst_81 : f32 to vector<8x1xf32>
    %199 = arith.divf %197, %198 : vector<8x1xf32>
    %200 = vector.broadcast %199 : vector<8x1xf32> to vector<8x32xf32>
    %201 = arith.subf %193, %200 : vector<8x32xf32>
    %202 = arith.mulf %201, %201 : vector<8x32xf32>
    %cst_82 = arith.constant dense<0.000000e+00> : vector<8xf32>
    %203 = vector.multi_reduction <add>, %202, %cst_82 [1] : vector<8x32xf32> to vector<8xf32>
    %204 = vector.shape_cast %203 : vector<8xf32> to vector<8x1xf32>
    %cst_83 = arith.constant 3.200000e+01 : f32
    %205 = vector.broadcast %cst_83 : f32 to vector<8x1xf32>
    %206 = arith.divf %204, %205 : vector<8x1xf32>
    %207 = vector.broadcast %199 : vector<8x1xf32> to vector<8x32xf32>
    %208 = arith.subf %193, %207 : vector<8x32xf32>
    %cst_84 = arith.constant 9.99999974E-6 : f32
    %209 = vector.broadcast %cst_84 : f32 to vector<8x1xf32>
    %210 = arith.addf %206, %209 : vector<8x1xf32>
    %211 = math.rsqrt %210 : vector<8x1xf32>
    %212 = vector.broadcast %211 : vector<8x1xf32> to vector<8x32xf32>
    %213 = arith.mulf %208, %212 : vector<8x32xf32>
    %214 = vector.broadcast %194 : vector<1x32xf32> to vector<8x32xf32>
    %215 = arith.mulf %213, %214 : vector<8x32xf32>
    %216 = vector.broadcast %195 : vector<1x32xf32> to vector<8x32xf32>
    %217 = arith.addf %215, %216 : vector<8x32xf32>
    %c0_85 = arith.constant 0 : index
    %c0_86 = arith.constant 0 : index
    %218 = vector.load %arg19[%c0_85, %c0_86] : memref<32x64xf32, #tpu.memory_space<vmem>>, vector<32x64xf32>
    %cst_87 = arith.constant dense<0.000000e+00> : vector<8x64xf32>
    %219 = tpu.matmul %217, %218, %cst_87 {dimension_numbers = #tpu.dot_dimension_numbers<[1], [0], [0], [1], [0, 0, 1, 1], [], []>} : vector<8x32xf32>, vector<32x64xf32>, vector<8x64xf32> -> vector<8x64xf32>
    %c0_88 = arith.constant 0 : index
    %c0_89 = arith.constant 0 : index
    %220 = vector.load %arg20[%c0_88, %c0_89] : memref<1x64xf32, #tpu.memory_space<vmem>>, vector<1x64xf32>
    %221 = vector.broadcast %220 : vector<1x64xf32> to vector<8x64xf32>
    %222 = arith.addf %219, %221 : vector<8x64xf32>
    %cst_90 = arith.constant 0.000000e+00 : f32
    %223 = vector.broadcast %cst_90 : f32 to vector<8x64xf32>
    %224 = arith.maximumf %222, %223 : vector<8x64xf32>
    %c0_91 = arith.constant 0 : index
    %c0_92 = arith.constant 0 : index
    %225 = vector.load %arg21[%c0_91, %c0_92] : memref<64x32xf32, #tpu.memory_space<vmem>>, vector<64x32xf32>
    %cst_93 = arith.constant dense<0.000000e+00> : vector<8x32xf32>
    %226 = tpu.matmul %224, %225, %cst_93 {dimension_numbers = #tpu.dot_dimension_numbers<[1], [0], [0], [1], [0, 0, 1, 1], [], []>} : vector<8x64xf32>, vector<64x32xf32>, vector<8x32xf32> -> vector<8x32xf32>
    %c0_94 = arith.constant 0 : index
    %c0_95 = arith.constant 0 : index
    %227 = vector.load %arg22[%c0_94, %c0_95] : memref<1x32xf32, #tpu.memory_space<vmem>>, vector<1x32xf32>
    %228 = vector.broadcast %227 : vector<1x32xf32> to vector<8x32xf32>
    %229 = arith.addf %226, %228 : vector<8x32xf32>
    %230 = arith.addf %217, %229 : vector<8x32xf32>
    %c0_96 = arith.constant 0 : index
    %c0_97 = arith.constant 0 : index
    %231 = vector.load %arg23[%c0_96, %c0_97] : memref<1x32xf32, #tpu.memory_space<vmem>>, vector<1x32xf32>
    %c0_98 = arith.constant 0 : index
    %c0_99 = arith.constant 0 : index
    %232 = vector.load %arg24[%c0_98, %c0_99] : memref<1x32xf32, #tpu.memory_space<vmem>>, vector<1x32xf32>
    %cst_100 = arith.constant dense<0.000000e+00> : vector<8xf32>
    %233 = vector.multi_reduction <add>, %230, %cst_100 [1] : vector<8x32xf32> to vector<8xf32>
    %234 = vector.shape_cast %233 : vector<8xf32> to vector<8x1xf32>
    %cst_101 = arith.constant 3.200000e+01 : f32
    %235 = vector.broadcast %cst_101 : f32 to vector<8x1xf32>
    %236 = arith.divf %234, %235 : vector<8x1xf32>
    %237 = vector.broadcast %236 : vector<8x1xf32> to vector<8x32xf32>
    %238 = arith.subf %230, %237 : vector<8x32xf32>
    %239 = arith.mulf %238, %238 : vector<8x32xf32>
    %cst_102 = arith.constant dense<0.000000e+00> : vector<8xf32>
    %240 = vector.multi_reduction <add>, %239, %cst_102 [1] : vector<8x32xf32> to vector<8xf32>
    %241 = vector.shape_cast %240 : vector<8xf32> to vector<8x1xf32>
    %cst_103 = arith.constant 3.200000e+01 : f32
    %242 = vector.broadcast %cst_103 : f32 to vector<8x1xf32>
    %243 = arith.divf %241, %242 : vector<8x1xf32>
    %244 = vector.broadcast %236 : vector<8x1xf32> to vector<8x32xf32>
    %245 = arith.subf %230, %244 : vector<8x32xf32>
    %cst_104 = arith.constant 9.99999974E-6 : f32
    %246 = vector.broadcast %cst_104 : f32 to vector<8x1xf32>
    %247 = arith.addf %243, %246 : vector<8x1xf32>
    %248 = math.rsqrt %247 : vector<8x1xf32>
    %249 = vector.broadcast %248 : vector<8x1xf32> to vector<8x32xf32>
    %250 = arith.mulf %245, %249 : vector<8x32xf32>
    %251 = vector.broadcast %231 : vector<1x32xf32> to vector<8x32xf32>
    %252 = arith.mulf %250, %251 : vector<8x32xf32>
    %253 = vector.broadcast %232 : vector<1x32xf32> to vector<8x32xf32>
    %254 = arith.addf %252, %253 : vector<8x32xf32>
    %c0_105 = arith.constant 0 : index
    %c0_106 = arith.constant 0 : index
    %c0_107 = arith.constant 0 : index
    %255 = vector.load %arg25[%c0_105, %c0_106, %c0_107] : memref<1x8x32xf32, #tpu.memory_space<vmem>>, vector<1x8x32xf32>
    %256 = vector.shape_cast %255 : vector<1x8x32xf32> to vector<8x32xf32>
    %257 = vector.shape_cast %254 : vector<8x32xf32> to vector<1x8x32xf32>
    tpu.vector_store %arg25[%c0_105, %c0_106, %c0_107], %257 {strides = array<i32>} : memref<1x8x32xf32, #tpu.memory_space<vmem>>, vector<1x8x32xf32>,
    return
  }
  func.func @transform_0(%arg0: i32) -> (i32, i32, i32) {
    %c0_i32 = arith.constant 0 : i32
    %c0_i32_0 = arith.constant 0 : i32
    %c0_i32_1 = arith.constant 0 : i32
    return %arg0, %c0_i32, %c0_i32_0 : i32, i32, i32
  }
  func.func @transform_1(%arg0: i32) -> (i32, i32, i32) {
    %c0_i32 = arith.constant 0 : i32
    %c0_i32_0 = arith.constant 0 : i32
    %c0_i32_1 = arith.constant 0 : i32
    return %arg0, %c0_i32, %c0_i32_0 : i32, i32, i32
  }
  func.func @transform_2(%arg0: i32) -> (i32, i32, i32) {
    %c0_i32 = arith.constant 0 : i32
    %c0_i32_0 = arith.constant 0 : i32
    %c0_i32_1 = arith.constant 0 : i32
    return %arg0, %c0_i32, %c0_i32_0 : i32, i32, i32
  }
  func.func @transform_3(%arg0: i32) -> (i32, i32, i32) {
    %c0_i32 = arith.constant 0 : i32
    %c0_i32_0 = arith.constant 0 : i32
    %c0_i32_1 = arith.constant 0 : i32
    return %arg0, %c0_i32, %c0_i32_0 : i32, i32, i32
  }
  func.func @transform_4(%arg0: i32) -> (i32, i32) {
    %c0_i32 = arith.constant 0 : i32
    %c0_i32_0 = arith.constant 0 : i32
    %c0_i32_1 = arith.constant 0 : i32
    return %c0_i32, %c0_i32_0 : i32, i32
  }
  func.func @transform_5(%arg0: i32) -> (i32, i32) {
    %c0_i32 = arith.constant 0 : i32
    %c0_i32_0 = arith.constant 0 : i32
    %c0_i32_1 = arith.constant 0 : i32
    return %c0_i32, %c0_i32_0 : i32, i32
  }
  func.func @transform_6(%arg0: i32) -> (i32, i32) {
    %c0_i32 = arith.constant 0 : i32
    %c0_i32_0 = arith.constant 0 : i32
    %c0_i32_1 = arith.constant 0 : i32
    return %c0_i32, %c0_i32_0 : i32, i32
  }
  func.func @transform_7(%arg0: i32) -> (i32, i32) {
    %c0_i32 = arith.constant 0 : i32
    %c0_i32_0 = arith.constant 0 : i32
    %c0_i32_1 = arith.constant 0 : i32
    return %c0_i32, %c0_i32_0 : i32, i32
  }
  func.func @transform_8(%arg0: i32) -> (i32, i32) {
    %c0_i32 = arith.constant 0 : i32
    %c0_i32_0 = arith.constant 0 : i32
    %c0_i32_1 = arith.constant 0 : i32
    return %c0_i32, %c0_i32_0 : i32, i32
  }
  func.func @transform_9(%arg0: i32) -> (i32, i32) {
    %c0_i32 = arith.constant 0 : i32
    %c0_i32_0 = arith.constant 0 : i32
    %c0_i32_1 = arith.constant 0 : i32
    return %c0_i32, %c0_i32_0 : i32, i32
  }
  func.func @transform_10(%arg0: i32) -> (i32, i32) {
    %c0_i32 = arith.constant 0 : i32
    %c0_i32_0 = arith.constant 0 : i32
    %c0_i32_1 = arith.constant 0 : i32
    return %c0_i32, %c0_i32_0 : i32, i32
  }
  func.func @transform_11(%arg0: i32) -> (i32, i32) {
    %c0_i32 = arith.constant 0 : i32
    %c0_i32_0 = arith.constant 0 : i32
    %c0_i32_1 = arith.constant 0 : i32
    return %c0_i32, %c0_i32_0 : i32, i32
  }
  func.func @transform_12(%arg0: i32) -> (i32, i32) {
    %c0_i32 = arith.constant 0 : i32
    %c0_i32_0 = arith.constant 0 : i32
    %c0_i32_1 = arith.constant 0 : i32
    return %c0_i32, %c0_i32_0 : i32, i32
  }
  func.func @transform_13(%arg0: i32) -> (i32, i32) {
    %c0_i32 = arith.constant 0 : i32
    %c0_i32_0 = arith.constant 0 : i32
    %c0_i32_1 = arith.constant 0 : i32
    return %c0_i32, %c0_i32_0 : i32, i32
  }
  func.func @transform_14(%arg0: i32) -> (i32, i32) {
    %c0_i32 = arith.constant 0 : i32
    %c0_i32_0 = arith.constant 0 : i32
    %c0_i32_1 = arith.constant 0 : i32
    return %c0_i32, %c0_i32_0 : i32, i32
  }
  func.func @transform_15(%arg0: i32) -> (i32, i32) {
    %c0_i32 = arith.constant 0 : i32
    %c0_i32_0 = arith.constant 0 : i32
    %c0_i32_1 = arith.constant 0 : i32
    return %c0_i32, %c0_i32_0 : i32, i32
  }
  func.func @transform_16(%arg0: i32) -> (i32, i32) {
    %c0_i32 = arith.constant 0 : i32
    %c0_i32_0 = arith.constant 0 : i32
    %c0_i32_1 = arith.constant 0 : i32
    return %c0_i32, %c0_i32_0 : i32, i32
  }
  func.func @transform_17(%arg0: i32) -> (i32, i32) {
    %c0_i32 = arith.constant 0 : i32
    %c0_i32_0 = arith.constant 0 : i32
    %c0_i32_1 = arith.constant 0 : i32
    return %c0_i32, %c0_i32_0 : i32, i32
  }
  func.func @transform_18(%arg0: i32) -> (i32, i32) {
    %c0_i32 = arith.constant 0 : i32
    %c0_i32_0 = arith.constant 0 : i32
    %c0_i32_1 = arith.constant 0 : i32
    return %c0_i32, %c0_i32_0 : i32, i32
  }
  func.func @transform_19(%arg0: i32) -> (i32, i32) {
    %c0_i32 = arith.constant 0 : i32
    %c0_i32_0 = arith.constant 0 : i32
    %c0_i32_1 = arith.constant 0 : i32
    return %c0_i32, %c0_i32_0 : i32, i32
  }
  func.func @transform_20(%arg0: i32) -> (i32, i32) {
    %c0_i32 = arith.constant 0 : i32
    %c0_i32_0 = arith.constant 0 : i32
    %c0_i32_1 = arith.constant 0 : i32
    return %c0_i32, %c0_i32_0 : i32, i32
  }
  func.func @transform_21(%arg0: i32) -> (i32, i32) {
    %c0_i32 = arith.constant 0 : i32
    %c0_i32_0 = arith.constant 0 : i32
    %c0_i32_1 = arith.constant 0 : i32
    return %c0_i32, %c0_i32_0 : i32, i32
  }
  func.func @transform_22(%arg0: i32) -> (i32, i32) {
    %c0_i32 = arith.constant 0 : i32
    %c0_i32_0 = arith.constant 0 : i32
    %c0_i32_1 = arith.constant 0 : i32
    return %c0_i32, %c0_i32_0 : i32, i32
  }
  func.func @transform_23(%arg0: i32) -> (i32, i32) {
    %c0_i32 = arith.constant 0 : i32
    %c0_i32_0 = arith.constant 0 : i32
    %c0_i32_1 = arith.constant 0 : i32
    return %c0_i32, %c0_i32_0 : i32, i32
  }
  func.func @transform_24(%arg0: i32) -> (i32, i32, i32) {
    %c0_i32 = arith.constant 0 : i32
    %c0_i32_0 = arith.constant 0 : i32
    %c0_i32_1 = arith.constant 0 : i32
    return %arg0, %c0_i32, %c0_i32_0 : i32, i32, i32
  }
}

module attributes {stable_mosaic.version = 11 : i64} {
  func.func @_ln_proj_kernel(%arg0: i32, %arg1: memref<1x8x32xf32, #tpu.memory_space<vmem>>, %arg2: memref<1x32xf32, #tpu.memory_space<vmem>>, %arg3: memref<1x32xf32, #tpu.memory_space<vmem>>, %arg4: memref<32x128xf32, #tpu.memory_space<vmem>>, %arg5: memref<1x128xf32, #tpu.memory_space<vmem>>, %arg6: memref<1x8x128xf32, #tpu.memory_space<vmem>>) attributes {dimension_semantics = [#tpu.dimension_semantics<parallel>], iteration_bounds = array<i64: 2>, scalar_prefetch = 0 : i64, scratch_operands = 0 : i64, tpu.core_type = #tpu.core_type<tc>, window_params = [{transform_indices = @transform_0, window_bounds = array<i64: 1, 8, 32>}, {pipeline_mode = #tpu.pipeline_mode<synchronous>, transform_indices = @transform_1, window_bounds = array<i64: 1, 32>}, {pipeline_mode = #tpu.pipeline_mode<synchronous>, transform_indices = @transform_2, window_bounds = array<i64: 1, 32>}, {pipeline_mode = #tpu.pipeline_mode<synchronous>, transform_indices = @transform_3, window_bounds = array<i64: 32, 128>}, {pipeline_mode = #tpu.pipeline_mode<synchronous>, transform_indices = @transform_4, window_bounds = array<i64: 1, 128>}, {transform_indices = @transform_5, window_bounds = array<i64: 1, 8, 128>}]} {
    %c0 = arith.constant 0 : index
    %c0_0 = arith.constant 0 : index
    %c0_1 = arith.constant 0 : index
    %0 = vector.load %arg1[%c0, %c0_0, %c0_1] : memref<1x8x32xf32, #tpu.memory_space<vmem>>, vector<1x8x32xf32>
    %1 = vector.shape_cast %0 : vector<1x8x32xf32> to vector<8x32xf32>
    %c0_2 = arith.constant 0 : index
    %c0_3 = arith.constant 0 : index
    %2 = vector.load %arg2[%c0_2, %c0_3] : memref<1x32xf32, #tpu.memory_space<vmem>>, vector<1x32xf32>
    %c0_4 = arith.constant 0 : index
    %c0_5 = arith.constant 0 : index
    %3 = vector.load %arg3[%c0_4, %c0_5] : memref<1x32xf32, #tpu.memory_space<vmem>>, vector<1x32xf32>
    %cst = arith.constant dense<0.000000e+00> : vector<8xf32>
    %4 = vector.multi_reduction <add>, %1, %cst [1] : vector<8x32xf32> to vector<8xf32>
    %5 = vector.shape_cast %4 : vector<8xf32> to vector<8x1xf32>
    %cst_6 = arith.constant 3.200000e+01 : f32
    %6 = vector.broadcast %cst_6 : f32 to vector<8x1xf32>
    %7 = arith.divf %5, %6 : vector<8x1xf32>
    %8 = vector.broadcast %7 : vector<8x1xf32> to vector<8x32xf32>
    %9 = arith.subf %1, %8 : vector<8x32xf32>
    %10 = arith.mulf %9, %9 : vector<8x32xf32>
    %cst_7 = arith.constant dense<0.000000e+00> : vector<8xf32>
    %11 = vector.multi_reduction <add>, %10, %cst_7 [1] : vector<8x32xf32> to vector<8xf32>
    %12 = vector.shape_cast %11 : vector<8xf32> to vector<8x1xf32>
    %cst_8 = arith.constant 3.200000e+01 : f32
    %13 = vector.broadcast %cst_8 : f32 to vector<8x1xf32>
    %14 = arith.divf %12, %13 : vector<8x1xf32>
    %15 = vector.broadcast %7 : vector<8x1xf32> to vector<8x32xf32>
    %16 = arith.subf %1, %15 : vector<8x32xf32>
    %cst_9 = arith.constant 9.99999974E-6 : f32
    %17 = vector.broadcast %cst_9 : f32 to vector<8x1xf32>
    %18 = arith.addf %14, %17 : vector<8x1xf32>
    %19 = math.rsqrt %18 : vector<8x1xf32>
    %20 = vector.broadcast %19 : vector<8x1xf32> to vector<8x32xf32>
    %21 = arith.mulf %16, %20 : vector<8x32xf32>
    %22 = vector.broadcast %2 : vector<1x32xf32> to vector<8x32xf32>
    %23 = arith.mulf %21, %22 : vector<8x32xf32>
    %24 = vector.broadcast %3 : vector<1x32xf32> to vector<8x32xf32>
    %25 = arith.addf %23, %24 : vector<8x32xf32>
    %c0_10 = arith.constant 0 : index
    %c0_11 = arith.constant 0 : index
    %26 = vector.load %arg4[%c0_10, %c0_11] : memref<32x128xf32, #tpu.memory_space<vmem>>, vector<32x128xf32>
    %cst_12 = arith.constant dense<0.000000e+00> : vector<8x128xf32>
    %27 = tpu.matmul %25, %26, %cst_12 {dimension_numbers = #tpu.dot_dimension_numbers<[1], [0], [0], [1], [0, 0, 1, 1], [], []>} : vector<8x32xf32>, vector<32x128xf32>, vector<8x128xf32> -> vector<8x128xf32>
    %c0_13 = arith.constant 0 : index
    %c0_14 = arith.constant 0 : index
    %28 = vector.load %arg5[%c0_13, %c0_14] : memref<1x128xf32, #tpu.memory_space<vmem>>, vector<1x128xf32>
    %29 = vector.broadcast %28 : vector<1x128xf32> to vector<8x128xf32>
    %30 = arith.addf %27, %29 : vector<8x128xf32>
    %c0_15 = arith.constant 0 : index
    %c0_16 = arith.constant 0 : index
    %c0_17 = arith.constant 0 : index
    %31 = vector.load %arg6[%c0_15, %c0_16, %c0_17] : memref<1x8x128xf32, #tpu.memory_space<vmem>>, vector<1x8x128xf32>
    %32 = vector.shape_cast %31 : vector<1x8x128xf32> to vector<8x128xf32>
    %33 = vector.shape_cast %30 : vector<8x128xf32> to vector<1x8x128xf32>
    tpu.vector_store %arg6[%c0_15, %c0_16, %c0_17], %33 {strides = array<i32>} : memref<1x8x128xf32, #tpu.memory_space<vmem>>, vector<1x8x128xf32>,
    return
  }
  func.func @transform_0(%arg0: i32) -> (i32, i32, i32) {
    %c0_i32 = arith.constant 0 : i32
    %c0_i32_0 = arith.constant 0 : i32
    %c0_i32_1 = arith.constant 0 : i32
    return %arg0, %c0_i32, %c0_i32_0 : i32, i32, i32
  }
  func.func @transform_1(%arg0: i32) -> (i32, i32) {
    %c0_i32 = arith.constant 0 : i32
    %c0_i32_0 = arith.constant 0 : i32
    %c0_i32_1 = arith.constant 0 : i32
    return %c0_i32, %c0_i32_0 : i32, i32
  }
  func.func @transform_2(%arg0: i32) -> (i32, i32) {
    %c0_i32 = arith.constant 0 : i32
    %c0_i32_0 = arith.constant 0 : i32
    %c0_i32_1 = arith.constant 0 : i32
    return %c0_i32, %c0_i32_0 : i32, i32
  }
  func.func @transform_3(%arg0: i32) -> (i32, i32) {
    %c0_i32 = arith.constant 0 : i32
    %c0_i32_0 = arith.constant 0 : i32
    %c0_i32_1 = arith.constant 0 : i32
    return %c0_i32, %c0_i32_0 : i32, i32
  }
  func.func @transform_4(%arg0: i32) -> (i32, i32) {
    %c0_i32 = arith.constant 0 : i32
    %c0_i32_0 = arith.constant 0 : i32
    %c0_i32_1 = arith.constant 0 : i32
    return %c0_i32, %c0_i32_0 : i32, i32
  }
  func.func @transform_5(%arg0: i32) -> (i32, i32, i32) {
    %c0_i32 = arith.constant 0 : i32
    %c0_i32_0 = arith.constant 0 : i32
    %c0_i32_1 = arith.constant 0 : i32
    return %arg0, %c0_i32, %c0_i32_0 : i32, i32, i32
  }
}

</mosaic_0001>

<bundles_post_ra>
// kernel: net_forward.8
= control target key start
LH: loop header
LB: loop body
LE: loop exit
PB: predicated region body
PF: predicated region fallthrough
CT: control target
= control target key end

     0   :  { %s301_s12 = smov 0   ;;  %s327_s0 = inlined_call_operand.vmem [shape: f32[2,8,32], index: 0, kind: input, shape index: {}]   ;;  %s328_s1 = inlined_call_operand.vmem [shape: f32[1,32], index: 1, kind: input, shape index: {}]   ;;  %s329_s2 = inlined_call_operand.vmem [shape: f32[1,32], index: 2, kind: input, shape index: {}]   ;;  %s330_s3 = inlined_call_operand.vmem [shape: f32[2,8,32], index: 3, kind: output, shape index: {}]  }
   0x1 LB: > { %s252_s13 = sadd.s32 4294967295, %s279_s12   ;;  %p256_p0 = scmp.ge.s32.totalorder %s279_s12, 1  ;;  %s279_s12 = sphi %s301_s12, %s13_s12  }
   0x2   : > { %p136_p1 = scmp.lt.s32.totalorder %s279_s12, 3 }
   0x4   : > { %p137_p2 = pnand %p256_p0, %p136_p1 }
   0x5   : > { %p158_p3 = scmp.lt.s32.totalorder (!%p137_p2), %s252_s13, 1  ;;  %vm169_vm0 = vcmask (!%p137_p2), 261120   ;;  %v259_v11 = vld [vmem:[%s328_s1] ss:$0 sm:$0xff] (!%p137_p2) }
   0x6   : > { %140 = sbr.rel (%p137_p2) target bundleno = 331 (0x14b), region = 32  ;;  %v260_v13 = vld [vmem:[%s329_s2] ss:$0 sm:$0xff] (!%p137_p2) }
   0xd   : > { %s332_s13 = smov (!%p158_p3, %s252_s13), 1 }
   0xe   : > { %s257_s14 = sshll.u32 %s332_s13, 3 }
   0xf   : > { %s161_s17 = scalar_lea.vmem %s327_s0, %s257_s14  ;;  %s165_s24 = scalar_lea.vmem %s330_s3, %s257_s14 }
  0x10   : > { %v166_v0 = vld [vmem:[%s161_s17] sm:$0xff] }
  0x11   : > { %v170_v1 = vsel %vm169_vm0, %v166_v0, 0.0 }
  0x12   : > { %171 = vadd.xlane.f32.xlu0 %v170_v1 }
  0x9f   : > { %v172_v2 = vpop.xlane.xlu0 %171 }
  0xa0   : > { %v174_v3 = vmul.f32 0.03125, %v172_v2 }
  0xa2   : > { %v175_v4 = vsub.f32 %v166_v0, %v174_v3 }
  0xa4   : > { %v176_v5 = vmul.f32 %v175_v4, %v175_v4 }
  0xa6   : > { %v177_v6 = vsel %vm169_vm0, %v176_v5, 0.0 }
  0xa7   : > { %178 = vadd.xlane.f32.xlu0 %v177_v6 }
 0x134   : > { %v179_v7 = vpop.xlane.xlu0 %178 }
 0x135   : > { %v180_v8 = vmul.f32 0.03125, %v179_v7 }
 0x137   : > { %v181_v9 = vadd.f32 1e-05, %v180_v8 }
 0x139   : > { %271 = vrsqrt.f32 %v181_v9 }
 0x143   : > { %v272_v10 = vpop.eup %271 }
 0x144   : > { %v183_v12 = vmul.f32 %v272_v10, %v175_v4 }
 0x146   : > { %v190_v14 = vmul.f32 %v259_v11, %v183_v12 }
 0x148   : > { %v197_v15 = vadd.f32 %v260_v13, %v190_v14 }
 0x14a   : > { %198 = vst.msk [vmem:[%s165_s24] sm:$0xff] %vm169_vm0, %v197_v15 }
 0x14b PF: > { %s13_s12 = sadd.s32 1, %s279_s12  }
 0x14c   : > { %p10_p4 = scmp.ge.s32.totalorder %s13_s12, 4  }
 0x14e   :  { %12 = sbr.rel (!%p10_p4) target bundleno = 1 (0x1), region = 62 }

// kernel: net_forward.6
= control target key start
LH: loop header
LB: loop body
LE: loop exit
PB: predicated region body
PF: predicated region fallthrough
CT: control target
= control target key end

     0   :  { %s1970_s29 = smov 0   ;;  %s2168_s0 = inlined_call_operand.vmem [shape: f32[2,8,32], index: 0, kind: input, shape index: {}]   ;;  %s2169_s1 = inlined_call_operand.vmem [shape: f32[2,8,8], index: 1, kind: input, shape index: {}]   ;;  %s2170_s2 = inlined_call_operand.vmem [shape: f32[32,96], index: 2, kind: input, shape index: {}]   ;;  %s2171_s3 = inlined_call_operand.vmem [shape: f32[1,96], index: 3, kind: input, shape index: {}]   ;;  %s2172_s4 = inlined_call_operand.vmem [shape: f32[32,32], index: 4, kind: input, shape index: {}]   ;;  %s2173_s5 = inlined_call_operand.vmem [shape: f32[1,32], index: 5, kind: input, shape index: {}]   ;;  %s2174_s6 = inlined_call_operand.vmem [shape: f32[1,32], index: 6, kind: input, shape index: {}]   ;;  %s2175_s7 = inlined_call_operand.vmem [shape: f32[1,32], index: 7, kind: input, shape index: {}]   ;;  %s2176_s8 = inlined_call_operand.vmem [shape: f32[32,64], index: 8, kind: input, shape index: {}]   ;;  %s2177_s9 = inlined_call_operand.vmem [shape: f32[1,64], index: 9, kind: input, shape index: {}]   ;;  %s2178_s10 = inlined_call_operand.vmem [shape: f32[64,32], index: 10, kind: input, shape index: {}]   ;;  %s2179_s11 = inlined_call_operand.vmem [shape: f32[1,32], index: 11, kind: input, shape index: {}]   ;;  %s2180_s12 = inlined_call_operand.vmem [shape: f32[1,32], index: 12, kind: input, shape index: {}]   ;;  %s2181_s13 = inlined_call_operand.vmem [shape: f32[1,32], index: 13, kind: input, shape index: {}]   ;;  %s2182_s14 = inlined_call_operand.vmem [shape: f32[2,8,32], index: 14, kind: output, shape index: {}]  }
   0x1 LB: > { %s1629_s30 = sadd.s32 4294967295, %s1876_s29   ;;  %p1633_p0 = scmp.ge.s32.totalorder %s1876_s29, 1  ;;  %s1876_s29 = sphi %s1970_s29, %s24_s29  }
   0x2   : > { %p420_p1 = scmp.lt.s32.totalorder %s1876_s29, 3 }
   0x4   : > { %p421_p2 = pnand %p1633_p0, %p420_p1 }
   0x5   : > { %v481_v0 = vld [vmem:[%s2170_s2] sm:$0xff] (!%p421_p2)  ;;  %v482_v1 = vld [vmem:[%s2170_s2 + $0x8] sm:$0xff] (!%p421_p2)  ;;  %v483_v2 = vld [vmem:[%s2170_s2 + $0x10] sm:$0xff] (!%p421_p2)  ;;  %v1878_v3 = vmov (!%p421_p2), 0.0|0.0   ;;  %vm1879_vm0 = vmmov (!%p421_p2), 0   ;;  %v1880_v6 = vmov (!%p421_p2), 0.0  }
   0x6   : > { %424 = sbr.rel (%p421_p2) target bundleno = 2537 (0x9e9), region = 76  ;;  %1795 = vmatprep.subr.bf16.mxu1 (!%p421_p2), %v1878_v3  ;;  %v1796_v4 = vpack.c.bf16 (!%p421_p2), %v482_v1, %v481_v0  ;;  %v484_v5 = vld [vmem:[%s2170_s2 + $0x18] sm:$0xff] (!%p421_p2)  ;;  %1711 = vmatprep.mubr.msk.f32.mxu1 (!%p421_p2), %vm1879_vm0, %v1880_v6  ;;  %p468_p3 = scmp.lt.s32.totalorder (!%p421_p2), %s1629_s30, 1  ;;  %vm492_vm1 = vcmask (!%p421_p2), 261120   ;;  %v1637_v9 = vld [vmem:[%s2171_s3] ss:$0 sm:$0xff] (!%p421_p2) }
   0x7   : > { %1724 = vmatprep.subr.mxu0 (!%p421_p2), %v1880_v6  ;;  %1726 = vmatprep.mubr.msk.f32.mxu0 (!%p421_p2), %vm1879_vm0, %v1880_v6  ;;  %v1799_v7 = vpack.c.bf16 (!%p421_p2), %v484_v5, %v483_v2  ;;  %s1882_s15 = smov (!%p421_p2), 96   ;;  %s1883_s16 = smov (!%p421_p2), 80   ;;  %vm570_vm2 = vcmask (!%p421_p2), 64512   ;;  %vm1240_vm3 = vcmask (!%p421_p2), 130048   ;;  %vm1242_vm4 = vcmask (!%p421_p2), 195584  }
   0x8   : > { %1797 = vmatpush3.bf16.msra.mxu1 (!%p421_p2), %v1796_v4  ;;  %s1884_s17 = smov (!%p421_p2), 88   ;;  %s1885_s18 = smov (!%p421_p2), 72   ;;  %vm1459_vm5 = vcmask (!%p421_p2), 523264  }
   0x9   : > { %1798 = vmatprep.subr.bf16.mxu1 (!%p421_p2), %v1878_v3  ;;  %s1886_s19 = smov (!%p421_p2), 112   ;;  %s1887_s20 = smov (!%p421_p2), 104  }
   0xa   : > { %s1888_s25 = smov (!%p421_p2), 56   ;;  %s1890_s27 = smov (!%p421_p2), 48  }
   0xb   : > { %s1891_s28 = smov (!%p421_p2), 40  }
   0xc   : > { %1800 = vmatpush3.bf16.msra.mxu1 (!%p421_p2), %v1799_v7 }
   0xd   : > { %s2184_s30 = smov (!%p468_p3, %s1629_s30), 1  ;;  %1714 = vmatprep.subr.mxu1 %v1880_v6 }
   0xe   : > { %s1997_s23 = sshll.u32 %s2184_s30, 3  ;;  %s1881_s30 = smov 120  }
   0xf   : > { %s471_s26 = scalar_lea.vmem %s2168_s0, %s1997_s23  ;;  %s475_s24 = scalar_lea.vmem %s2169_s1, %s1997_s23 }
  0x10   : > { %v2003_v8 = vld [vmem:[%s471_s26] sm:$0xff]  ;;  %s1889_s26 = smov 64  }
  0x11   : > { %1712 = vmatmul.mubr.msk.f32.vlgmr.msra.gmra.mrb[0].mxu1 %vm492_vm1, %v2003_v8  ;;  %v566_v20 = vld [vmem:[%s475_s24] sm:$0xff]  ;;  %s1893_s24 = smov 16  }
  0x12   : > { %1716 = vmatprep.mubr.msk.f32.mxu1 %vm1879_vm0, %v1880_v6 }
  0xe4   : > { %v562_v10 = vpop.f32.mrb[0].mxu1 }
  0xe5   : > { %v2013_v11 = vadd.f32 %v1637_v9, %v562_v10  ;;  %v1713_v12 = vpop.f32.mrb[1].mxu1 }
  0xe6   : > { %v1244_v12 = vld [vmem:[%s2172_s4] sm:$0xff] }
  0xe7   : > { %732 = vrot.lane.b32.xlu1 %v2013_v11, %s1881_s30  ;;  %568 = vrot.lane.b32.xlu0 %v2013_v11, %s1882_s15 }
  0xeb   : > { %899 = vrot.lane.b32.xlu1 %v2013_v11, %s1883_s16  ;;  %734 = vrot.lane.b32.xlu0 %v2013_v11, %s1884_s17 }
  0xef   : > { %1064 = vrot.lane.b32.xlu1 %v2013_v11, %s1885_s18  ;;  %897 = vrot.lane.b32.xlu0 %v2013_v11, %s1886_s19  ;;  %s1892_s18 = smov 8  }
  0xf3   : > { %1062 = vrot.lane.b32.xlu0 %v2013_v11, %s1887_s20 }
 0x159   : > { %v733_v13 = vpop.permute.xlu1 %732  ;;  %v569_v14 = vpop.permute.xlu0 %568 }
 0x15a   : > { %1715 = vmatpush3.xpose.msk.msra.mxu1 %vm570_vm2, %v569_v14 }
 0x15b   : > { %1719 = vmatprep.subr.mxu1 %v1880_v6 }
 0x15d   : > { %1717 = vmatmul.mubr.msk.f32.vlgmr.msra.gmra.mrb[2].mxu1 %vm570_vm2, %v2013_v11  ;;  %v735_v15 = vpop.permute.xlu0 %734  ;;  %v900_v16 = vpop.permute.xlu1 %899 }
 0x15e   : > { %1725 = vmatpush3.xpose.msk.msra.mxu0 %vm570_vm2, %v735_v15  ;;  %1721 = vmatprep.mubr.msk.f32.mxu1 %vm1879_vm0, %v1880_v6 }
 0x15f   : > { %1734 = vmatprep.subr.mxu0 %v1880_v6 }
 0x161   : > { %1727 = vmatmul.mubr.msk.f32.vlgmr.msra.gmra.mrb[0].mxu0 %vm570_vm2, %v733_v13  ;;  %v898_v17 = vpop.permute.xlu0 %897  ;;  %v1065_v18 = vpop.permute.xlu1 %1064  ;;  %v1245_v13 = vld [vmem:[%s2172_s4 + $0x8] sm:$0xff] }
 0x162   : > { %1735 = vmatpush3.xpose.msk.msra.mxu0 %vm570_vm2, %v900_v16  ;;  %1736 = vmatprep.mubr.msk.f32.mxu0 %vm1879_vm0, %v1880_v6  ;;  %v1802_v14 = vpack.c.bf16 %v1245_v13, %v1244_v12 }
 0x163   : > { %1744 = vmatprep.subr.mxu0 %v1880_v6 }
 0x165   : > { %1737 = vmatmul.mubr.msk.f32.vlgmr.msra.gmra.mrb[2].mxu0 %vm570_vm2, %v898_v17  ;;  %v1063_v19 = vpop.permute.xlu0 %1062 }
 0x166   : > { %1745 = vmatpush3.xpose.msk.msra.mxu0 %vm570_vm2, %v1065_v18  ;;  %1746 = vmatprep.mubr.msk.f32.mxu0 %vm1879_vm0, %v1880_v6 }
 0x167   : > { %1801 = vmatprep.subr.bf16.mxu0 %v1878_v3 }
 0x169   : > { %1747 = vmatmul.mubr.msk.f32.vlgmr.msra.gmra.mrb[4].mxu0 %vm570_vm2, %v1063_v19  ;;  %v1246_v19 = vld [vmem:[%s2172_s4 + $0x10] sm:$0xff] }
 0x16a   : > { %1762 = vmatprep.mubr.msk.f32.mxu0 %vm1879_vm0, %v1880_v6  ;;  %1803 = vmatpush3.bf16.msra.mxu0 %v1802_v14 }
 0x16b   : > { %1804 = vmatprep.subr.bf16.mxu0 %v1878_v3 }
 0x230   : > { %v641_v21 = vpop.f32.mrb[2].mxu1 }
 0x231   : > { %v642_v22 = vadd.f32 %v641_v21, %v566_v20  ;;  %v1718_v23 = vpop.f32.mrb[3].mxu1 }
 0x233   : > { %v645_v24 = vsel %vm570_vm2, %v642_v22, -inf }
 0x234   : > { %v806_v25 = vpop.f32.mrb[0].mxu0  ;;  %646 = vmax.xlane.f32.xlu1 %v645_v24 }
 0x235   : > { %v807_v26 = vadd.f32 %v806_v25, %v566_v20  ;;  %v1728_v27 = vpop.f32.mrb[1].mxu0 }
 0x237   : > { %v810_v28 = vsel %vm570_vm2, %v807_v26, -inf }
 0x238   : > { %811 = vmax.xlane.f32.xlu0 %v810_v28  ;;  %v971_v29 = vpop.f32.mrb[2].mxu0 }
 0x239   : > { %v972_v30 = vadd.f32 %v971_v29, %v566_v20  ;;  %v1738_v31 = vpop.f32.mrb[3].mxu0 }
 0x23b   : > { %v975_v32 = vsel %vm570_vm2, %v972_v30, -inf }
 0x23c   : > { %976 = vmax.xlane.f32.xlu0 %v975_v32  ;;  %v1136_v33 = vpop.f32.mrb[4].mxu0  ;;  %v1651_v32 = vld [vmem:[%s2173_s5] ss:$0 sm:$0xff] }
 0x23d   : > { %v1137_v34 = vadd.f32 %v1136_v33, %v566_v20  ;;  %v1748_v35 = vpop.f32.mrb[5].mxu0  ;;  %v1247_v20 = vld [vmem:[%s2172_s4 + $0x18] sm:$0xff] }
 0x23e   : > { %v1805_v21 = vpack.c.bf16 %v1247_v20, %v1246_v19 }
 0x23f   : > { %v1140_v36 = vsel %vm570_vm2, %v1137_v34, -inf }
 0x240   : > { %1141 = vmax.xlane.f32.xlu1 %v1140_v36  ;;  %1806 = vmatpush3.bf16.msra.mxu0 %v1805_v21 }
 0x241   : > { %1813 = vmatprep.subr.bf16.mxu0 %v1878_v3 }
 0x251   : > { %821 = vrot.lane.b32.xlu1 %v2013_v11, %s1888_s25  ;;  %s1894_s25 = smov 24  }
 0x2c1   : > { %v647_v37 = vpop.xlane.xlu1 %646 }
 0x2c2   : > { %v648_v38 = vsub.f32 %v642_v22, %v647_v37 }
 0x2c4   : > { %v649_v39 = vmul.f32 1.442695, %v648_v38 }
 0x2c5   : > { %v812_v40 = vpop.xlane.xlu0 %811 }
 0x2c6   : > { %1850 = vpow2.f32 %v649_v39  ;;  %v813_v41 = vsub.f32 %v807_v26, %v812_v40 }
 0x2c8   : > { %v814_v42 = vmul.f32 1.442695, %v813_v41 }
 0x2c9   : > { %v977_v52 = vpop.xlane.xlu0 %976 }
 0x2ca   : > { %1852 = vpow2.f32 %v814_v42  ;;  %v978_v53 = vsub.f32 %v972_v30, %v977_v52 }
 0x2cc   : > { %v979_v54 = vmul.f32 1.442695, %v978_v53  ;;  %v1448_v53 = vld [vmem:[%s2178_s10 + $0x20] sm:$0xff] }
 0x2cd   : > { %v1142_v43 = vpop.xlane.xlu1 %1141 }
 0x2ce   : > { %v1143_v44 = vsub.f32 %v1137_v34, %v1142_v43  ;;  %v1360_v43 = vld [vmem:[%s2176_s8 + $0x8] sm:$0xff] }
 0x2d0   : > { %v1851_v45 = vpop.eup %1850  ;;  %v1144_v46 = vmul.f32 1.442695, %v1143_v44 }
 0x2d1   : > { %v651_v47 = vsel %vm570_vm2, %v1851_v45, 0.0  ;;  %v822_v57 = vpop.permute.xlu1 %821 }
 0x2d2   : > { %1854 = vpow2.f32 %v1144_v46  ;;  %652 = vadd.xlane.f32.xlu0 %v651_v47  ;;  %v1444_v47 = vld [vmem:[%s2178_s10] sm:$0xff] }
 0x2d3   : > { %1856 = vpow2.f32 %v979_v54  ;;  %v1449_v54 = vld [vmem:[%s2178_s10 + $0x28] sm:$0xff] }
 0x2d4   : > { %v1853_v48 = vpop.eup %1852 }
 0x2d5   : > { %v816_v49 = vsel %vm570_vm2, %v1853_v48, 0.0 }
 0x2d6   : > { %817 = vadd.xlane.f32.xlu1 %v816_v49  ;;  %v1446_v49 = vld [vmem:[%s2178_s10 + $0x10] sm:$0xff] }
 0x2dc   : > { %v1855_v50 = vpop.eup %1854 }
 0x2dd   : > { %v1146_v51 = vsel %vm570_vm2, %v1855_v50, 0.0  ;;  %v1857_v55 = vpop.eup %1856 }
 0x2de   : > { %1147 = vadd.xlane.f32.xlu1 %v1146_v51  ;;  %v981_v56 = vsel %vm570_vm2, %v1857_v55, 0.0  ;;  %v1447_v51 = vld [vmem:[%s2178_s10 + $0x18] sm:$0xff] }
 0x2df   : > { %v1817_v52 = vpack.c.bf16 %v1447_v51, %v1446_v49 }
 0x2e8   : > { %656 = vrot.lane.b32.xlu0 %v2013_v11, %s1889_s26 }
 0x2ef   : > { %986 = vrot.lane.b32.xlu1 %v2013_v11, %s1890_s27 }
 0x307   : > { %982 = vadd.xlane.f32.xlu0 %v981_v56 }
 0x31d   : > { %1151 = vrot.lane.b32.xlu0 %v2013_v11, %s1891_s28 }
 0x35f   : > { %v653_v58 = vpop.xlane.xlu0 %652 }
 0x360   : > { %1858 = vrcp.f32 %v653_v58 }
 0x363   : > { %v657_v59 = vpop.permute.xlu0 %656  ;;  %v818_v60 = vpop.xlane.xlu1 %817 }
 0x364   : > { %1860 = vrcp.f32 %v818_v60  ;;  %1720 = vmatpush3.msra.mxu1 %v657_v59  ;;  %v1653_v60 = vld [vmem:[%s2174_s6] ss:$0 sm:$0xff] }
 0x365   : > { %1729 = vmatprep.subr.mxu1 %v1880_v6 }
 0x36a   : > { %v1859_v61 = vpop.eup %1858 }
 0x36b   : > { %v655_v62 = vmul.f32 %v1859_v61, %v1851_v45  ;;  %v1148_v63 = vpop.xlane.xlu1 %1147  ;;  %v1362_v45 = vld [vmem:[%s2176_s8 + $0x18] sm:$0xff] }
 0x36d   : > { %1722 = vmatmul.mubr.msk.f32.vlgmr.msra.gmra.mrb[4].mxu1 %vm570_vm2, %v655_v62  ;;  %v1654_v62 = vld [vmem:[%s2175_s7] ss:$0 sm:$0xff] }
 0x36e   : > { %v1861_v0 = vpop.eup %1860  ;;  %1730 = vmatpush3.msra.mxu1 %v822_v57  ;;  %1731 = vmatprep.mubr.msk.f32.mxu1 %vm1879_vm0, %v1880_v6 }
 0x36f   : > { %v820_v1 = vmul.f32 %v1861_v0, %v1853_v48  ;;  %v987_v2 = vpop.permute.xlu1 %986  ;;  %1739 = vmatprep.subr.mxu1 %v1880_v6  ;;  %v1445_v48 = vld [vmem:[%s2178_s10 + $0x8] sm:$0xff] }
 0x371   : > { %1732 = vmatmul.mubr.msk.f32.vlgmr.msra.gmra.mrb[6].mxu1 %vm570_vm2, %v820_v1  ;;  %v1451_v1 = vld [vmem:[%s2178_s10 + $0x38] sm:$0xff] }
 0x372   : > { %1740 = vmatpush3.msra.mxu1 %v987_v2  ;;  %1741 = vmatprep.mubr.msk.f32.mxu1 %vm1879_vm0, %v1880_v6 }
 0x373   : > { %1749 = vmatprep.subr.mxu1 %v1880_v6 }
 0x394   : > { %v983_v4 = vpop.xlane.xlu0 %982 }
 0x395   : > { %1862 = vrcp.f32 %v983_v4  ;;  %v1655_v4 = vld [vmem:[%s2177_s9] ss:$0 sm:$0xff] }
 0x396   : > { %1864 = vrcp.f32 %v1148_v63 }
 0x398   : > { %v1152_v10 = vpop.permute.xlu0 %1151 }
 0x39f   : > { %v1863_v5 = vpop.eup %1862 }
 0x3a0   : > { %v985_v7 = vmul.f32 %v1863_v5, %v1857_v55  ;;  %v1865_v9 = vpop.eup %1864  ;;  %v1820_v55 = vpack.c.bf16 %v1449_v54, %v1448_v53 }
 0x3a1   : > { %v1150_v11 = vmul.f32 %v1865_v9, %v1855_v50  ;;  %v1814_v50 = vpack.c.bf16 %v1445_v48, %v1444_v47 }
 0x3a2   : > { %1742 = vmatmul.mubr.msk.f32.vlgmr.msra.gmra.mrb[8].mxu1 %vm570_vm2, %v985_v7 }
 0x3a3   : > { %1750 = vmatpush3.msra.mxu1 %v1152_v10  ;;  %1751 = vmatprep.mubr.msk.f32.mxu1 %vm1879_vm0, %v1880_v6 }
 0x3a4   : > { %1807 = vmatprep.subr.bf16.mxu1 %v1878_v3 }
 0x3a6   : > { %1752 = vmatmul.mubr.msk.f32.vlgmr.msra.gmra.mrb[10].mxu1 %vm570_vm2, %v1150_v11  ;;  %v1657_v11 = vld [vmem:[%s2179_s11] ss:$0 sm:$0xff] }
 0x3a7   : > { %1773 = vmatprep.mubr.msk.f32.mxu1 %vm1879_vm0, %v1880_v6 }
 0x440   : > { %v728_v15 = vpop.f32.mrb[4].mxu1 }
 0x441   : > { %v1723_v16 = vpop.f32.mrb[5].mxu1 }
 0x444   : > { %v893_v17 = vpop.f32.mrb[6].mxu1 }
 0x445   : > { %1228 = vrot.lane.b32.xlu1 %v893_v17, %s1892_s18  ;;  %v1733_v18 = vpop.f32.mrb[7].mxu1 }
 0x475   : > { %v1058_v22 = vpop.f32.mrb[8].mxu1 }
 0x476   : > { %1232 = vrot.lane.b32.xlu0 %v1058_v22, %s1893_s24  ;;  %v1743_v23 = vpop.f32.mrb[9].mxu1  ;;  %s479_s24 = scalar_lea.vmem %s2182_s14, %s1997_s23 }
 0x479   : > { %v1223_v24 = vpop.f32.mrb[10].mxu1 }
 0x47a   : > { %1236 = vrot.lane.b32.xlu1 %v1223_v24, %s1894_s25  ;;  %v1753_v25 = vpop.f32.mrb[11].mxu1 }
 0x4b7   : > { %v1229_v26 = vpop.permute.xlu1 %1228 }
 0x4b8   : > { %v1239_v28 = vsel %vm570_vm2, %v728_v15, %v1229_v26  ;;  %v1659_v26 = vld [vmem:[%s2180_s12] ss:$0 sm:$0xff] }
 0x4e8   : > { %v1233_v27 = vpop.permute.xlu0 %1232 }
 0x4e9   : > { %v1241_v29 = vsel %vm1240_vm3, %v1239_v28, %v1233_v27  ;;  %v1660_v28 = vld [vmem:[%s2181_s13] ss:$0 sm:$0xff] }
 0x4ec   : > { %v1237_v30 = vpop.permute.xlu1 %1236 }
 0x4ed   : > { %v1243_v31 = vsel %vm1242_vm4, %v1241_v29, %v1237_v30 }
 0x4ee   : > { %1763 = vmatmul.mubr.msk.f32.vlgmr.msra.gmra.mrb[6].mxu0 %vm492_vm1, %v1243_v31 }
 0x4ef   : > { %1792 = vmatprep.mubr.msk.f32.mxu0 %vm1879_vm0, %v1880_v6  ;;  %v1359_v6 = vld [vmem:[%s2176_s8] sm:$0xff]  ;;  %1815 = vmatpush3.bf16.msra.mxu0 %v1814_v50 }
 0x4f0   : > { %v1808_v44 = vpack.c.bf16 %v1360_v43, %v1359_v6  ;;  %1816 = vmatprep.subr.bf16.mxu0 %v1878_v3 }
 0x4f2   : > { %1809 = vmatpush3.bf16.msra.mxu1 %v1808_v44 }
 0x4f3   : > { %1810 = vmatprep.subr.bf16.mxu1 %v1878_v3  ;;  %1818 = vmatpush3.bf16.msra.mxu0 %v1817_v52 }
 0x4f4   : > { %1819 = vmatprep.subr.bf16.mxu0 %v1878_v3 }
 0x4f7   : > { %1821 = vmatpush3.bf16.msra.mxu0 %v1820_v55 }
 0x4f8   : > { %1822 = vmatprep.subr.bf16.mxu0 %v1878_v3  ;;  %v1450_v3 = vld [vmem:[%s2178_s10 + $0x30] sm:$0xff] }
 0x4f9   : > { %v1823_v2 = vpack.c.bf16 %v1451_v1, %v1450_v3 }
 0x4fb   : > { %1824 = vmatpush3.bf16.msra.mxu0 %v1823_v2 }
 0x5c1   : > { %v1324_v33 = vpop.f32.mrb[6].mxu0 }
 0x5c2   : > { %v1325_v34 = vadd.f32 %v1651_v32, %v1324_v33  ;;  %v1764_v35 = vpop.f32.mrb[7].mxu0 }
 0x5c4   : > { %v1328_v36 = vadd.f32 %v1325_v34, %v2003_v8  ;;  %v1361_v8 = vld [vmem:[%s2176_s8 + $0x10] sm:$0xff] }
 0x5c5   : > { %v1811_v46 = vpack.c.bf16 %v1362_v45, %v1361_v8 }
 0x5c6   : > { %v1331_v37 = vsel %vm492_vm1, %v1328_v36, 0.0 }
 0x5c7   : > { %1332 = vadd.xlane.f32.xlu0 %v1331_v37  ;;  %1812 = vmatpush3.bf16.msra.mxu1 %v1811_v46 }
 0x654   : > { %v1333_v38 = vpop.xlane.xlu0 %1332 }
 0x655   : > { %v1335_v39 = vmul.f32 0.03125, %v1333_v38 }
 0x657   : > { %v1336_v40 = vsub.f32 %v1328_v36, %v1335_v39 }
 0x659   : > { %v1337_v41 = vmul.f32 %v1336_v40, %v1336_v40 }
 0x65b   : > { %v1338_v42 = vsel %vm492_vm1, %v1337_v41, 0.0 }
 0x65c   : > { %1339 = vadd.xlane.f32.xlu1 %v1338_v42 }
 0x6e9   : > { %v1340_v56 = vpop.xlane.xlu1 %1339 }
 0x6ea   : > { %v1341_v57 = vmul.f32 0.03125, %v1340_v56 }
 0x6ec   : > { %v1342_v58 = vadd.f32 1e-05, %v1341_v57 }
 0x6ee   : > { %1866 = vrsqrt.f32 %v1342_v58 }
 0x6f8   : > { %v1867_v59 = vpop.eup %1866 }
 0x6f9   : > { %v1344_v61 = vmul.f32 %v1867_v59, %v1336_v40 }
 0x6fb   : > { %v1351_v63 = vmul.f32 %v1653_v60, %v1344_v61 }
 0x6fd   : > { %v1358_v0 = vadd.f32 %v1654_v62, %v1351_v63 }
 0x6ff   : > { %1774 = vmatmul.mubr.msk.f32.vlgmr.msra.gmra.mrb[12].mxu1 %vm492_vm1, %v1358_v0 }
 0x7d2   : > { %v1439_v5 = vpop.f32.mrb[12].mxu1 }
 0x7d3   : > { %v1440_v7 = vadd.f32 %v1655_v4, %v1439_v5  ;;  %v1775_v9 = vpop.f32.mrb[13].mxu1 }
 0x7d5   : > { %v1443_v10 = vmax.f32 %v1440_v7, 0.0 }
 0x7d7   : > { %1793 = vmatmul.mubr.msk.f32.vlgmr.msra.gmra.mrb[8].mxu0 %vm1459_vm5, %v1443_v10 }
 0x8aa   : > { %v1529_v12 = vpop.f32.mrb[8].mxu0 }
 0x8ab   : > { %v1530_v13 = vadd.f32 %v1657_v11, %v1529_v12  ;;  %v1794_v14 = vpop.f32.mrb[9].mxu0 }
 0x8ad   : > { %v1533_v15 = vadd.f32 %v1530_v13, %v1358_v0 }
 0x8af   : > { %v1536_v16 = vsel %vm492_vm1, %v1533_v15, 0.0 }
 0x8b0   : > { %1537 = vadd.xlane.f32.xlu0 %v1536_v16 }
 0x93d   : > { %v1538_v17 = vpop.xlane.xlu0 %1537 }
 0x93e   : > { %v1539_v18 = vmul.f32 0.03125, %v1538_v17 }
 0x940   : > { %v1540_v19 = vsub.f32 %v1533_v15, %v1539_v18 }
 0x942   : > { %v1541_v20 = vmul.f32 %v1540_v19, %v1540_v19 }
 0x944   : > { %v1542_v21 = vsel %vm492_vm1, %v1541_v20, 0.0 }
 0x945   : > { %1543 = vadd.xlane.f32.xlu0 %v1542_v21 }
 0x9d2   : > { %v1544_v22 = vpop.xlane.xlu0 %1543 }
 0x9d3   : > { %v1545_v23 = vmul.f32 0.03125, %v1544_v22 }
 0x9d5   : > { %v1546_v24 = vadd.f32 1e-05, %v1545_v23 }
 0x9d7   : > { %1868 = vrsqrt.f32 %v1546_v24 }
 0x9e1   : > { %v1869_v25 = vpop.eup %1868 }
 0x9e2   : > { %v1548_v27 = vmul.f32 %v1869_v25, %v1540_v19 }
 0x9e4   : > { %v1555_v29 = vmul.f32 %v1659_v26, %v1548_v27 }
 0x9e6   : > { %v1562_v30 = vadd.f32 %v1660_v28, %v1555_v29 }
 0x9e8   : > { %1563 = vst.msk [vmem:[%s479_s24] sm:$0xff] %vm492_vm1, %v1562_v30 }
 0x9e9 PF: > { %s24_s29 = sadd.s32 1, %s1876_s29  }
 0x9ea   : > { %p21_p4 = scmp.ge.s32.totalorder %s24_s29, 4  }
 0x9ec   :  { %23 = sbr.rel (!%p21_p4) target bundleno = 1 (0x1), region = 109 }

// kernel: net_forward.9
= control target key start
LH: loop header
LB: loop body
LE: loop exit
PB: predicated region body
PF: predicated region fallthrough
CT: control target
= control target key end

     0   :  { %s3827_s0 = inlined_call_operand.vmem [shape: f32[2,8,32], index: 0, kind: input, shape index: {}]   ;;  %s3828_s1 = inlined_call_operand.vmem [shape: f32[2,8,32], index: 1, kind: input, shape index: {}]   ;;  %s3829_s2 = inlined_call_operand.vmem [shape: f32[2,8,8], index: 2, kind: input, shape index: {}]   ;;  %s3830_s3 = inlined_call_operand.vmem [shape: f32[2,8,8], index: 3, kind: input, shape index: {}]   ;;  %s3831_s4 = inlined_call_operand.vmem [shape: f32[32,96], index: 4, kind: input, shape index: {}]   ;;  %s3832_s5 = inlined_call_operand.vmem [shape: f32[1,96], index: 5, kind: input, shape index: {}]   ;;  %s3833_s6 = inlined_call_operand.vmem [shape: f32[32,32], index: 6, kind: input, shape index: {}]   ;;  %s3834_s7 = inlined_call_operand.vmem [shape: f32[1,32], index: 7, kind: input, shape index: {}]   ;;  %s3835_s8 = inlined_call_operand.vmem [shape: f32[1,32], index: 8, kind: input, shape index: {}]   ;;  %s3836_s9 = inlined_call_operand.vmem [shape: f32[1,32], index: 9, kind: input, shape index: {}]   ;;  %s3837_s10 = inlined_call_operand.vmem [shape: f32[32,32], index: 10, kind: input, shape index: {}]   ;;  %s3838_s11 = inlined_call_operand.vmem [shape: f32[1,32], index: 11, kind: input, shape index: {}]   ;;  %s3839_s12 = inlined_call_operand.vmem [shape: f32[32,64], index: 12, kind: input, shape index: {}]   ;;  %s3840_s13 = inlined_call_operand.vmem [shape: f32[1,64], index: 13, kind: input, shape index: {}]   ;;  %s3841_s14 = inlined_call_operand.vmem [shape: f32[32,32], index: 14, kind: input, shape index: {}]   ;;  %s3842_s15 = inlined_call_operand.vmem [shape: f32[1,32], index: 15, kind: input, shape index: {}]   ;;  %s3843_s16 = inlined_call_operand.vmem [shape: f32[1,32], index: 16, kind: input, shape index: {}]   ;;  %s3844_s17 = inlined_call_operand.vmem [shape: f32[1,32], index: 17, kind: input, shape index: {}]   ;;  %s3845_s18 = inlined_call_operand.vmem [shape: f32[32,64], index: 18, kind: input, shape index: {}]   ;;  %s3846_s19 = inlined_call_operand.vmem [shape: f32[1,64], index: 19, kind: input, shape index: {}]   ;;  %s3847_s20 = inlined_call_operand.vmem [shape: f32[64,32], index: 20, kind: input, shape index: {}]   ;;  %s3848_s21 = inlined_call_operand.vmem [shape: f32[1,32], index: 21, kind: input, shape index: {}]   ;;  %s3849_s22 = inlined_call_operand.vmem [shape: f32[1,32], index: 22, kind: input, shape index: {}]   ;;  %s3850_s23 = inlined_call_operand.vmem [shape: f32[1,32], index: 23, kind: input, shape index: {}]   ;;  %s3851_s24 = inlined_call_operand.vmem [shape: f32[2,8,32], index: 24, kind: output, shape index: {}]  }
   0x1   :  { %3865 = sst [smem:[#allocation2_spill]] %s3827_s0 }
   0x2   :  { %3866 = sst [smem:[#allocation3_spill]] %s3828_s1 }
   0x3   :  { %3867 = sst [smem:[#allocation4_spill]] %s3829_s2 }
   0x4   :  { %3868 = sst [smem:[#allocation5_spill]] %s3830_s3 }
   0x5   :  { %3869 = sst [smem:[#allocation6_spill]] %s3831_s4 }
   0x6   :  { %3870 = sst [smem:[#allocation7_spill]] %s3832_s5  ;;  %s3467_s5 = smov 0  }
   0x7   :  { %3871 = sst [smem:[#allocation8_spill]] %s3833_s6 }
   0x8   :  { %3872 = sst [smem:[#allocation9_spill]] %s3834_s7 }
   0x9   :  { %3873 = sst [smem:[#allocation10_spill]] %s3835_s8 }
   0xa LB: > { %s2914_s26 = sadd.s32 4294967295, %s3323_s5   ;;  %p2918_p0 = scmp.ge.s32.totalorder %s3323_s5, 1  ;;  %s3323_s5 = sphi %s3467_s5, %s34_s5  }
   0xb   : > { %p688_p1 = scmp.lt.s32.totalorder %s3323_s5, 3 }
   0xd   : > { %p689_p2 = pnand %p2918_p0, %p688_p1 }
   0xe   : > { %s3874_s6 = sld [smem:[#allocation6_spill]] (!%p689_p2)  ;;  %v3325_v3 = vmov (!%p689_p2), 0.0|0.0   ;;  %vm3326_vm0 = vmmov (!%p689_p2), 0   ;;  %v3327_v6 = vmov (!%p689_p2), 0.0   ;;  %p764_p3 = scmp.lt.s32.totalorder (!%p689_p2), %s2914_s26, 1  ;;  %vm797_vm1 = vcmask (!%p689_p2), 261120  }
   0xf   : > { %692 = sbr.rel (%p689_p2) target bundleno = 4272 (0x10b0), region = 116  ;;  %3206 = vmatprep.subr.bf16.mxu1 (!%p689_p2), %v3325_v3  ;;  %3049 = vmatprep.mubr.msk.f32.mxu1 (!%p689_p2), %vm3326_vm0, %v3327_v6  ;;  %s3875_s1 = sld [smem:[#allocation2_spill]] (!%p689_p2)  ;;  %vm875_vm2 = vcmask (!%p689_p2), 64512   ;;  %vm1545_vm3 = vcmask (!%p689_p2), 130048   ;;  %vm1547_vm4 = vcmask (!%p689_p2), 195584   ;;  %vm2720_vm5 = vcmask (!%p689_p2), 523264  }
  0x10   : > { %3062 = vmatprep.subr.mxu0 (!%p689_p2), %v3327_v6  ;;  %3064 = vmatprep.mubr.msk.f32.mxu0 (!%p689_p2), %vm3326_vm0, %v3327_v6  ;;  %s3876_s2 = sld [smem:[#allocation7_spill]] (!%p689_p2)  ;;  %s3328_s29 = smov (!%p689_p2), 120  }
  0x11   : > { %s3860_s0 = smov (!%p689_p2), 96   ;;  %s3856_s7 = smov (!%p689_p2), 80  }
  0x12   : > { %s3854_s30 = smov (!%p689_p2), 88   ;;  %s3855_s3 = smov (!%p689_p2), 72  }
  0x13   : > { %s3863_s8 = smov (!%p689_p2), 112   ;;  %s3861_s4 = smov (!%p689_p2), 104  }
  0x14   : > { %v786_v0 = vld [vmem:[%s3874_s6] sm:$0xff] (!%p689_p2)  ;;  %v787_v1 = vld [vmem:[%s3874_s6 + $0x8] sm:$0xff] (!%p689_p2)  ;;  %v788_v2 = vld [vmem:[%s3874_s6 + $0x10] sm:$0xff] (!%p689_p2)  ;;  %s3877_s28 = sld [smem:[#allocation4_spill]] (!%p689_p2) }
  0x15   : > { %v3207_v4 = vpack.c.bf16 (!%p689_p2), %v787_v1, %v786_v0  ;;  %v789_v5 = vld [vmem:[%s3874_s6 + $0x18] sm:$0xff] (!%p689_p2) }
  0x16   : > { %v3210_v7 = vpack.c.bf16 %v789_v5, %v788_v2  ;;  %s3893_s26 = smov (!%p764_p3, %s2914_s26), 1  ;;  %v2924_v9 = vld [vmem:[%s3876_s2] ss:$0 sm:$0xff]  ;;  %s3335_s2 = smov 56  }
  0x17   : > { %3208 = vmatpush3.bf16.msra.mxu1 %v3207_v4  ;;  %s3494_s25 = sshll.u32 %s3893_s26, 3 }
  0x18   : > { %3209 = vmatprep.subr.bf16.mxu1 %v3325_v3  ;;  %s767_s27 = scalar_lea.vmem %s3875_s1, %s3494_s25  ;;  %s3336_s1 = smov 64  }
  0x19   : > { %v3500_v8 = vld [vmem:[%s767_s27] sm:$0xff]  ;;  %s3337_s27 = smov 48  }
  0x1a   : > { %s775_s26 = scalar_lea.vmem %s3877_s28, %s3494_s25  ;;  %s3338_s28 = smov 40  }
  0x1b   : > { %3211 = vmatpush3.bf16.msra.mxu1 %v3210_v7  ;;  %v871_v20 = vld [vmem:[%s775_s26] sm:$0xff]  ;;  %s3879_s26 = sld [smem:[#allocation9_spill]] }
  0x1c   : > { %3052 = vmatprep.subr.mxu1 %v3327_v6 }
  0x1e   : > { %3050 = vmatmul.mubr.msk.f32.vlgmr.msra.gmra.mrb[0].mxu1 %vm797_vm1, %v3500_v8 }
  0x1f   : > { %3054 = vmatprep.mubr.msk.f32.mxu1 %vm3326_vm0, %v3327_v6 }
  0xf1   : > { %v867_v10 = vpop.f32.mrb[0].mxu1 }
  0xf2   : > { %v3510_v11 = vadd.f32 %v2924_v9, %v867_v10  ;;  %v3051_v12 = vpop.f32.mrb[1].mxu1 }
  0xf4   : > { %1037 = vrot.lane.b32.xlu1 %v3510_v11, %s3328_s29  ;;  %873 = vrot.lane.b32.xlu0 %v3510_v11, %s3860_s0  ;;  %s3887_s0 = smov 72  }
  0xf8   : > { %1204 = vrot.lane.b32.xlu1 %v3510_v11, %s3856_s7  ;;  %1039 = vrot.lane.b32.xlu0 %v3510_v11, %s3854_s30  ;;  %s3859_s30 = smov 8   ;;  %s3881_s7 = sld [smem:[#allocation10_spill]] }
  0xfc   : > { %1369 = vrot.lane.b32.xlu1 %v3510_v11, %s3855_s3  ;;  %1202 = vrot.lane.b32.xlu0 %v3510_v11, %s3863_s8 }
 0x100   : > { %1367 = vrot.lane.b32.xlu0 %v3510_v11, %s3861_s4  ;;  %s3880_s4 = sld [smem:[#allocation3_spill]] }
 0x106   : > { %s771_s8 = scalar_lea.vmem %s3880_s4, %s3494_s25 }
 0x166   : > { %v1038_v13 = vpop.permute.xlu1 %1037  ;;  %v874_v14 = vpop.permute.xlu0 %873 }
 0x167   : > { %3053 = vmatpush3.xpose.msk.msra.mxu1 %vm875_vm2, %v874_v14 }
 0x168   : > { %3057 = vmatprep.subr.mxu1 %v3327_v6 }
 0x16a   : > { %3055 = vmatmul.mubr.msk.f32.vlgmr.msra.gmra.mrb[2].mxu1 %vm875_vm2, %v3510_v11  ;;  %v1040_v15 = vpop.permute.xlu0 %1039  ;;  %v1205_v16 = vpop.permute.xlu1 %1204 }
 0x16b   : > { %3063 = vmatpush3.xpose.msk.msra.mxu0 %vm875_vm2, %v1040_v15  ;;  %3059 = vmatprep.mubr.msk.f32.mxu1 %vm3326_vm0, %v3327_v6 }
 0x16c   : > { %3072 = vmatprep.subr.mxu0 %v3327_v6 }
 0x16e   : > { %3065 = vmatmul.mubr.msk.f32.vlgmr.msra.gmra.mrb[0].mxu0 %vm875_vm2, %v1038_v13  ;;  %v1203_v17 = vpop.permute.xlu0 %1202  ;;  %v1370_v18 = vpop.permute.xlu1 %1369 }
 0x16f   : > { %3073 = vmatpush3.xpose.msk.msra.mxu0 %vm875_vm2, %v1205_v16  ;;  %3074 = vmatprep.mubr.msk.f32.mxu0 %vm3326_vm0, %v3327_v6 }
 0x170   : > { %3082 = vmatprep.subr.mxu0 %v3327_v6 }
 0x172   : > { %3075 = vmatmul.mubr.msk.f32.vlgmr.msra.gmra.mrb[2].mxu0 %vm875_vm2, %v1203_v17  ;;  %v1368_v19 = vpop.permute.xlu0 %1367 }
 0x173   : > { %3083 = vmatpush3.xpose.msk.msra.mxu0 %vm875_vm2, %v1370_v18  ;;  %3084 = vmatprep.mubr.msk.f32.mxu0 %vm3326_vm0, %v3327_v6 }
 0x174   : > { %3212 = vmatprep.subr.bf16.mxu0 %v3325_v3 }
 0x176   : > { %3085 = vmatmul.mubr.msk.f32.vlgmr.msra.gmra.mrb[4].mxu0 %vm875_vm2, %v1368_v19 }
 0x177   : > { %3100 = vmatprep.mubr.msk.f32.mxu0 %vm3326_vm0, %v3327_v6 }
 0x23d   : > { %v946_v21 = vpop.f32.mrb[2].mxu1 }
 0x23e   : > { %v947_v22 = vadd.f32 %v946_v21, %v871_v20  ;;  %v3056_v23 = vpop.f32.mrb[3].mxu1 }
 0x240   : > { %v950_v24 = vsel %vm875_vm2, %v947_v22, -inf }
 0x241   : > { %v1111_v25 = vpop.f32.mrb[0].mxu0  ;;  %951 = vmax.xlane.f32.xlu1 %v950_v24 }
 0x242   : > { %v1112_v26 = vadd.f32 %v1111_v25, %v871_v20  ;;  %v3066_v27 = vpop.f32.mrb[1].mxu0 }
 0x244   : > { %v1115_v28 = vsel %vm875_vm2, %v1112_v26, -inf }
 0x245   : > { %1116 = vmax.xlane.f32.xlu0 %v1115_v28  ;;  %v1276_v29 = vpop.f32.mrb[2].mxu0 }
 0x246   : > { %v1277_v30 = vadd.f32 %v1276_v29, %v871_v20  ;;  %v3076_v31 = vpop.f32.mrb[3].mxu0 }
 0x248   : > { %v1280_v32 = vsel %vm875_vm2, %v1277_v30, -inf }
 0x249   : > { %1281 = vmax.xlane.f32.xlu0 %v1280_v32  ;;  %v1441_v33 = vpop.f32.mrb[4].mxu0  ;;  %v2938_v32 = vld [vmem:[%s3879_s26] ss:$0 sm:$0xff]  ;;  %s3886_s26 = smov 80  }
 0x24a   : > { %v1442_v34 = vadd.f32 %v1441_v33, %v871_v20  ;;  %v3086_v35 = vpop.f32.mrb[5].mxu0 }
 0x24c   : > { %v1445_v36 = vsel %vm875_vm2, %v1442_v34, -inf }
 0x24d   : > { %1446 = vmax.xlane.f32.xlu1 %v1445_v36 }
 0x25e   : > { %1126 = vrot.lane.b32.xlu1 %v3510_v11, %s3335_s2 }
 0x2ce   : > { %v952_v37 = vpop.xlane.xlu1 %951 }
 0x2cf   : > { %v953_v38 = vsub.f32 %v947_v22, %v952_v37 }
 0x2d1   : > { %v954_v39 = vmul.f32 1.442695, %v953_v38 }
 0x2d2   : > { %v1117_v40 = vpop.xlane.xlu0 %1116 }
 0x2d3   : > { %3279 = vpow2.f32 %v954_v39  ;;  %v1118_v41 = vsub.f32 %v1112_v26, %v1117_v40 }
 0x2d5   : > { %v1119_v42 = vmul.f32 1.442695, %v1118_v41 }
 0x2d6   : > { %v1282_v52 = vpop.xlane.xlu0 %1281 }
 0x2d7   : > { %3281 = vpow2.f32 %v1119_v42  ;;  %v1283_v53 = vsub.f32 %v1277_v30, %v1282_v52  ;;  %v1666_v52 = vld [vmem:[%s3837_s10 + $0x10] sm:$0xff] }
 0x2d9   : > { %v1284_v54 = vmul.f32 1.442695, %v1283_v53  ;;  %v1667_v53 = vld [vmem:[%s3837_s10 + $0x18] sm:$0xff] }
 0x2da   : > { %v1447_v43 = vpop.xlane.xlu1 %1446 }
 0x2db   : > { %v1448_v44 = vsub.f32 %v1442_v34, %v1447_v43  ;;  %v1748_v43 = vld [vmem:[%s3839_s12] sm:$0xff] }
 0x2dd   : > { %v3280_v45 = vpop.eup %3279  ;;  %v1449_v46 = vmul.f32 1.442695, %v1448_v44  ;;  %v1749_v44 = vld [vmem:[%s3839_s12 + $0x8] sm:$0xff] }
 0x2de   : > { %v956_v47 = vsel %vm875_vm2, %v3280_v45, 0.0  ;;  %v1127_v57 = vpop.permute.xlu1 %1126 }
 0x2df   : > { %3283 = vpow2.f32 %v1449_v46  ;;  %957 = vadd.xlane.f32.xlu0 %v956_v47  ;;  %v1751_v46 = vld [vmem:[%s3839_s12 + $0x18] sm:$0xff] }
 0x2e0   : > { %3285 = vpow2.f32 %v1284_v54  ;;  %v3222_v54 = vpack.c.bf16 %v1667_v53, %v1666_v52 }
 0x2e1   : > { %v3282_v48 = vpop.eup %3281 }
 0x2e2   : > { %v1121_v49 = vsel %vm875_vm2, %v3282_v48, 0.0 }
 0x2e3   : > { %1122 = vadd.xlane.f32.xlu1 %v1121_v49  ;;  %v1664_v49 = vld [vmem:[%s3837_s10] sm:$0xff] }
 0x2e9   : > { %v3284_v50 = vpop.eup %3283 }
 0x2ea   : > { %v1451_v51 = vsel %vm875_vm2, %v3284_v50, 0.0  ;;  %v3286_v55 = vpop.eup %3285 }
 0x2eb   : > { %1452 = vadd.xlane.f32.xlu1 %v1451_v51  ;;  %v1286_v56 = vsel %vm875_vm2, %v3286_v55, 0.0 }
 0x2f5   : > { %961 = vrot.lane.b32.xlu0 %v3510_v11, %s3336_s1  ;;  %s3878_s1 = sld [smem:[#allocation8_spill]] }
 0x2fb   : > { %v1549_v12 = vld [vmem:[%s3878_s1] sm:$0xff]  ;;  %v1550_v13 = vld [vmem:[%s3878_s1 + $0x8] sm:$0xff]  ;;  %v1551_v19 = vld [vmem:[%s3878_s1 + $0x10] sm:$0xff] }
 0x2fc   : > { %1291 = vrot.lane.b32.xlu1 %v3510_v11, %s3337_s27  ;;  %v3213_v14 = vpack.c.bf16 %v1550_v13, %v1549_v12  ;;  %v1552_v20 = vld [vmem:[%s3878_s1 + $0x18] sm:$0xff]  ;;  %s3858_s27 = smov 16  }
 0x2fd   : > { %v3216_v21 = vpack.c.bf16 %v1552_v20, %v1551_v19 }
 0x2fe   : > { %3214 = vmatpush3.bf16.msra.mxu0 %v3213_v14 }
 0x2ff   : > { %3215 = vmatprep.subr.bf16.mxu0 %v3325_v3 }
 0x302   : > { %3217 = vmatpush3.bf16.msra.mxu0 %v3216_v21 }
 0x303   : > { %3224 = vmatprep.subr.bf16.mxu0 %v3325_v3 }
 0x314   : > { %1287 = vadd.xlane.f32.xlu0 %v1286_v56 }
 0x32a   : > { %1456 = vrot.lane.b32.xlu0 %v3510_v11, %s3338_s28  ;;  %s3857_s28 = smov 24  }
 0x36c   : > { %v958_v58 = vpop.xlane.xlu0 %957 }
 0x36d   : > { %3287 = vrcp.f32 %v958_v58 }
 0x370   : > { %v962_v59 = vpop.permute.xlu0 %961  ;;  %v1123_v60 = vpop.xlane.xlu1 %1122 }
 0x371   : > { %3289 = vrcp.f32 %v1123_v60  ;;  %3058 = vmatpush3.msra.mxu1 %v962_v59  ;;  %v2940_v59 = vld [vmem:[%s3881_s7] ss:$0 sm:$0xff]  ;;  %s3884_s7 = sld [smem:[#allocation5_spill]] }
 0x372   : > { %3067 = vmatprep.subr.mxu1 %v3327_v6 }
 0x377   : > { %v3288_v61 = vpop.eup %3287  ;;  %s779_s3 = scalar_lea.vmem %s3884_s7, %s3494_s25 }
 0x378   : > { %v960_v62 = vmul.f32 %v3288_v61, %v3280_v45  ;;  %v1453_v63 = vpop.xlane.xlu1 %1452  ;;  %v1750_v45 = vld [vmem:[%s3839_s12 + $0x10] sm:$0xff]  ;;  %v2941_v61 = vld [vmem:[%s3836_s9] ss:$0 sm:$0xff] }
 0x379   : > { %v3228_v47 = vpack.c.bf16 %v1751_v46, %v1750_v45 }
 0x37a   : > { %3060 = vmatmul.mubr.msk.f32.vlgmr.msra.gmra.mrb[4].mxu1 %vm875_vm2, %v960_v62 }
 0x37b   : > { %v3290_v0 = vpop.eup %3289  ;;  %3068 = vmatpush3.msra.mxu1 %v1127_v57  ;;  %3069 = vmatprep.mubr.msk.f32.mxu1 %vm3326_vm0, %v3327_v6 }
 0x37c   : > { %v1125_v1 = vmul.f32 %v3290_v0, %v3282_v48  ;;  %v1292_v2 = vpop.permute.xlu1 %1291  ;;  %3077 = vmatprep.subr.mxu1 %v3327_v6  ;;  %v785_v48 = vld [vmem:[%s771_s8] sm:$0xff]  ;;  %s3883_s8 = smov 104  }
 0x37d   : > { %v2944_v0 = vld [vmem:[%s3840_s13] ss:$0 sm:$0xff] }
 0x37e   : > { %3070 = vmatmul.mubr.msk.f32.vlgmr.msra.gmra.mrb[6].mxu1 %vm875_vm2, %v1125_v1 }
 0x37f   : > { %3078 = vmatpush3.msra.mxu1 %v1292_v2  ;;  %3079 = vmatprep.mubr.msk.f32.mxu1 %vm3326_vm0, %v3327_v6 }
 0x380   : > { %3087 = vmatprep.subr.mxu1 %v3327_v6 }
 0x3a1   : > { %v1288_v4 = vpop.xlane.xlu0 %1287 }
 0x3a2   : > { %3291 = vrcp.f32 %v1288_v4 }
 0x3a3   : > { %3293 = vrcp.f32 %v1453_v63 }
 0x3a5   : > { %v1457_v10 = vpop.permute.xlu0 %1456 }
 0x3ac   : > { %v3292_v5 = vpop.eup %3291 }
 0x3ad   : > { %v1290_v7 = vmul.f32 %v3292_v5, %v3286_v55  ;;  %v3294_v9 = vpop.eup %3293 }
 0x3ae   : > { %v1455_v11 = vmul.f32 %v3294_v9, %v3284_v50  ;;  %v1665_v50 = vld [vmem:[%s3837_s10 + $0x8] sm:$0xff] }
 0x3af   : > { %3080 = vmatmul.mubr.msk.f32.vlgmr.msra.gmra.mrb[8].mxu1 %vm875_vm2, %v1290_v7  ;;  %v3219_v51 = vpack.c.bf16 %v1665_v50, %v1664_v49  ;;  %v2942_v7 = vld [vmem:[%s3838_s11] ss:$0 sm:$0xff] }
 0x3b0   : > { %3088 = vmatpush3.msra.mxu1 %v1457_v10  ;;  %3089 = vmatprep.mubr.msk.f32.mxu1 %vm3326_vm0, %v3327_v6 }
 0x3b1   : > { %3218 = vmatprep.subr.bf16.mxu1 %v3325_v3 }
 0x3b3   : > { %3090 = vmatmul.mubr.msk.f32.vlgmr.msra.gmra.mrb[10].mxu1 %vm875_vm2, %v1455_v11 }
 0x3b4   : > { %3111 = vmatprep.mubr.msk.f32.mxu1 %vm3326_vm0, %v3327_v6  ;;  %3220 = vmatpush3.bf16.msra.mxu1 %v3219_v51 }
 0x3b5   : > { %3221 = vmatprep.subr.bf16.mxu1 %v3325_v3 }
 0x3b8   : > { %3223 = vmatpush3.bf16.msra.mxu1 %v3222_v54 }
 0x3b9   : > { %3125 = vmatprep.subr.mxu1 %v3327_v6 }
 0x44d   : > { %v1033_v15 = vpop.f32.mrb[4].mxu1 }
 0x44e   : > { %v3061_v16 = vpop.f32.mrb[5].mxu1 }
 0x451   : > { %v1198_v17 = vpop.f32.mrb[6].mxu1 }
 0x452   : > { %1533 = vrot.lane.b32.xlu1 %v1198_v17, %s3859_s30  ;;  %v3071_v18 = vpop.f32.mrb[7].mxu1  ;;  %s3882_s30 = smov 112   ;;  %v1832_v17 = vld [vmem:[%s779_s3] sm:$0xff] }
 0x482   : > { %v1363_v22 = vpop.f32.mrb[8].mxu1 }
 0x483   : > { %1537 = vrot.lane.b32.xlu0 %v1363_v22, %s3858_s27  ;;  %v3081_v23 = vpop.f32.mrb[9].mxu1  ;;  %s3885_s27 = smov 96  }
 0x486   : > { %v1528_v24 = vpop.f32.mrb[10].mxu1 }
 0x487   : > { %1541 = vrot.lane.b32.xlu1 %v1528_v24, %s3857_s28  ;;  %v3091_v25 = vpop.f32.mrb[11].mxu1 }
 0x4c4   : > { %v1534_v26 = vpop.permute.xlu1 %1533 }
 0x4c5   : > { %v1544_v28 = vsel %vm875_vm2, %v1033_v15, %v1534_v26 }
 0x4f5   : > { %v1538_v27 = vpop.permute.xlu0 %1537 }
 0x4f6   : > { %v1546_v29 = vsel %vm1545_vm3, %v1544_v28, %v1538_v27 }
 0x4f9   : > { %v1542_v30 = vpop.permute.xlu1 %1541 }
 0x4fa   : > { %v1548_v31 = vsel %vm1547_vm4, %v1546_v29, %v1542_v30 }
 0x4fb   : > { %3101 = vmatmul.mubr.msk.f32.vlgmr.msra.gmra.mrb[6].mxu0 %vm797_vm1, %v1548_v31 }
 0x4fc   : > { %3122 = vmatprep.mubr.msk.f32.mxu0 %vm3326_vm0, %v3327_v6 }
 0x5ce   : > { %v1629_v33 = vpop.f32.mrb[6].mxu0 }
 0x5cf   : > { %v1630_v34 = vadd.f32 %v2938_v32, %v1629_v33  ;;  %v3102_v35 = vpop.f32.mrb[7].mxu0 }
 0x5d1   : > { %v1633_v36 = vadd.f32 %v1630_v34, %v3500_v8  ;;  %v3225_v8 = vpack.c.bf16 %v1749_v44, %v1748_v43 }
 0x5d3   : > { %v1636_v37 = vsel %vm797_vm1, %v1633_v36, 0.0  ;;  %3226 = vmatpush3.bf16.msra.mxu0 %v3225_v8 }
 0x5d4   : > { %1637 = vadd.xlane.f32.xlu0 %v1636_v37  ;;  %3227 = vmatprep.subr.bf16.mxu0 %v3325_v3 }
 0x5d7   : > { %3229 = vmatpush3.bf16.msra.mxu0 %v3228_v47 }
 0x5d8   : > { %3135 = vmatprep.subr.mxu0 %v3327_v6 }
 0x5da   : > { %3123 = vmatmul.mubr.msk.f32.vlgmr.msra.gmra.mrb[8].mxu0 %vm797_vm1, %v785_v48 }
 0x5db   : > { %3137 = vmatprep.mubr.msk.f32.mxu0 %vm3326_vm0, %v3327_v6 }
 0x661   : > { %v1638_v38 = vpop.xlane.xlu0 %1637 }
 0x662   : > { %v1640_v39 = vmul.f32 0.03125, %v1638_v38 }
 0x664   : > { %v1641_v40 = vsub.f32 %v1633_v36, %v1640_v39 }
 0x666   : > { %v1642_v41 = vmul.f32 %v1641_v40, %v1641_v40 }
 0x668   : > { %v1643_v42 = vsel %vm797_vm1, %v1642_v41, 0.0 }
 0x669   : > { %1644 = vadd.xlane.f32.xlu1 %v1643_v42 }
 0x6ad   : > { %v1828_v1 = vpop.f32.mrb[8].mxu0 }
 0x6ae   : > { %v3658_v2 = vadd.f32 %v2944_v0, %v1828_v1  ;;  %v3124_v4 = vpop.f32.mrb[9].mxu0 }
 0x6b0   : > { %1998 = vrot.lane.b32.xlu0 %v3658_v2, %s3328_s29 }
 0x6b4   : > { %2163 = vrot.lane.b32.xlu0 %v3658_v2, %s3882_s30 }
 0x6b8   : > { %2328 = vrot.lane.b32.xlu0 %v3658_v2, %s3883_s8 }
 0x6f6   : > { %v1645_v55 = vpop.xlane.xlu1 %1644 }
 0x6f7   : > { %v1646_v56 = vmul.f32 0.03125, %v1645_v55 }
 0x6f9   : > { %v1647_v57 = vadd.f32 1e-05, %v1646_v56 }
 0x6fb   : > { %3295 = vrsqrt.f32 %v1647_v57 }
 0x705   : > { %v3296_v58 = vpop.eup %3295 }
 0x706   : > { %v1649_v60 = vmul.f32 %v3296_v58, %v1641_v40 }
 0x708   : > { %v1656_v62 = vmul.f32 %v2940_v59, %v1649_v60 }
 0x70a   : > { %v3649_v63 = vadd.f32 %v2941_v61, %v1656_v62 }
 0x70c   : > { %3112 = vmatmul.mubr.msk.f32.vlgmr.msra.gmra.mrb[12].mxu1 %vm797_vm1, %v3649_v63 }
 0x70d   : > { %3127 = vmatprep.mubr.msk.f32.mxu1 %vm3326_vm0, %v3327_v6  ;;  %3126 = vmatpush3.xpose.msk.msra.mxu1 %vm875_vm2, %v3658_v2 }
 0x70e   : > { %3130 = vmatprep.subr.mxu1 %v3327_v6 }
 0x722   : > { %v1999_v5 = vpop.permute.xlu0 %1998 }
 0x723   : > { %3136 = vmatpush3.xpose.msk.msra.mxu0 %vm875_vm2, %v1999_v5 }
 0x724   : > { %3145 = vmatprep.subr.mxu0 %v3327_v6 }
 0x726   : > { %v2164_v12 = vpop.permute.xlu0 %2163 }
 0x72a   : > { %v2329_v15 = vpop.permute.xlu0 %2328 }
 0x7df   : > { %v1744_v9 = vpop.f32.mrb[12].mxu1 }
 0x7e0   : > { %v1745_v10 = vadd.f32 %v2942_v7, %v1744_v9  ;;  %v3113_v11 = vpop.f32.mrb[13].mxu1 }
 0x7e1   : > { %v2506_v11 = vld [vmem:[%s3841_s14] sm:$0xff] }
 0x7e2   : > { %1996 = vrot.lane.b32.xlu1 %v1745_v10, %s3328_s29  ;;  %3128 = vmatmul.mubr.msk.f32.vlgmr.msra.gmra.mrb[14].mxu1 %vm875_vm2, %v1745_v10 }
 0x7e3   : > { %3132 = vmatprep.mubr.msk.f32.mxu1 %vm3326_vm0, %v3327_v6 }
 0x7e6   : > { %2161 = vrot.lane.b32.xlu1 %v1745_v10, %s3882_s30  ;;  %s3888_s30 = smov 88  }
 0x7ea   : > { %2326 = vrot.lane.b32.xlu1 %v1745_v10, %s3883_s8 }
 0x854   : > { %v1997_v13 = vpop.permute.xlu1 %1996 }
 0x855   : > { %3138 = vmatmul.mubr.msk.f32.vlgmr.msra.gmra.mrb[10].mxu0 %vm875_vm2, %v1997_v13 }
 0x856   : > { %3146 = vmatpush3.xpose.msk.msra.mxu0 %vm875_vm2, %v2164_v12  ;;  %3147 = vmatprep.mubr.msk.f32.mxu0 %vm3326_vm0, %v3327_v6  ;;  %v2507_v12 = vld [vmem:[%s3841_s14 + $0x8] sm:$0xff] }
 0x857   : > { %3155 = vmatprep.subr.mxu0 %v3327_v6  ;;  %v3231_v13 = vpack.c.bf16 %v2507_v12, %v2506_v11 }
 0x858   : > { %v2162_v14 = vpop.permute.xlu1 %2161 }
 0x859   : > { %3148 = vmatmul.mubr.msk.f32.vlgmr.msra.gmra.mrb[12].mxu0 %vm875_vm2, %v2162_v14  ;;  %v2508_v14 = vld [vmem:[%s3841_s14 + $0x10] sm:$0xff] }
 0x85a   : > { %3156 = vmatpush3.xpose.msk.msra.mxu0 %vm875_vm2, %v2329_v15  ;;  %3157 = vmatprep.mubr.msk.f32.mxu0 %vm3326_vm0, %v3327_v6  ;;  %v2509_v15 = vld [vmem:[%s3841_s14 + $0x18] sm:$0xff] }
 0x85b   : > { %3230 = vmatprep.subr.bf16.mxu0 %v3325_v3 }
 0x85c   : > { %v2327_v16 = vpop.permute.xlu1 %2326 }
 0x85d   : > { %3158 = vmatmul.mubr.msk.f32.vlgmr.msra.gmra.mrb[14].mxu0 %vm875_vm2, %v2327_v16  ;;  %v3234_v16 = vpack.c.bf16 %v2509_v15, %v2508_v14 }
 0x85e   : > { %3173 = vmatprep.mubr.msk.f32.mxu0 %vm3326_vm0, %v3327_v6  ;;  %3232 = vmatpush3.bf16.msra.mxu0 %v3231_v13 }
 0x85f   : > { %3233 = vmatprep.subr.bf16.mxu0 %v3325_v3 }
 0x862   : > { %3235 = vmatpush3.bf16.msra.mxu0 %v3234_v16 }
 0x863   : > { %3242 = vmatprep.subr.bf16.mxu0 %v3325_v3 }
 0x8b5   : > { %v1905_v18 = vpop.f32.mrb[14].mxu1 }
 0x8b6   : > { %v1906_v19 = vadd.f32 %v1905_v18, %v1832_v17  ;;  %v3129_v20 = vpop.f32.mrb[15].mxu1 }
 0x8b8   : > { %v1909_v21 = vsel %vm875_vm2, %v1906_v19, -inf }
 0x8b9   : > { %1910 = vmax.xlane.f32.xlu0 %v1909_v21 }
 0x928   : > { %v2070_v22 = vpop.f32.mrb[10].mxu0 }
 0x929   : > { %v2071_v23 = vadd.f32 %v2070_v22, %v1832_v17  ;;  %v3139_v24 = vpop.f32.mrb[11].mxu0 }
 0x92b   : > { %v2074_v25 = vsel %vm875_vm2, %v2071_v23, -inf }
 0x92c   : > { %2075 = vmax.xlane.f32.xlu1 %v2074_v25  ;;  %v2235_v26 = vpop.f32.mrb[12].mxu0 }
 0x92d   : > { %v2236_v27 = vadd.f32 %v2235_v26, %v1832_v17  ;;  %v3149_v28 = vpop.f32.mrb[13].mxu0 }
 0x92f   : > { %v2239_v29 = vsel %vm875_vm2, %v2236_v27, -inf }
 0x930   : > { %v2400_v30 = vpop.f32.mrb[14].mxu0  ;;  %2240 = vmax.xlane.f32.xlu0 %v2239_v29  ;;  %v2958_v29 = vld [vmem:[%s3842_s15] ss:$0 sm:$0xff] }
 0x931   : > { %v2401_v31 = vadd.f32 %v2400_v30, %v1832_v17  ;;  %v3159_v32 = vpop.f32.mrb[15].mxu0 }
 0x933   : > { %v2404_v33 = vsel %vm875_vm2, %v2401_v31, -inf }
 0x934   : > { %2405 = vmax.xlane.f32.xlu0 %v2404_v33 }
 0x93d   : > { %1920 = vrot.lane.b32.xlu1 %v3658_v2, %s3885_s27  ;;  %s783_s27 = scalar_lea.vmem %s3851_s24, %s3494_s25 }
 0x946   : > { %v1911_v34 = vpop.xlane.xlu0 %1910 }
 0x947   : > { %v1912_v35 = vsub.f32 %v1906_v19, %v1911_v34 }
 0x949   : > { %v1913_v36 = vmul.f32 1.442695, %v1912_v35 }
 0x94b   : > { %3297 = vpow2.f32 %v1913_v36 }
 0x955   : > { %v3298_v37 = vpop.eup %3297 }
 0x956   : > { %v1915_v38 = vsel %vm875_vm2, %v3298_v37, 0.0 }
 0x961   : > { %1916 = vadd.xlane.f32.xlu1 %v1915_v38 }
 0x9b9   : > { %v2076_v39 = vpop.xlane.xlu1 %2075 }
 0x9ba   : > { %v2077_v40 = vsub.f32 %v2071_v23, %v2076_v39 }
 0x9bc   : > { %v2078_v41 = vmul.f32 1.442695, %v2077_v40  ;;  %v2621_v40 = vld [vmem:[%s3845_s18 + $0x8] sm:$0xff] }
 0x9bd   : > { %v1921_v42 = vpop.permute.xlu1 %1920  ;;  %v2241_v43 = vpop.xlane.xlu0 %2240 }
 0x9be   : > { %3299 = vpow2.f32 %v2078_v41  ;;  %v2242_v44 = vsub.f32 %v2236_v27, %v2241_v43  ;;  %3131 = vmatpush3.msra.mxu1 %v1921_v42  ;;  %v2623_v42 = vld [vmem:[%s3845_s18 + $0x18] sm:$0xff] }
 0x9bf   : > { %3140 = vmatprep.subr.mxu1 %v3327_v6 }
 0x9c0   : > { %v2243_v8 = vmul.f32 1.442695, %v2242_v44  ;;  %v2705_v44 = vld [vmem:[%s3847_s20] sm:$0xff] }
 0x9c1   : > { %v2406_v45 = vpop.xlane.xlu0 %2405 }
 0x9c2   : > { %3301 = vpow2.f32 %v2243_v8  ;;  %v2407_v46 = vsub.f32 %v2401_v31, %v2406_v45  ;;  %v2706_v8 = vld [vmem:[%s3847_s20 + $0x8] sm:$0xff]  ;;  %v2707_v45 = vld [vmem:[%s3847_s20 + $0x10] sm:$0xff] }
 0x9c4   : > { %v2408_v47 = vmul.f32 1.442695, %v2407_v46  ;;  %v3243_v46 = vpack.c.bf16 %v2706_v8, %v2705_v44 }
 0x9c6   : > { %3303 = vpow2.f32 %v2408_v47  ;;  %v2708_v47 = vld [vmem:[%s3847_s20 + $0x18] sm:$0xff] }
 0x9c8   : > { %v3300_v48 = vpop.eup %3299 }
 0x9c9   : > { %v2080_v49 = vsel %vm875_vm2, %v3300_v48, 0.0 }
 0x9ca   : > { %2081 = vadd.xlane.f32.xlu0 %v2080_v49  ;;  %v2709_v49 = vld [vmem:[%s3847_s20 + $0x20] sm:$0xff] }
 0x9cc   : > { %v3302_v50 = vpop.eup %3301 }
 0x9cd   : > { %v2245_v51 = vsel %vm875_vm2, %v3302_v50, 0.0 }
 0x9ce   : > { %2246 = vadd.xlane.f32.xlu1 %v2245_v51 }
 0x9d0   : > { %v3304_v52 = vpop.eup %3303 }
 0x9d1   : > { %v2410_v53 = vsel %vm875_vm2, %v3304_v52, 0.0 }
 0x9d2   : > { %2411 = vadd.xlane.f32.xlu0 %v2410_v53 }
 0x9df   : > { %2250 = vrot.lane.b32.xlu1 %v3658_v2, %s3886_s26  ;;  %s3889_s26 = smov 8  }
 0x9e3   : > { %2415 = vrot.lane.b32.xlu1 %v3658_v2, %s3887_s0  ;;  %s3890_s0 = smov 16  }
 0x9e8   : > { %2085 = vrot.lane.b32.xlu0 %v3658_v2, %s3888_s30  ;;  %s3891_s30 = smov 24  }
 0x9ee   : > { %v1917_v54 = vpop.xlane.xlu1 %1916 }
 0x9ef   : > { %3305 = vrcp.f32 %v1917_v54 }
 0x9f9   : > { %v3306_v55 = vpop.eup %3305 }
 0x9fa   : > { %v1919_v56 = vmul.f32 %v3306_v55, %v3298_v37 }
 0x9fc   : > { %3133 = vmatmul.mubr.msk.f32.vlgmr.msra.gmra.mrb[16].mxu1 %vm875_vm2, %v1919_v56  ;;  %v2960_v56 = vld [vmem:[%s3843_s16] ss:$0 sm:$0xff] }
 0x9fd   : > { %3142 = vmatprep.mubr.msk.f32.mxu1 %vm3326_vm0, %v3327_v6 }
 0xa57   : > { %v2082_v57 = vpop.xlane.xlu0 %2081 }
 0xa58   : > { %3307 = vrcp.f32 %v2082_v57 }
 0xa5b   : > { %v2247_v58 = vpop.xlane.xlu1 %2246 }
 0xa5c   : > { %3309 = vrcp.f32 %v2247_v58  ;;  %v2961_v58 = vld [vmem:[%s3844_s17] ss:$0 sm:$0xff] }
 0xa5f   : > { %v2412_v59 = vpop.xlane.xlu0 %2411  ;;  %v2251_v62 = vpop.permute.xlu1 %2250 }
 0xa60   : > { %3311 = vrcp.f32 %v2412_v59 }
 0xa62   : > { %v3308_v60 = vpop.eup %3307 }
 0xa63   : > { %v2084_v61 = vmul.f32 %v3308_v60, %v3300_v48  ;;  %v2086_v0 = vpop.permute.xlu0 %2085  ;;  %v2416_v4 = vpop.permute.xlu1 %2415  ;;  %v3246_v48 = vpack.c.bf16 %v2708_v47, %v2707_v45 }
 0xa64   : > { %3141 = vmatpush3.msra.mxu1 %v2086_v0  ;;  %v2962_v0 = vld [vmem:[%s3846_s19] ss:$0 sm:$0xff] }
 0xa65   : > { %3143 = vmatmul.mubr.msk.f32.vlgmr.msra.gmra.mrb[18].mxu1 %vm875_vm2, %v2084_v61  ;;  %3150 = vmatprep.subr.mxu1 %v3327_v6  ;;  %v2712_v61 = vld [vmem:[%s3847_s20 + $0x38] sm:$0xff] }
 0xa66   : > { %v3310_v1 = vpop.eup %3309  ;;  %3151 = vmatpush3.msra.mxu1 %v2251_v62  ;;  %3152 = vmatprep.mubr.msk.f32.mxu1 %vm3326_vm0, %v3327_v6 }
 0xa67   : > { %v2249_v2 = vmul.f32 %v3310_v1, %v3302_v50  ;;  %3160 = vmatprep.subr.mxu1 %v3327_v6  ;;  %v2710_v50 = vld [vmem:[%s3847_s20 + $0x28] sm:$0xff] }
 0xa68   : > { %v3249_v51 = vpack.c.bf16 %v2710_v50, %v2709_v49 }
 0xa69   : > { %3153 = vmatmul.mubr.msk.f32.vlgmr.msra.gmra.mrb[20].mxu1 %vm875_vm2, %v2249_v2 }
 0xa6a   : > { %v3312_v5 = vpop.eup %3311  ;;  %3161 = vmatpush3.msra.mxu1 %v2416_v4  ;;  %3162 = vmatprep.mubr.msk.f32.mxu1 %vm3326_vm0, %v3327_v6 }
 0xa6b   : > { %v2414_v7 = vmul.f32 %v3312_v5, %v3304_v52  ;;  %3236 = vmatprep.subr.bf16.mxu1 %v3325_v3 }
 0xa6d   : > { %3163 = vmatmul.mubr.msk.f32.vlgmr.msra.gmra.mrb[22].mxu1 %vm875_vm2, %v2414_v7  ;;  %v2964_v7 = vld [vmem:[%s3848_s21] ss:$0 sm:$0xff] }
 0xa6e   : > { %3184 = vmatprep.mubr.msk.f32.mxu1 %vm3326_vm0, %v3327_v6 }
 0xacf   : > { %v1992_v9 = vpop.f32.mrb[16].mxu1 }
 0xad0   : > { %v3134_v10 = vpop.f32.mrb[17].mxu1 }
 0xb38   : > { %v2157_v17 = vpop.f32.mrb[18].mxu1 }
 0xb39   : > { %2492 = vrot.lane.b32.xlu0 %v2157_v17, %s3889_s26  ;;  %v3144_v18 = vpop.f32.mrb[19].mxu1 }
 0xb3c   : > { %v2322_v19 = vpop.f32.mrb[20].mxu1 }
 0xb3d   : > { %2496 = vrot.lane.b32.xlu1 %v2322_v19, %s3890_s0  ;;  %v3154_v20 = vpop.f32.mrb[21].mxu1 }
 0xb40   : > { %v2487_v21 = vpop.f32.mrb[22].mxu1 }
 0xb41   : > { %2500 = vrot.lane.b32.xlu0 %v2487_v21, %s3891_s30  ;;  %v3164_v22 = vpop.f32.mrb[23].mxu1 }
 0xbab   : > { %v2493_v23 = vpop.permute.xlu0 %2492 }
 0xbac   : > { %v2503_v25 = vsel %vm875_vm2, %v1992_v9, %v2493_v23  ;;  %v2966_v23 = vld [vmem:[%s3849_s22] ss:$0 sm:$0xff] }
 0xbaf   : > { %v2497_v24 = vpop.permute.xlu1 %2496 }
 0xbb0   : > { %v2504_v26 = vsel %vm1545_vm3, %v2503_v25, %v2497_v24  ;;  %v2967_v25 = vld [vmem:[%s3850_s23] ss:$0 sm:$0xff] }
 0xbb3   : > { %v2501_v27 = vpop.permute.xlu0 %2500 }
 0xbb4   : > { %v2505_v28 = vsel %vm1547_vm4, %v2504_v26, %v2501_v27 }
 0xbb5   : > { %3174 = vmatmul.mubr.msk.f32.vlgmr.msra.gmra.mrb[16].mxu0 %vm797_vm1, %v2505_v28 }
 0xbb6   : > { %3203 = vmatprep.mubr.msk.f32.mxu0 %vm3326_vm0, %v3327_v6  ;;  %v2620_v6 = vld [vmem:[%s3845_s18] sm:$0xff]  ;;  %3244 = vmatpush3.bf16.msra.mxu0 %v3243_v46 }
 0xbb7   : > { %v3237_v41 = vpack.c.bf16 %v2621_v40, %v2620_v6  ;;  %3245 = vmatprep.subr.bf16.mxu0 %v3325_v3 }
 0xbb9   : > { %3238 = vmatpush3.bf16.msra.mxu1 %v3237_v41 }
 0xbba   : > { %3239 = vmatprep.subr.bf16.mxu1 %v3325_v3  ;;  %3247 = vmatpush3.bf16.msra.mxu0 %v3246_v48 }
 0xbbb   : > { %3248 = vmatprep.subr.bf16.mxu0 %v3325_v3 }
 0xbbe   : > { %3250 = vmatpush3.bf16.msra.mxu0 %v3249_v51 }
 0xbbf   : > { %3251 = vmatprep.subr.bf16.mxu0 %v3325_v3  ;;  %v2711_v3 = vld [vmem:[%s3847_s20 + $0x30] sm:$0xff] }
 0xbc0   : > { %v3252_v62 = vpack.c.bf16 %v2712_v61, %v2711_v3 }
 0xbc2   : > { %3253 = vmatpush3.bf16.msra.mxu0 %v3252_v62 }
 0xc88   : > { %v2586_v30 = vpop.f32.mrb[16].mxu0 }
 0xc89   : > { %v2587_v31 = vadd.f32 %v2958_v29, %v2586_v30  ;;  %v3175_v32 = vpop.f32.mrb[17].mxu0 }
 0xc8b   : > { %v2590_v33 = vadd.f32 %v2587_v31, %v3649_v63  ;;  %v2622_v63 = vld [vmem:[%s3845_s18 + $0x10] sm:$0xff] }
 0xc8c   : > { %v3240_v43 = vpack.c.bf16 %v2623_v42, %v2622_v63 }
 0xc8d   : > { %v2593_v34 = vsel %vm797_vm1, %v2590_v33, 0.0 }
 0xc8e   : > { %2594 = vadd.xlane.f32.xlu1 %v2593_v34  ;;  %3241 = vmatpush3.bf16.msra.mxu1 %v3240_v43 }
 0xd1b   : > { %v2595_v35 = vpop.xlane.xlu1 %2594 }
 0xd1c   : > { %v2596_v36 = vmul.f32 0.03125, %v2595_v35 }
 0xd1e   : > { %v2597_v37 = vsub.f32 %v2590_v33, %v2596_v36 }
 0xd20   : > { %v2598_v38 = vmul.f32 %v2597_v37, %v2597_v37 }
 0xd22   : > { %v2599_v39 = vsel %vm797_vm1, %v2598_v38, 0.0 }
 0xd23   : > { %2600 = vadd.xlane.f32.xlu0 %v2599_v39 }
 0xdb0   : > { %v2601_v52 = vpop.xlane.xlu0 %2600 }
 0xdb1   : > { %v2602_v53 = vmul.f32 0.03125, %v2601_v52 }
 0xdb3   : > { %v2603_v54 = vadd.f32 1e-05, %v2602_v53 }
 0xdb5   : > { %3313 = vrsqrt.f32 %v2603_v54 }
 0xdbf   : > { %v3314_v55 = vpop.eup %3313 }
 0xdc0   : > { %v2605_v57 = vmul.f32 %v3314_v55, %v2597_v37 }
 0xdc2   : > { %v2612_v59 = vmul.f32 %v2960_v56, %v2605_v57 }
 0xdc4   : > { %v2619_v60 = vadd.f32 %v2961_v58, %v2612_v59 }
 0xdc6   : > { %3185 = vmatmul.mubr.msk.f32.vlgmr.msra.gmra.mrb[24].mxu1 %vm797_vm1, %v2619_v60 }
 0xe99   : > { %v2700_v1 = vpop.f32.mrb[24].mxu1 }
 0xe9a   : > { %v2701_v2 = vadd.f32 %v2962_v0, %v2700_v1  ;;  %v3186_v4 = vpop.f32.mrb[25].mxu1 }
 0xe9c   : > { %v2704_v5 = vmax.f32 %v2701_v2, 0.0 }
 0xe9e   : > { %3204 = vmatmul.mubr.msk.f32.vlgmr.msra.gmra.mrb[18].mxu0 %vm2720_vm5, %v2704_v5 }
 0xf71   : > { %v2790_v9 = vpop.f32.mrb[18].mxu0 }
 0xf72   : > { %v2791_v10 = vadd.f32 %v2964_v7, %v2790_v9  ;;  %v3205_v11 = vpop.f32.mrb[19].mxu0 }
 0xf74   : > { %v2794_v12 = vadd.f32 %v2791_v10, %v2619_v60 }
 0xf76   : > { %v2797_v13 = vsel %vm797_vm1, %v2794_v12, 0.0 }
 0xf77   : > { %2798 = vadd.xlane.f32.xlu0 %v2797_v13 }
0x1004   : > { %v2799_v14 = vpop.xlane.xlu0 %2798 }
0x1005   : > { %v2800_v15 = vmul.f32 0.03125, %v2799_v14 }
0x1007   : > { %v2801_v16 = vsub.f32 %v2794_v12, %v2800_v15 }
0x1009   : > { %v2802_v17 = vmul.f32 %v2801_v16, %v2801_v16 }
0x100b   : > { %v2803_v18 = vsel %vm797_vm1, %v2802_v17, 0.0 }
0x100c   : > { %2804 = vadd.xlane.f32.xlu1 %v2803_v18 }
0x1099   : > { %v2805_v19 = vpop.xlane.xlu1 %2804 }
0x109a   : > { %v2806_v20 = vmul.f32 0.03125, %v2805_v19 }
0x109c   : > { %v2807_v21 = vadd.f32 1e-05, %v2806_v20 }
0x109e   : > { %3315 = vrsqrt.f32 %v2807_v21 }
0x10a8   : > { %v3316_v22 = vpop.eup %3315 }
0x10a9   : > { %v2809_v24 = vmul.f32 %v3316_v22, %v2801_v16 }
0x10ab   : > { %v2816_v26 = vmul.f32 %v2966_v23, %v2809_v24 }
0x10ad   : > { %v2823_v27 = vadd.f32 %v2967_v25, %v2816_v26 }
0x10af   : > { %2824 = vst.msk [vmem:[%s783_s27] sm:$0xff] %vm797_vm1, %v2823_v27 }
0x10b0 PF: > { %s34_s5 = sadd.s32 1, %s3323_s5  }
0x10b1   : > { %p31_p4 = scmp.ge.s32.totalorder %s34_s5, 4  }
0x10b3   :  { %33 = sbr.rel (!%p31_p4) target bundleno = 10 (0xa), region = 155 }

// kernel: net_forward.11
= control target key start
LH: loop header
LB: loop body
LE: loop exit
PB: predicated region body
PF: predicated region fallthrough
CT: control target
= control target key end

     0   :  { %10 = vsyncpa [#allocation3], 0  ;;  %s712_s0 = inlined_call_operand.vmem [shape: f32[2,8,32], index: 0, kind: input, shape index: {}]   ;;  %s713_s1 = inlined_call_operand.vmem [shape: f32[1,32], index: 1, kind: input, shape index: {}]   ;;  %s714_s2 = inlined_call_operand.vmem [shape: f32[1,32], index: 2, kind: input, shape index: {}]   ;;  %s715_s3 = inlined_call_operand.vmem [shape: f32[32,128], index: 3, kind: input, shape index: {}]   ;;  %s716_s4 = inlined_call_operand.vmem [shape: f32[1,128], index: 4, kind: input, shape index: {}]   ;;  %s717_s5 = inlined_call_operand.hbm [shape: f32[2,8,128], index: 5, kind: output, shape index: {}]  }
   0x1   :  { %12 = vsyncpa [#allocation3 + $0x1], 0  ;;  %s588_s18 = smov 0   ;;  %s590_s19 = smov 0  }
   0x2   :  { %s592_s20 = smov 0   ;;  %s594_s21 = smov 0  }
   0x3 LB: > { %s609_s22 = sadd.s32 4294967295, %s552_s21   ;;  %s410_s23 = sadd.s32 4294967294, %s552_s21   ;;  %s552_s21 = sphi %s594_s21, %s723_s21   ;;  %s548_s20 = sphi %s592_s20, %s722_s20   ;;  %s544_s19 = sphi %s590_s19, %s721_s19   ;;  %s540_s18 = sphi %s588_s18, %s720_s18  }
   0x4   : > { %s613_s24 = sadd.s32 1, %s552_s21   ;;  %s135_s25 = sadd.s32 1, %s548_s20 }
   0x5   : > { %s132_s26 = ssub.s32 %s552_s21, %s613_s24  ;;  %p145_p0 = scmp.ne.s32.totalorder %s548_s20, %s544_s19 }
   0x6   : > { %p133_p1 = scmp.eq.s32.totalorder %s132_s26, 0  ;;  %p146_p2 = scmp.eq.s32.totalorder %s609_s22, 1 }
   0x7   : > { %p151_p3 = scmp.ne.s32.totalorder %s544_s19, %s540_s18  ;;  %p152_p4 = scmp.eq.s32.totalorder %s410_s23, 1 }
   0x8   : > { %s624_s27 = scalar_select %p133_p1, %s548_s20, %s135_s25  }
   0x9   : > { %p626_p5 = por %p146_p2, %p145_p0  ;;  %p630_p6 = por %p152_p4, %p151_p3 }
   0xa   : > { %p413_p7 = scmp.ge.s32.totalorder %s552_s21, 1  ;;  %p189_p8 = scmp.lt.s32.totalorder %s552_s21, 3 }
   0xc   : > { %p190_p9 = pnand %p413_p7, %p189_p8 }
   0xd   : > { %p216_p10 = scmp.lt.s32.totalorder (!%p190_p9), %s609_s22, 1  ;;  %vm223_vm0 = vcmask (!%p190_p9), 261120   ;;  %v252_v7 = vld [vmem:[%s715_s3] sm:$0xff] (!%p190_p9)  ;;  %v253_v8 = vld [vmem:[%s715_s3 + $0x8] sm:$0xff] (!%p190_p9)  ;;  %v254_v9 = vld [vmem:[%s715_s3 + $0x10] sm:$0xff] (!%p190_p9)  ;;  %v554_v10 = vmov (!%p190_p9), 0.0|0.0  }
   0xe   : > { %193 = sbr.rel (%p190_p9) target bundleno = 567 (0x237), region = 40  ;;  %440 = vmatprep.subr.bf16.mxu0 (!%p190_p9), %v554_v10  ;;  %v441_v11 = vpack.c.bf16 (!%p190_p9), %v253_v8, %v252_v7  ;;  %v255_v12 = vld [vmem:[%s715_s3 + $0x18] sm:$0xff] (!%p190_p9)  ;;  %vm555_vm1 = vmmov (!%p190_p9), 0   ;;  %v556_v13 = vmov (!%p190_p9), 0.0   ;;  %v416_v19 = vld [vmem:[%s713_s1] ss:$0 sm:$0xff] (!%p190_p9) }
   0xf   : > { %437 = vmatprep.mubr.msk.f32.mxu0 (!%p190_p9), %vm555_vm1, %v556_v13  ;;  %v444_v14 = vpack.c.bf16 (!%p190_p9), %v255_v12, %v254_v9  ;;  %v417_v21 = vld [vmem:[%s714_s2] ss:$0 sm:$0xff] (!%p190_p9)  ;;  %s421_s10 = sshll.u32 (!%p190_p9), %s609_s22, 7 }
  0x10   : > { %442 = vmatpush3.bf16.msra.mxu0 (!%p190_p9), %v441_v11  ;;  %v418_v24 = vld [vmem:[%s716_s4] ss:$0 sm:$0xff] (!%p190_p9)  ;;  %s670_s15 = scalar_lea.hbm (!%p190_p9), %s717_s5, %s421_s10 }
  0x11   : > { %443 = vmatprep.subr.bf16.mxu0 (!%p190_p9), %v554_v10 }
  0x14   : > { %445 = vmatpush3.bf16.msra.mxu0 (!%p190_p9), %v444_v14 }
  0x15   : > { %s217_s30 = scalar_select %p216_p10, %s609_s22, 1 }
  0x16   : > { %s557_s22 = smov [#allocation2]  }
  0x17   : > { %s415_s6 = sshll.u32 %s217_s30, 3  ;;  %s494_s23 = sshll.u32 %s557_s22, 4  ;;  %s495_s23 = int_to_ptr.vmem [resolvable:$false] %s494_s23 }
  0x18   : > { %s219_s9 = scalar_lea.vmem %s712_s0, %s415_s6  ;;  %s213_s6 = sand.u32 1, %s544_s19  }
  0x19   : > { %v220_v0 = vld [vmem:[%s219_s9] sm:$0xff]  ;;  %s414_s7 = sshll.u32 %s213_s6, 3  ;;  %s338_s16 = scalar_lea.sflag [#allocation3], %s213_s6 }
  0x1a   : > { %v224_v1 = vsel %vm223_vm0, %v220_v0, 0.0  ;;  %s215_s11 = scalar_lea.vmem [#allocation2], %s414_s7  ;;  %s496_s25 = scalar_lea.vmem %s495_s23, 256 }
  0x1b   : > { %225 = vadd.xlane.f32.xlu0 %v224_v1  ;;  %s351_s12 = sshll.u32 %s215_s11, 4  ;;  %s672_s12 = int_to_ptr.vmem [resolvable:$true] %s351_s12 }
  0x1c   : > { %s490_s17 = scalar_lea.vmem %s672_s12, 128  ;;  %p497_p0 = scmp.lt.s32.totalorder %s672_s12, %s495_s23 }
  0x1d   : > { %p491_p11 = scmp.ne.s32.totalorder %s672_s12, %s490_s17  ;;  %p498_p1 = scmp.lt.s32.totalorder %s496_s25, %s490_s17 }
  0x1f   : > { %p492_p12 = pnand %p491_p11, %p626_p5  ;;  %p499_p2 = por %p498_p1, %p497_p0 }
  0x21   : > { %p493_p13 = pneg %p492_p12 }
  0x23   : > { %p500_p3 = pnand %p499_p2, %p493_p13 }
  0xa8   : > { %v226_v2 = vpop.xlane.xlu0 %225 }
  0xa9   : > { %v228_v3 = vmul.f32 0.03125, %v226_v2 }
  0xab   : > { %v229_v4 = vsub.f32 %v220_v0, %v228_v3 }
  0xad   : > { %v230_v5 = vmul.f32 %v229_v4, %v229_v4 }
  0xaf   : > { %v231_v6 = vsel %vm223_vm0, %v230_v5, 0.0 }
  0xb0   : > { %232 = vadd.xlane.f32.xlu0 %v231_v6 }
 0x13d   : > { %v233_v15 = vpop.xlane.xlu0 %232 }
 0x13e   : > { %v234_v16 = vmul.f32 0.03125, %v233_v15 }
 0x140   : > { %v235_v17 = vadd.f32 1e-05, %v234_v16 }
 0x142   : > { %488 = vrsqrt.f32 %v235_v17 }
 0x14c   : > { %v489_v18 = vpop.eup %488 }
 0x14d   : > { %v237_v20 = vmul.f32 %v489_v18, %v229_v4 }
 0x14f   : > { %v244_v22 = vmul.f32 %v416_v19, %v237_v20 }
 0x151   : > { %v251_v23 = vadd.f32 %v417_v21, %v244_v22 }
 0x153   : > { %438 = vmatmul.mubr.msk.f32.vlgmr.msra.gmra.mrb[0].mxu0 %vm223_vm0, %v251_v23 }
 0x226   : > { %v332_v25 = vpop.f32.mrb[0].mxu0 }
 0x227   : > { %v333_v26 = vadd.f32 %v418_v24, %v332_v25  ;;  %v439_v27 = vpop.f32.mrb[1].mxu0 }
 0x229   : > { %336 = vst [vmem:[%s215_s11] sm:$0xff] %v333_v26 }
 0x22a   : > { %503 = shalt.err (!%p500_p3)
}
 0x22b   : > { %s504_s26 = scalar_lea.hbm %s670_s15, 128  ;;  %s508_s7 = scalar_lea.hbm %s717_s5, 256 }
 0x22c   : > { %p505_p4 = scmp.ne.s32.totalorder %s670_s15, %s504_s26  ;;  %p509_p9 = scmp.lt.u32.totalorder %s670_s15, %s717_s5 }
 0x22d   : > { %p510_p10 = scmp.lt.u32.totalorder %s508_s7, %s504_s26  ;;  %p512_p12 = scmp.lt.u32.totalorder %s504_s26, %s670_s15 }
 0x22e   : > { %p506_p7 = pnand %p505_p4, %p626_p5 }
 0x22f   : > { %p511_p11 = por %p510_p10, %p509_p9 }
 0x230   : > { %p507_p8 = pneg %p506_p7 }
 0x231   : > { %p513_p13 = por %p512_p12, %p511_p11 }
 0x233   : > { %p514_p0 = pnand %p513_p13, %p507_p8 }
 0x235   : > { %517 = shalt.err (!%p514_p0)
}
 0x236   : > { %446 = dma.vmem_to_hbm [thread:$0]  (%p626_p5), %s672_s12, 128, %s670_s15, %s338_s16  }
 0x237 PF: > { %p452_p1 = scmp.ge.s32.totalorder %s552_s21, 2  ;;  %s363_s10 = sand.u32 1, %s540_s18  }
 0x238   : > { %s364_s11 = scalar_lea.sflag [#allocation3], %s363_s10 }
 0x239   : > { %p449_p2 = pnand %p452_p1, %p630_p6 }
 0x23b   : > { %535 = dma.done.wait (!%p449_p2), %s364_s11, 128  }
 0x23c   : > { %537 = vsyncadd (!%p449_p2), %s364_s11, 4294967168  ;;  %p15_p3 = scmp.ge.s32.totalorder %s613_s24, 4   ;;  %s720_s18 = smov %s544_s19 }
 0x23d   : > { %s721_s19 = smov %s548_s20  ;;  %s722_s20 = smov %s624_s27 }
 0x23e   : > { %s723_s21 = smov %s613_s24  ;;  %17 = sbr.rel (!%p15_p3) target bundleno = 3 (0x3), region = 75 }
 0x245   :  { %369 = vsyncpa [#allocation3], 1 }
 0x246   :  { %371 = vsyncpa [#allocation3 + $0x1], 1 }

// kernel: net_forward.10
= control target key start
LH: loop header
LB: loop body
LE: loop exit
PB: predicated region body
PF: predicated region fallthrough
CT: control target
= control target key end

     0   :  { %s3934_s0 = inlined_call_operand.vmem [shape: f32[2,8,32], index: 0, kind: input, shape index: {}]   ;;  %s3935_s1 = inlined_call_operand.vmem [shape: f32[2,8,32], index: 1, kind: input, shape index: {}]   ;;  %s3936_s2 = inlined_call_operand.vmem [shape: f32[2,8,8], index: 2, kind: input, shape index: {}]   ;;  %s3937_s3 = inlined_call_operand.vmem [shape: f32[2,8,8], index: 3, kind: input, shape index: {}]   ;;  %s3938_s4 = inlined_call_operand.vmem [shape: f32[32,96], index: 4, kind: input, shape index: {}]   ;;  %s3939_s5 = inlined_call_operand.vmem [shape: f32[1,96], index: 5, kind: input, shape index: {}]   ;;  %s3940_s6 = inlined_call_operand.vmem [shape: f32[32,32], index: 6, kind: input, shape index: {}]   ;;  %s3941_s7 = inlined_call_operand.vmem [shape: f32[1,32], index: 7, kind: input, shape index: {}]   ;;  %s3942_s8 = inlined_call_operand.vmem [shape: f32[1,32], index: 8, kind: input, shape index: {}]   ;;  %s3943_s9 = inlined_call_operand.vmem [shape: f32[1,32], index: 9, kind: input, shape index: {}]   ;;  %s3944_s10 = inlined_call_operand.vmem [shape: f32[32,32], index: 10, kind: input, shape index: {}]   ;;  %s3945_s11 = inlined_call_operand.vmem [shape: f32[1,32], index: 11, kind: input, shape index: {}]   ;;  %s3946_s12 = inlined_call_operand.vmem [shape: f32[32,64], index: 12, kind: input, shape index: {}]   ;;  %s3947_s13 = inlined_call_operand.vmem [shape: f32[1,64], index: 13, kind: input, shape index: {}]   ;;  %s3948_s14 = inlined_call_operand.vmem [shape: f32[32,32], index: 14, kind: input, shape index: {}]   ;;  %s3949_s15 = inlined_call_operand.vmem [shape: f32[1,32], index: 15, kind: input, shape index: {}]   ;;  %s3950_s16 = inlined_call_operand.vmem [shape: f32[1,32], index: 16, kind: input, shape index: {}]   ;;  %s3951_s17 = inlined_call_operand.vmem [shape: f32[1,32], index: 17, kind: input, shape index: {}]   ;;  %s3952_s18 = inlined_call_operand.vmem [shape: f32[32,64], index: 18, kind: input, shape index: {}]   ;;  %s3953_s19 = inlined_call_operand.vmem [shape: f32[1,64], index: 19, kind: input, shape index: {}]   ;;  %s3954_s20 = inlined_call_operand.vmem [shape: f32[64,32], index: 20, kind: input, shape index: {}]   ;;  %s3955_s21 = inlined_call_operand.vmem [shape: f32[1,32], index: 21, kind: input, shape index: {}]   ;;  %s3956_s22 = inlined_call_operand.vmem [shape: f32[1,32], index: 22, kind: input, shape index: {}]   ;;  %s3957_s23 = inlined_call_operand.hbm [shape: f32[1,32], index: 23, kind: input, shape index: {}]   ;;  %s3958_s24 = inlined_call_operand.vmem [shape: f32[2,8,32], index: 24, kind: output, shape index: {}]  }
   0x1   :  { %3974 = sst [smem:[#allocation5_spill]] %s3934_s0 }
   0x2   :  { %3975 = sst [smem:[#allocation6_spill]] %s3935_s1 }
   0x3   :  { %3976 = sst [smem:[#allocation7_spill]] %s3936_s2 }
   0x4   :  { %3977 = sst [smem:[#allocation8_spill]] %s3937_s3 }
   0x5   :  { %3978 = sst [smem:[#allocation9_spill]] %s3938_s4 }
   0x6   :  { %3979 = sst [smem:[#allocation10_spill]] %s3939_s5 }
   0x7   :  { %3980 = sst [smem:[#allocation11_spill]] %s3940_s6 }
   0x8   :  { %3981 = sst [smem:[#allocation12_spill]] %s3941_s7 }
   0x9   :  { %3982 = sst [smem:[#allocation13_spill]] %s3942_s8 }
   0xa   :  { %29 = vsyncpa [#allocation3], 0  ;;  %s3538_s5 = smov 0  }
   0xb LB: > { %s3544_s26 = sadd.s32 4294967295, %s3393_s5   ;;  %p2941_p0 = scmp.ge.s32.totalorder %s3393_s5, 1  ;;  %s3393_s5 = sphi %s3538_s5, %s35_s5  }
   0xc   : > { %p590_p1 = scmp.lt.s32.totalorder %s3393_s5, 3  ;;  %p3961_p3 = scmp.eq.s32.totalorder %s3544_s26, 0 }
   0xd   : > { %s3395_s28 = smov [#allocation2]   ;;  %s3355_s7 = scalar_lea.hbm %s3957_s23, 16 }
   0xe   : > { %p3548_p2 = pnand %p2941_p0, %p590_p1  ;;  %s660_s6 = sshll.u32 %s3395_s28, 4  ;;  %s661_s6 = int_to_ptr.vmem [resolvable:$true] %s660_s6 }
   0xf   : > { %p3356_p6 = scmp.ne.s32.totalorder %s3957_s23, %s3355_s7  ;;  %p3362_p10 = scmp.lt.u32.totalorder %s3355_s7, %s3957_s23 }
  0x10   : > { %s3983_s27 = scalar_select %p3548_p2, 1, 0 }
  0x11   : > { %p3285_p4 = pneg %p3548_p2 }
  0x13   : > { %p3557_p5 = pnand %p3961_p3, %p3285_p4 }
  0x15   : > { %p3357_p7 = pneg %p3557_p5 }
  0x17   : > { %p3358_p8 = pnand %p3357_p7, %p3356_p6 }
  0x19   : > { %p3359_p9 = pneg %p3358_p8 }
  0x1b   : > { %p3364_p11 = pnand %p3362_p10, %p3359_p9 }
  0x1d   : > { %3367 = shalt.err (!%p3364_p11)
}
  0x1e   : > { %s3368_s4 = scalar_lea.vmem %s661_s6, 16  ;;  %s3375_s1 = scalar_lea.vmem %s661_s6, 32 }
  0x1f   : > { %p3369_p12 = scmp.ne.s32.totalorder %s661_s6, %s3368_s4  ;;  %p3376_p1 = scmp.lt.s32.totalorder %s661_s6, %s661_s6 }
  0x20   : > { %p3377_p4 = scmp.lt.s32.totalorder %s3375_s1, %s3368_s4 }
  0x21   : > { %p3371_p13 = pnand %p3369_p12, %p3357_p7 }
  0x22   : > { %p3378_p3 = por %p3377_p4, %p3376_p1 }
  0x23   : > { %p3372_p0 = pneg %p3371_p13 }
  0x25   : > { %p3379_p2 = pnand %p3378_p3, %p3372_p0 }
  0x27   : > { %3382 = shalt.err (!%p3379_p2)
}
  0x28   : > { %3288 = dma.hbm_to_vmem [thread:$0]  (!%p3557_p5), %s3957_s23, 16, %s661_s6, [#allocation3]  }
  0x29   : > { %p3985_p6 = scmp.ne.s32.totalorder %s3983_s27, 0 }
  0x2a   : > { %p3986_p8 = scmp.eq.s32.totalorder (!%p3985_p6), %s3544_s26, 0 }
  0x2b   : > { %701 = sbr.rel (%p3985_p6) target bundleno = 4309 (0x10d5), region = 116 }
  0x32   : > { %3388 = dma.done.wait (%p3986_p8), [#allocation3], 16   ;;  %p3987_p7 = pmov %p3986_p8 }
  0x33   : > { %p777_p9 = scmp.lt.s32.totalorder %s3544_s26, 1  ;;  %v3396_v0 = vmov 0.0|0.0   ;;  %vm3397_vm0 = vmmov 0   ;;  %v3398_v1 = vmov 0.0   ;;  %s3988_s2 = sld [smem:[#allocation9_spill]]  ;;  %vm810_vm1 = vcmask 261120  }
  0x34   : > { %3390 = vsyncadd (%p3987_p7), [#allocation3], 4294967280  ;;  %3233 = vmatprep.subr.bf16.mxu1 %v3396_v0  ;;  %3076 = vmatprep.mubr.msk.f32.mxu1 %vm3397_vm0, %v3398_v1  ;;  %s3989_s29 = sld [smem:[#allocation5_spill]]  ;;  %s3990_s0 = sld [smem:[#allocation10_spill]]  ;;  %vm888_vm2 = vcmask 64512   ;;  %vm1558_vm3 = vcmask 130048  }
  0x35   : > { %3089 = vmatprep.subr.mxu0 %v3398_v1  ;;  %3091 = vmatprep.mubr.msk.f32.mxu0 %vm3397_vm0, %v3398_v1  ;;  %s4007_s26 = smov (!%p777_p9, %s3544_s26), 1  ;;  %s3399_s7 = smov 120   ;;  %vm1560_vm4 = vcmask 195584   ;;  %vm2733_vm5 = vcmask 523264  }
  0x36   : > { %s3603_s4 = sshll.u32 %s4007_s26, 3  ;;  %s3969_s30 = smov 96  }
  0x37   : > { %s3965_s3 = smov 80   ;;  %s3963_s25 = smov 88  }
  0x38   : > { %s3964_s8 = smov 72   ;;  %s3972_s1 = smov 112  }
  0x39   : > { %v799_v2 = vld [vmem:[%s3988_s2] sm:$0xff]  ;;  %v800_v3 = vld [vmem:[%s3988_s2 + $0x8] sm:$0xff]  ;;  %v801_v4 = vld [vmem:[%s3988_s2 + $0x10] sm:$0xff]  ;;  %s3970_s28 = smov 104   ;;  %s3991_s26 = sld [smem:[#allocation7_spill]] }
  0x3a   : > { %v3234_v5 = vpack.c.bf16 %v800_v3, %v799_v2  ;;  %v802_v6 = vld [vmem:[%s3988_s2 + $0x18] sm:$0xff]  ;;  %s780_s27 = scalar_lea.vmem %s3989_s29, %s3603_s4  ;;  %v2951_v9 = vld [vmem:[%s3990_s0] ss:$0 sm:$0xff]  ;;  %s3406_s0 = smov 56  }
  0x3b   : > { %v3237_v7 = vpack.c.bf16 %v802_v6, %v801_v4  ;;  %v3610_v8 = vld [vmem:[%s780_s27] sm:$0xff]  ;;  %s3407_s29 = smov 64   ;;  %s3408_s27 = smov 48  }
  0x3c   : > { %3235 = vmatpush3.bf16.msra.mxu1 %v3234_v5 }
  0x3d   : > { %3236 = vmatprep.subr.bf16.mxu1 %v3396_v0 }
  0x3f   : > { %s788_s6 = scalar_lea.vmem %s3991_s26, %s3603_s4  ;;  %s3409_s26 = smov 40  }
  0x40   : > { %3238 = vmatpush3.bf16.msra.mxu1 %v3237_v7  ;;  %v884_v20 = vld [vmem:[%s788_s6] sm:$0xff]  ;;  %s3993_s6 = sld [smem:[#allocation12_spill]] }
  0x41   : > { %3079 = vmatprep.subr.mxu1 %v3398_v1 }
  0x43   : > { %3077 = vmatmul.mubr.msk.f32.vlgmr.msra.gmra.mrb[0].mxu1 %vm810_vm1, %v3610_v8 }
  0x44   : > { %3081 = vmatprep.mubr.msk.f32.mxu1 %vm3397_vm0, %v3398_v1 }
 0x116   : > { %v880_v10 = vpop.f32.mrb[0].mxu1 }
 0x117   : > { %v3620_v11 = vadd.f32 %v2951_v9, %v880_v10  ;;  %v3078_v12 = vpop.f32.mrb[1].mxu1 }
 0x119   : > { %1050 = vrot.lane.b32.xlu1 %v3620_v11, %s3399_s7  ;;  %886 = vrot.lane.b32.xlu0 %v3620_v11, %s3969_s30  ;;  %s4001_s30 = smov 72  }
 0x11d   : > { %1217 = vrot.lane.b32.xlu1 %v3620_v11, %s3965_s3  ;;  %1052 = vrot.lane.b32.xlu0 %v3620_v11, %s3963_s25  ;;  %s3968_s25 = smov 8   ;;  %s3995_s3 = sld [smem:[#allocation13_spill]] }
 0x121   : > { %1382 = vrot.lane.b32.xlu1 %v3620_v11, %s3964_s8  ;;  %1215 = vrot.lane.b32.xlu0 %v3620_v11, %s3972_s1 }
 0x125   : > { %1380 = vrot.lane.b32.xlu0 %v3620_v11, %s3970_s28  ;;  %s3994_s28 = sld [smem:[#allocation6_spill]] }
 0x12b   : > { %s784_s1 = scalar_lea.vmem %s3994_s28, %s3603_s4 }
 0x18b   : > { %v1051_v13 = vpop.permute.xlu1 %1050  ;;  %v887_v14 = vpop.permute.xlu0 %886 }
 0x18c   : > { %3080 = vmatpush3.xpose.msk.msra.mxu1 %vm888_vm2, %v887_v14 }
 0x18d   : > { %3084 = vmatprep.subr.mxu1 %v3398_v1 }
 0x18f   : > { %3082 = vmatmul.mubr.msk.f32.vlgmr.msra.gmra.mrb[2].mxu1 %vm888_vm2, %v3620_v11  ;;  %v1053_v15 = vpop.permute.xlu0 %1052  ;;  %v1218_v16 = vpop.permute.xlu1 %1217 }
 0x190   : > { %3090 = vmatpush3.xpose.msk.msra.mxu0 %vm888_vm2, %v1053_v15  ;;  %3086 = vmatprep.mubr.msk.f32.mxu1 %vm3397_vm0, %v3398_v1 }
 0x191   : > { %3099 = vmatprep.subr.mxu0 %v3398_v1 }
 0x193   : > { %3092 = vmatmul.mubr.msk.f32.vlgmr.msra.gmra.mrb[0].mxu0 %vm888_vm2, %v1051_v13  ;;  %v1216_v17 = vpop.permute.xlu0 %1215  ;;  %v1383_v18 = vpop.permute.xlu1 %1382 }
 0x194   : > { %3100 = vmatpush3.xpose.msk.msra.mxu0 %vm888_vm2, %v1218_v16  ;;  %3101 = vmatprep.mubr.msk.f32.mxu0 %vm3397_vm0, %v3398_v1 }
 0x195   : > { %3109 = vmatprep.subr.mxu0 %v3398_v1 }
 0x197   : > { %3102 = vmatmul.mubr.msk.f32.vlgmr.msra.gmra.mrb[2].mxu0 %vm888_vm2, %v1216_v17  ;;  %v1381_v19 = vpop.permute.xlu0 %1380 }
 0x198   : > { %3110 = vmatpush3.xpose.msk.msra.mxu0 %vm888_vm2, %v1383_v18  ;;  %3111 = vmatprep.mubr.msk.f32.mxu0 %vm3397_vm0, %v3398_v1 }
 0x199   : > { %3239 = vmatprep.subr.bf16.mxu0 %v3396_v0 }
 0x19b   : > { %3112 = vmatmul.mubr.msk.f32.vlgmr.msra.gmra.mrb[4].mxu0 %vm888_vm2, %v1381_v19 }
 0x19c   : > { %3127 = vmatprep.mubr.msk.f32.mxu0 %vm3397_vm0, %v3398_v1 }
 0x262   : > { %v959_v21 = vpop.f32.mrb[2].mxu1 }
 0x263   : > { %v960_v22 = vadd.f32 %v959_v21, %v884_v20  ;;  %v3083_v23 = vpop.f32.mrb[3].mxu1 }
 0x265   : > { %v963_v24 = vsel %vm888_vm2, %v960_v22, -inf }
 0x266   : > { %v1124_v25 = vpop.f32.mrb[0].mxu0  ;;  %964 = vmax.xlane.f32.xlu1 %v963_v24 }
 0x267   : > { %v1125_v26 = vadd.f32 %v1124_v25, %v884_v20  ;;  %v3093_v27 = vpop.f32.mrb[1].mxu0 }
 0x269   : > { %v1128_v28 = vsel %vm888_vm2, %v1125_v26, -inf }
 0x26a   : > { %1129 = vmax.xlane.f32.xlu0 %v1128_v28  ;;  %v1289_v29 = vpop.f32.mrb[2].mxu0 }
 0x26b   : > { %v1290_v30 = vadd.f32 %v1289_v29, %v884_v20  ;;  %v3103_v31 = vpop.f32.mrb[3].mxu0 }
 0x26d   : > { %v1293_v32 = vsel %vm888_vm2, %v1290_v30, -inf }
 0x26e   : > { %1294 = vmax.xlane.f32.xlu0 %v1293_v32  ;;  %v1454_v33 = vpop.f32.mrb[4].mxu0  ;;  %v2965_v32 = vld [vmem:[%s3993_s6] ss:$0 sm:$0xff]  ;;  %s4000_s6 = smov 80  }
 0x26f   : > { %v1455_v34 = vadd.f32 %v1454_v33, %v884_v20  ;;  %v3113_v35 = vpop.f32.mrb[5].mxu0 }
 0x271   : > { %v1458_v36 = vsel %vm888_vm2, %v1455_v34, -inf }
 0x272   : > { %1459 = vmax.xlane.f32.xlu1 %v1458_v36 }
 0x283   : > { %1139 = vrot.lane.b32.xlu1 %v3620_v11, %s3406_s0 }
 0x2f3   : > { %v965_v37 = vpop.xlane.xlu1 %964 }
 0x2f4   : > { %v966_v38 = vsub.f32 %v960_v22, %v965_v37 }
 0x2f6   : > { %v967_v39 = vmul.f32 1.442695, %v966_v38 }
 0x2f7   : > { %v1130_v40 = vpop.xlane.xlu0 %1129 }
 0x2f8   : > { %3317 = vpow2.f32 %v967_v39  ;;  %v1131_v41 = vsub.f32 %v1125_v26, %v1130_v40 }
 0x2fa   : > { %v1132_v42 = vmul.f32 1.442695, %v1131_v41 }
 0x2fb   : > { %v1295_v52 = vpop.xlane.xlu0 %1294 }
 0x2fc   : > { %3319 = vpow2.f32 %v1132_v42  ;;  %v1296_v53 = vsub.f32 %v1290_v30, %v1295_v52  ;;  %v1679_v52 = vld [vmem:[%s3944_s10 + $0x10] sm:$0xff] }
 0x2fe   : > { %v1297_v54 = vmul.f32 1.442695, %v1296_v53  ;;  %v1680_v53 = vld [vmem:[%s3944_s10 + $0x18] sm:$0xff] }
 0x2ff   : > { %v1460_v43 = vpop.xlane.xlu1 %1459 }
 0x300   : > { %v1461_v44 = vsub.f32 %v1455_v34, %v1460_v43  ;;  %v1761_v43 = vld [vmem:[%s3946_s12] sm:$0xff] }
 0x302   : > { %v3318_v45 = vpop.eup %3317  ;;  %v1462_v46 = vmul.f32 1.442695, %v1461_v44  ;;  %v1762_v44 = vld [vmem:[%s3946_s12 + $0x8] sm:$0xff] }
 0x303   : > { %v969_v47 = vsel %vm888_vm2, %v3318_v45, 0.0  ;;  %v1140_v57 = vpop.permute.xlu1 %1139 }
 0x304   : > { %3321 = vpow2.f32 %v1462_v46  ;;  %970 = vadd.xlane.f32.xlu0 %v969_v47  ;;  %v1764_v46 = vld [vmem:[%s3946_s12 + $0x18] sm:$0xff] }
 0x305   : > { %3323 = vpow2.f32 %v1297_v54  ;;  %v3249_v54 = vpack.c.bf16 %v1680_v53, %v1679_v52 }
 0x306   : > { %v3320_v48 = vpop.eup %3319 }
 0x307   : > { %v1134_v49 = vsel %vm888_vm2, %v3320_v48, 0.0 }
 0x308   : > { %1135 = vadd.xlane.f32.xlu1 %v1134_v49  ;;  %v1677_v49 = vld [vmem:[%s3944_s10] sm:$0xff] }
 0x30e   : > { %v3322_v50 = vpop.eup %3321 }
 0x30f   : > { %v1464_v51 = vsel %vm888_vm2, %v3322_v50, 0.0  ;;  %v3324_v55 = vpop.eup %3323 }
 0x310   : > { %1465 = vadd.xlane.f32.xlu1 %v1464_v51  ;;  %v1299_v56 = vsel %vm888_vm2, %v3324_v55, 0.0 }
 0x31a   : > { %974 = vrot.lane.b32.xlu0 %v3620_v11, %s3407_s29  ;;  %s3992_s29 = sld [smem:[#allocation11_spill]] }
 0x320   : > { %v1562_v12 = vld [vmem:[%s3992_s29] sm:$0xff]  ;;  %v1563_v13 = vld [vmem:[%s3992_s29 + $0x8] sm:$0xff]  ;;  %v1564_v19 = vld [vmem:[%s3992_s29 + $0x10] sm:$0xff] }
 0x321   : > { %1304 = vrot.lane.b32.xlu1 %v3620_v11, %s3408_s27  ;;  %v3240_v14 = vpack.c.bf16 %v1563_v13, %v1562_v12  ;;  %v1565_v20 = vld [vmem:[%s3992_s29 + $0x18] sm:$0xff]  ;;  %s3967_s27 = smov 16  }
 0x322   : > { %v3243_v21 = vpack.c.bf16 %v1565_v20, %v1564_v19 }
 0x323   : > { %3241 = vmatpush3.bf16.msra.mxu0 %v3240_v14 }
 0x324   : > { %3242 = vmatprep.subr.bf16.mxu0 %v3396_v0 }
 0x327   : > { %3244 = vmatpush3.bf16.msra.mxu0 %v3243_v21 }
 0x328   : > { %3251 = vmatprep.subr.bf16.mxu0 %v3396_v0 }
 0x339   : > { %1300 = vadd.xlane.f32.xlu0 %v1299_v56 }
 0x34f   : > { %1469 = vrot.lane.b32.xlu0 %v3620_v11, %s3409_s26  ;;  %s3966_s26 = smov 24  }
 0x391   : > { %v971_v58 = vpop.xlane.xlu0 %970 }
 0x392   : > { %3325 = vrcp.f32 %v971_v58 }
 0x395   : > { %v975_v59 = vpop.permute.xlu0 %974  ;;  %v1136_v60 = vpop.xlane.xlu1 %1135 }
 0x396   : > { %3327 = vrcp.f32 %v1136_v60  ;;  %3085 = vmatpush3.msra.mxu1 %v975_v59  ;;  %v2967_v59 = vld [vmem:[%s3995_s3] ss:$0 sm:$0xff]  ;;  %s3998_s3 = sld [smem:[#allocation8_spill]] }
 0x397   : > { %3094 = vmatprep.subr.mxu1 %v3398_v1 }
 0x39c   : > { %v3326_v61 = vpop.eup %3325  ;;  %s792_s8 = scalar_lea.vmem %s3998_s3, %s3603_s4  ;;  %s796_s3 = scalar_lea.vmem %s3958_s24, %s3603_s4 }
 0x39d   : > { %v973_v62 = vmul.f32 %v3326_v61, %v3318_v45  ;;  %v1466_v63 = vpop.xlane.xlu1 %1465  ;;  %v1763_v45 = vld [vmem:[%s3946_s12 + $0x10] sm:$0xff]  ;;  %v2968_v61 = vld [vmem:[%s3943_s9] ss:$0 sm:$0xff] }
 0x39e   : > { %v3255_v47 = vpack.c.bf16 %v1764_v46, %v1763_v45 }
 0x39f   : > { %3087 = vmatmul.mubr.msk.f32.vlgmr.msra.gmra.mrb[4].mxu1 %vm888_vm2, %v973_v62 }
 0x3a0   : > { %v3328_v2 = vpop.eup %3327  ;;  %3095 = vmatpush3.msra.mxu1 %v1140_v57  ;;  %3096 = vmatprep.mubr.msk.f32.mxu1 %vm3397_vm0, %v3398_v1 }
 0x3a1   : > { %v1138_v3 = vmul.f32 %v3328_v2, %v3320_v48  ;;  %v1305_v4 = vpop.permute.xlu1 %1304  ;;  %3104 = vmatprep.subr.mxu1 %v3398_v1  ;;  %v798_v48 = vld [vmem:[%s784_s1] sm:$0xff]  ;;  %s3997_s1 = smov 104  }
 0x3a2   : > { %v2971_v2 = vld [vmem:[%s3947_s13] ss:$0 sm:$0xff] }
 0x3a3   : > { %3097 = vmatmul.mubr.msk.f32.vlgmr.msra.gmra.mrb[6].mxu1 %vm888_vm2, %v1138_v3 }
 0x3a4   : > { %3105 = vmatpush3.msra.mxu1 %v1305_v4  ;;  %3106 = vmatprep.mubr.msk.f32.mxu1 %vm3397_vm0, %v3398_v1 }
 0x3a5   : > { %3114 = vmatprep.subr.mxu1 %v3398_v1 }
 0x3c6   : > { %v1301_v5 = vpop.xlane.xlu0 %1300 }
 0x3c7   : > { %3329 = vrcp.f32 %v1301_v5 }
 0x3c8   : > { %3331 = vrcp.f32 %v1466_v63 }
 0x3ca   : > { %v1470_v10 = vpop.permute.xlu0 %1469 }
 0x3d1   : > { %v3330_v6 = vpop.eup %3329 }
 0x3d2   : > { %v1303_v7 = vmul.f32 %v3330_v6, %v3324_v55  ;;  %v3332_v9 = vpop.eup %3331 }
 0x3d3   : > { %v1468_v11 = vmul.f32 %v3332_v9, %v3322_v50  ;;  %v1678_v50 = vld [vmem:[%s3944_s10 + $0x8] sm:$0xff] }
 0x3d4   : > { %3107 = vmatmul.mubr.msk.f32.vlgmr.msra.gmra.mrb[8].mxu1 %vm888_vm2, %v1303_v7  ;;  %v3246_v51 = vpack.c.bf16 %v1678_v50, %v1677_v49  ;;  %v2969_v7 = vld [vmem:[%s3945_s11] ss:$0 sm:$0xff] }
 0x3d5   : > { %3115 = vmatpush3.msra.mxu1 %v1470_v10  ;;  %3116 = vmatprep.mubr.msk.f32.mxu1 %vm3397_vm0, %v3398_v1 }
 0x3d6   : > { %3245 = vmatprep.subr.bf16.mxu1 %v3396_v0 }
 0x3d8   : > { %3117 = vmatmul.mubr.msk.f32.vlgmr.msra.gmra.mrb[10].mxu1 %vm888_vm2, %v1468_v11 }
 0x3d9   : > { %3138 = vmatprep.mubr.msk.f32.mxu1 %vm3397_vm0, %v3398_v1  ;;  %3247 = vmatpush3.bf16.msra.mxu1 %v3246_v51 }
 0x3da   : > { %3248 = vmatprep.subr.bf16.mxu1 %v3396_v0 }
 0x3dd   : > { %3250 = vmatpush3.bf16.msra.mxu1 %v3249_v54 }
 0x3de   : > { %3152 = vmatprep.subr.mxu1 %v3398_v1 }
 0x472   : > { %v1046_v15 = vpop.f32.mrb[4].mxu1 }
 0x473   : > { %v3088_v16 = vpop.f32.mrb[5].mxu1 }
 0x476   : > { %v1211_v17 = vpop.f32.mrb[6].mxu1 }
 0x477   : > { %1546 = vrot.lane.b32.xlu1 %v1211_v17, %s3968_s25  ;;  %v3098_v18 = vpop.f32.mrb[7].mxu1  ;;  %s3996_s25 = smov 112   ;;  %v1845_v17 = vld [vmem:[%s792_s8] sm:$0xff] }
 0x4a7   : > { %v1376_v22 = vpop.f32.mrb[8].mxu1 }
 0x4a8   : > { %1550 = vrot.lane.b32.xlu0 %v1376_v22, %s3967_s27  ;;  %v3108_v23 = vpop.f32.mrb[9].mxu1  ;;  %s3999_s27 = smov 96  }
 0x4ab   : > { %v1541_v24 = vpop.f32.mrb[10].mxu1 }
 0x4ac   : > { %1554 = vrot.lane.b32.xlu1 %v1541_v24, %s3966_s26  ;;  %v3118_v25 = vpop.f32.mrb[11].mxu1 }
 0x4e9   : > { %v1547_v26 = vpop.permute.xlu1 %1546 }
 0x4ea   : > { %v1557_v28 = vsel %vm888_vm2, %v1046_v15, %v1547_v26 }
 0x51a   : > { %v1551_v27 = vpop.permute.xlu0 %1550 }
 0x51b   : > { %v1559_v29 = vsel %vm1558_vm3, %v1557_v28, %v1551_v27 }
 0x51e   : > { %v1555_v30 = vpop.permute.xlu1 %1554 }
 0x51f   : > { %v1561_v31 = vsel %vm1560_vm4, %v1559_v29, %v1555_v30 }
 0x520   : > { %3128 = vmatmul.mubr.msk.f32.vlgmr.msra.gmra.mrb[6].mxu0 %vm810_vm1, %v1561_v31 }
 0x521   : > { %3149 = vmatprep.mubr.msk.f32.mxu0 %vm3397_vm0, %v3398_v1 }
 0x5f3   : > { %v1642_v33 = vpop.f32.mrb[6].mxu0 }
 0x5f4   : > { %v1643_v34 = vadd.f32 %v2965_v32, %v1642_v33  ;;  %v3129_v35 = vpop.f32.mrb[7].mxu0 }
 0x5f6   : > { %v1646_v36 = vadd.f32 %v1643_v34, %v3610_v8  ;;  %v3252_v8 = vpack.c.bf16 %v1762_v44, %v1761_v43 }
 0x5f8   : > { %v1649_v37 = vsel %vm810_vm1, %v1646_v36, 0.0  ;;  %3253 = vmatpush3.bf16.msra.mxu0 %v3252_v8 }
 0x5f9   : > { %1650 = vadd.xlane.f32.xlu0 %v1649_v37  ;;  %3254 = vmatprep.subr.bf16.mxu0 %v3396_v0 }
 0x5fc   : > { %3256 = vmatpush3.bf16.msra.mxu0 %v3255_v47 }
 0x5fd   : > { %3162 = vmatprep.subr.mxu0 %v3398_v1 }
 0x5ff   : > { %3150 = vmatmul.mubr.msk.f32.vlgmr.msra.gmra.mrb[8].mxu0 %vm810_vm1, %v798_v48 }
 0x600   : > { %3164 = vmatprep.mubr.msk.f32.mxu0 %vm3397_vm0, %v3398_v1 }
 0x686   : > { %v1651_v38 = vpop.xlane.xlu0 %1650 }
 0x687   : > { %v1653_v39 = vmul.f32 0.03125, %v1651_v38 }
 0x689   : > { %v1654_v40 = vsub.f32 %v1646_v36, %v1653_v39 }
 0x68b   : > { %v1655_v41 = vmul.f32 %v1654_v40, %v1654_v40 }
 0x68d   : > { %v1656_v42 = vsel %vm810_vm1, %v1655_v41, 0.0 }
 0x68e   : > { %1657 = vadd.xlane.f32.xlu1 %v1656_v42 }
 0x6d2   : > { %v1841_v3 = vpop.f32.mrb[8].mxu0 }
 0x6d3   : > { %v3768_v4 = vadd.f32 %v2971_v2, %v1841_v3  ;;  %v3151_v5 = vpop.f32.mrb[9].mxu0 }
 0x6d5   : > { %2011 = vrot.lane.b32.xlu0 %v3768_v4, %s3399_s7 }
 0x6d9   : > { %2176 = vrot.lane.b32.xlu0 %v3768_v4, %s3996_s25 }
 0x6dd   : > { %2341 = vrot.lane.b32.xlu0 %v3768_v4, %s3997_s1 }
 0x71b   : > { %v1658_v55 = vpop.xlane.xlu1 %1657 }
 0x71c   : > { %v1659_v56 = vmul.f32 0.03125, %v1658_v55 }
 0x71e   : > { %v1660_v57 = vadd.f32 1e-05, %v1659_v56 }
 0x720   : > { %3333 = vrsqrt.f32 %v1660_v57 }
 0x72a   : > { %v3334_v58 = vpop.eup %3333 }
 0x72b   : > { %v1662_v60 = vmul.f32 %v3334_v58, %v1654_v40 }
 0x72d   : > { %v1669_v62 = vmul.f32 %v2967_v59, %v1662_v60 }
 0x72f   : > { %v3759_v63 = vadd.f32 %v2968_v61, %v1669_v62 }
 0x731   : > { %3139 = vmatmul.mubr.msk.f32.vlgmr.msra.gmra.mrb[12].mxu1 %vm810_vm1, %v3759_v63 }
 0x732   : > { %3154 = vmatprep.mubr.msk.f32.mxu1 %vm3397_vm0, %v3398_v1  ;;  %3153 = vmatpush3.xpose.msk.msra.mxu1 %vm888_vm2, %v3768_v4 }
 0x733   : > { %3157 = vmatprep.subr.mxu1 %v3398_v1 }
 0x747   : > { %v2012_v6 = vpop.permute.xlu0 %2011 }
 0x748   : > { %3163 = vmatpush3.xpose.msk.msra.mxu0 %vm888_vm2, %v2012_v6 }
 0x749   : > { %3172 = vmatprep.subr.mxu0 %v3398_v1 }
 0x74b   : > { %v2177_v12 = vpop.permute.xlu0 %2176 }
 0x74f   : > { %v2342_v15 = vpop.permute.xlu0 %2341 }
 0x804   : > { %v1757_v9 = vpop.f32.mrb[12].mxu1 }
 0x805   : > { %v1758_v10 = vadd.f32 %v2969_v7, %v1757_v9  ;;  %v3140_v11 = vpop.f32.mrb[13].mxu1 }
 0x806   : > { %v2519_v11 = vld [vmem:[%s3948_s14] sm:$0xff] }
 0x807   : > { %2009 = vrot.lane.b32.xlu1 %v1758_v10, %s3399_s7  ;;  %3155 = vmatmul.mubr.msk.f32.vlgmr.msra.gmra.mrb[14].mxu1 %vm888_vm2, %v1758_v10 }
 0x808   : > { %3159 = vmatprep.mubr.msk.f32.mxu1 %vm3397_vm0, %v3398_v1 }
 0x80b   : > { %2174 = vrot.lane.b32.xlu1 %v1758_v10, %s3996_s25  ;;  %s4002_s25 = smov 88  }
 0x80f   : > { %2339 = vrot.lane.b32.xlu1 %v1758_v10, %s3997_s1 }
 0x879   : > { %v2010_v13 = vpop.permute.xlu1 %2009 }
 0x87a   : > { %3165 = vmatmul.mubr.msk.f32.vlgmr.msra.gmra.mrb[10].mxu0 %vm888_vm2, %v2010_v13 }
 0x87b   : > { %3173 = vmatpush3.xpose.msk.msra.mxu0 %vm888_vm2, %v2177_v12  ;;  %3174 = vmatprep.mubr.msk.f32.mxu0 %vm3397_vm0, %v3398_v1  ;;  %v2520_v12 = vld [vmem:[%s3948_s14 + $0x8] sm:$0xff] }
 0x87c   : > { %3182 = vmatprep.subr.mxu0 %v3398_v1  ;;  %v3258_v13 = vpack.c.bf16 %v2520_v12, %v2519_v11 }
 0x87d   : > { %v2175_v14 = vpop.permute.xlu1 %2174 }
 0x87e   : > { %3175 = vmatmul.mubr.msk.f32.vlgmr.msra.gmra.mrb[12].mxu0 %vm888_vm2, %v2175_v14  ;;  %v2521_v14 = vld [vmem:[%s3948_s14 + $0x10] sm:$0xff] }
 0x87f   : > { %3183 = vmatpush3.xpose.msk.msra.mxu0 %vm888_vm2, %v2342_v15  ;;  %3184 = vmatprep.mubr.msk.f32.mxu0 %vm3397_vm0, %v3398_v1  ;;  %v2522_v15 = vld [vmem:[%s3948_s14 + $0x18] sm:$0xff] }
 0x880   : > { %3257 = vmatprep.subr.bf16.mxu0 %v3396_v0 }
 0x881   : > { %v2340_v16 = vpop.permute.xlu1 %2339 }
 0x882   : > { %3185 = vmatmul.mubr.msk.f32.vlgmr.msra.gmra.mrb[14].mxu0 %vm888_vm2, %v2340_v16  ;;  %v3261_v16 = vpack.c.bf16 %v2522_v15, %v2521_v14 }
 0x883   : > { %3200 = vmatprep.mubr.msk.f32.mxu0 %vm3397_vm0, %v3398_v1  ;;  %3259 = vmatpush3.bf16.msra.mxu0 %v3258_v13 }
 0x884   : > { %3260 = vmatprep.subr.bf16.mxu0 %v3396_v0 }
 0x887   : > { %3262 = vmatpush3.bf16.msra.mxu0 %v3261_v16 }
 0x888   : > { %3269 = vmatprep.subr.bf16.mxu0 %v3396_v0 }
 0x8da   : > { %v1918_v18 = vpop.f32.mrb[14].mxu1 }
 0x8db   : > { %v1919_v19 = vadd.f32 %v1918_v18, %v1845_v17  ;;  %v3156_v20 = vpop.f32.mrb[15].mxu1 }
 0x8dd   : > { %v1922_v21 = vsel %vm888_vm2, %v1919_v19, -inf }
 0x8de   : > { %1923 = vmax.xlane.f32.xlu0 %v1922_v21 }
 0x94d   : > { %v2083_v22 = vpop.f32.mrb[10].mxu0 }
 0x94e   : > { %v2084_v23 = vadd.f32 %v2083_v22, %v1845_v17  ;;  %v3166_v24 = vpop.f32.mrb[11].mxu0 }
 0x950   : > { %v2087_v25 = vsel %vm888_vm2, %v2084_v23, -inf }
 0x951   : > { %2088 = vmax.xlane.f32.xlu1 %v2087_v25  ;;  %v2248_v26 = vpop.f32.mrb[12].mxu0 }
 0x952   : > { %v2249_v27 = vadd.f32 %v2248_v26, %v1845_v17  ;;  %v3176_v28 = vpop.f32.mrb[13].mxu0 }
 0x954   : > { %v2252_v29 = vsel %vm888_vm2, %v2249_v27, -inf }
 0x955   : > { %v2413_v30 = vpop.f32.mrb[14].mxu0  ;;  %2253 = vmax.xlane.f32.xlu0 %v2252_v29  ;;  %v2985_v29 = vld [vmem:[%s3949_s15] ss:$0 sm:$0xff] }
 0x956   : > { %v2414_v31 = vadd.f32 %v2413_v30, %v1845_v17  ;;  %v3186_v32 = vpop.f32.mrb[15].mxu0 }
 0x958   : > { %v2417_v33 = vsel %vm888_vm2, %v2414_v31, -inf }
 0x959   : > { %2418 = vmax.xlane.f32.xlu0 %v2417_v33 }
 0x962   : > { %1933 = vrot.lane.b32.xlu1 %v3768_v4, %s3999_s27 }
 0x96b   : > { %v1924_v34 = vpop.xlane.xlu0 %1923 }
 0x96c   : > { %v1925_v35 = vsub.f32 %v1919_v19, %v1924_v34 }
 0x96e   : > { %v1926_v36 = vmul.f32 1.442695, %v1925_v35 }
 0x970   : > { %3335 = vpow2.f32 %v1926_v36 }
 0x97a   : > { %v3336_v37 = vpop.eup %3335 }
 0x97b   : > { %v1928_v38 = vsel %vm888_vm2, %v3336_v37, 0.0 }
 0x986   : > { %1929 = vadd.xlane.f32.xlu1 %v1928_v38 }
 0x9de   : > { %v2089_v39 = vpop.xlane.xlu1 %2088 }
 0x9df   : > { %v2090_v40 = vsub.f32 %v2084_v23, %v2089_v39 }
 0x9e1   : > { %v2091_v41 = vmul.f32 1.442695, %v2090_v40  ;;  %v2634_v40 = vld [vmem:[%s3952_s18 + $0x8] sm:$0xff] }
 0x9e2   : > { %v1934_v42 = vpop.permute.xlu1 %1933  ;;  %v2254_v43 = vpop.xlane.xlu0 %2253 }
 0x9e3   : > { %3337 = vpow2.f32 %v2091_v41  ;;  %v2255_v44 = vsub.f32 %v2249_v27, %v2254_v43  ;;  %3158 = vmatpush3.msra.mxu1 %v1934_v42  ;;  %v2636_v42 = vld [vmem:[%s3952_s18 + $0x18] sm:$0xff] }
 0x9e4   : > { %3167 = vmatprep.subr.mxu1 %v3398_v1 }
 0x9e5   : > { %v2256_v8 = vmul.f32 1.442695, %v2255_v44  ;;  %v2718_v44 = vld [vmem:[%s3954_s20] sm:$0xff] }
 0x9e6   : > { %v2419_v45 = vpop.xlane.xlu0 %2418 }
 0x9e7   : > { %3339 = vpow2.f32 %v2256_v8  ;;  %v2420_v46 = vsub.f32 %v2414_v31, %v2419_v45  ;;  %v2719_v8 = vld [vmem:[%s3954_s20 + $0x8] sm:$0xff]  ;;  %v2720_v45 = vld [vmem:[%s3954_s20 + $0x10] sm:$0xff] }
 0x9e9   : > { %v2421_v47 = vmul.f32 1.442695, %v2420_v46  ;;  %v3270_v46 = vpack.c.bf16 %v2719_v8, %v2718_v44 }
 0x9eb   : > { %3341 = vpow2.f32 %v2421_v47  ;;  %v2721_v47 = vld [vmem:[%s3954_s20 + $0x18] sm:$0xff] }
 0x9ed   : > { %v3338_v48 = vpop.eup %3337 }
 0x9ee   : > { %v2093_v49 = vsel %vm888_vm2, %v3338_v48, 0.0 }
 0x9ef   : > { %2094 = vadd.xlane.f32.xlu0 %v2093_v49  ;;  %v2722_v49 = vld [vmem:[%s3954_s20 + $0x20] sm:$0xff] }
 0x9f1   : > { %v3340_v50 = vpop.eup %3339 }
 0x9f2   : > { %v2258_v51 = vsel %vm888_vm2, %v3340_v50, 0.0 }
 0x9f3   : > { %2259 = vadd.xlane.f32.xlu1 %v2258_v51 }
 0x9f5   : > { %v3342_v52 = vpop.eup %3341 }
 0x9f6   : > { %v2423_v53 = vsel %vm888_vm2, %v3342_v52, 0.0 }
 0x9f7   : > { %2424 = vadd.xlane.f32.xlu0 %v2423_v53 }
 0xa04   : > { %2263 = vrot.lane.b32.xlu1 %v3768_v4, %s4000_s6  ;;  %s4003_s6 = smov 8  }
 0xa08   : > { %2428 = vrot.lane.b32.xlu1 %v3768_v4, %s4001_s30  ;;  %s4004_s30 = smov 16  }
 0xa0d   : > { %2098 = vrot.lane.b32.xlu0 %v3768_v4, %s4002_s25  ;;  %s4005_s25 = smov 24  }
 0xa13   : > { %v1930_v54 = vpop.xlane.xlu1 %1929 }
 0xa14   : > { %3343 = vrcp.f32 %v1930_v54 }
 0xa1e   : > { %v3344_v55 = vpop.eup %3343 }
 0xa1f   : > { %v1932_v56 = vmul.f32 %v3344_v55, %v3336_v37 }
 0xa21   : > { %3160 = vmatmul.mubr.msk.f32.vlgmr.msra.gmra.mrb[16].mxu1 %vm888_vm2, %v1932_v56  ;;  %v2987_v56 = vld [vmem:[%s3950_s16] ss:$0 sm:$0xff] }
 0xa22   : > { %3169 = vmatprep.mubr.msk.f32.mxu1 %vm3397_vm0, %v3398_v1 }
 0xa7c   : > { %v2095_v57 = vpop.xlane.xlu0 %2094 }
 0xa7d   : > { %3345 = vrcp.f32 %v2095_v57 }
 0xa80   : > { %v2260_v58 = vpop.xlane.xlu1 %2259 }
 0xa81   : > { %3347 = vrcp.f32 %v2260_v58  ;;  %v2988_v58 = vld [vmem:[%s3951_s17] ss:$0 sm:$0xff] }
 0xa84   : > { %v2425_v59 = vpop.xlane.xlu0 %2424  ;;  %v2264_v62 = vpop.permute.xlu1 %2263 }
 0xa85   : > { %3349 = vrcp.f32 %v2425_v59 }
 0xa87   : > { %v3346_v60 = vpop.eup %3345 }
 0xa88   : > { %v2097_v61 = vmul.f32 %v3346_v60, %v3338_v48  ;;  %v2099_v2 = vpop.permute.xlu0 %2098  ;;  %v2429_v5 = vpop.permute.xlu1 %2428  ;;  %v3273_v48 = vpack.c.bf16 %v2721_v47, %v2720_v45 }
 0xa89   : > { %3168 = vmatpush3.msra.mxu1 %v2099_v2  ;;  %v2989_v2 = vld [vmem:[%s3953_s19] ss:$0 sm:$0xff] }
 0xa8a   : > { %3170 = vmatmul.mubr.msk.f32.vlgmr.msra.gmra.mrb[18].mxu1 %vm888_vm2, %v2097_v61  ;;  %3177 = vmatprep.subr.mxu1 %v3398_v1  ;;  %v2725_v61 = vld [vmem:[%s3954_s20 + $0x38] sm:$0xff] }
 0xa8b   : > { %v3348_v3 = vpop.eup %3347  ;;  %3178 = vmatpush3.msra.mxu1 %v2264_v62  ;;  %3179 = vmatprep.mubr.msk.f32.mxu1 %vm3397_vm0, %v3398_v1 }
 0xa8c   : > { %v2262_v4 = vmul.f32 %v3348_v3, %v3340_v50  ;;  %3187 = vmatprep.subr.mxu1 %v3398_v1  ;;  %v2723_v50 = vld [vmem:[%s3954_s20 + $0x28] sm:$0xff] }
 0xa8d   : > { %v3276_v51 = vpack.c.bf16 %v2723_v50, %v2722_v49 }
 0xa8e   : > { %3180 = vmatmul.mubr.msk.f32.vlgmr.msra.gmra.mrb[20].mxu1 %vm888_vm2, %v2262_v4 }
 0xa8f   : > { %v3350_v6 = vpop.eup %3349  ;;  %3188 = vmatpush3.msra.mxu1 %v2429_v5  ;;  %3189 = vmatprep.mubr.msk.f32.mxu1 %vm3397_vm0, %v3398_v1 }
 0xa90   : > { %v2427_v7 = vmul.f32 %v3350_v6, %v3342_v52  ;;  %3263 = vmatprep.subr.bf16.mxu1 %v3396_v0 }
 0xa92   : > { %3190 = vmatmul.mubr.msk.f32.vlgmr.msra.gmra.mrb[22].mxu1 %vm888_vm2, %v2427_v7  ;;  %v2991_v7 = vld [vmem:[%s3955_s21] ss:$0 sm:$0xff] }
 0xa93   : > { %3211 = vmatprep.mubr.msk.f32.mxu1 %vm3397_vm0, %v3398_v1 }
 0xaf4   : > { %v2005_v9 = vpop.f32.mrb[16].mxu1 }
 0xaf5   : > { %v3161_v10 = vpop.f32.mrb[17].mxu1 }
 0xb5d   : > { %v2170_v17 = vpop.f32.mrb[18].mxu1 }
 0xb5e   : > { %2505 = vrot.lane.b32.xlu0 %v2170_v17, %s4003_s6  ;;  %v3171_v18 = vpop.f32.mrb[19].mxu1 }
 0xb61   : > { %v2335_v19 = vpop.f32.mrb[20].mxu1 }
 0xb62   : > { %2509 = vrot.lane.b32.xlu1 %v2335_v19, %s4004_s30  ;;  %v3181_v20 = vpop.f32.mrb[21].mxu1 }
 0xb65   : > { %v2500_v21 = vpop.f32.mrb[22].mxu1 }
 0xb66   : > { %2513 = vrot.lane.b32.xlu0 %v2500_v21, %s4005_s25  ;;  %v3191_v22 = vpop.f32.mrb[23].mxu1 }
 0xbd0   : > { %v2506_v23 = vpop.permute.xlu0 %2505 }
 0xbd1   : > { %v2516_v25 = vsel %vm888_vm2, %v2005_v9, %v2506_v23  ;;  %v2993_v23 = vld [vmem:[%s3956_s22] ss:$0 sm:$0xff] }
 0xbd4   : > { %v2510_v24 = vpop.permute.xlu1 %2509 }
 0xbd5   : > { %v2517_v26 = vsel %vm1558_vm3, %v2516_v25, %v2510_v24  ;;  %v2994_v25 = vld [vmem:[#allocation2] ss:$0 sm:$0xff] }
 0xbd8   : > { %v2514_v27 = vpop.permute.xlu0 %2513 }
 0xbd9   : > { %v2518_v28 = vsel %vm1560_vm4, %v2517_v26, %v2514_v27 }
 0xbda   : > { %3201 = vmatmul.mubr.msk.f32.vlgmr.msra.gmra.mrb[16].mxu0 %vm810_vm1, %v2518_v28 }
 0xbdb   : > { %3230 = vmatprep.mubr.msk.f32.mxu0 %vm3397_vm0, %v3398_v1  ;;  %v2633_v1 = vld [vmem:[%s3952_s18] sm:$0xff]  ;;  %3271 = vmatpush3.bf16.msra.mxu0 %v3270_v46 }
 0xbdc   : > { %v3264_v41 = vpack.c.bf16 %v2634_v40, %v2633_v1  ;;  %3272 = vmatprep.subr.bf16.mxu0 %v3396_v0 }
 0xbde   : > { %3265 = vmatpush3.bf16.msra.mxu1 %v3264_v41 }
 0xbdf   : > { %3266 = vmatprep.subr.bf16.mxu1 %v3396_v0  ;;  %3274 = vmatpush3.bf16.msra.mxu0 %v3273_v48 }
 0xbe0   : > { %3275 = vmatprep.subr.bf16.mxu0 %v3396_v0 }
 0xbe3   : > { %3277 = vmatpush3.bf16.msra.mxu0 %v3276_v51 }
 0xbe4   : > { %3278 = vmatprep.subr.bf16.mxu0 %v3396_v0  ;;  %v2724_v0 = vld [vmem:[%s3954_s20 + $0x30] sm:$0xff] }
 0xbe5   : > { %v3279_v62 = vpack.c.bf16 %v2725_v61, %v2724_v0 }
 0xbe7   : > { %3280 = vmatpush3.bf16.msra.mxu0 %v3279_v62 }
 0xcad   : > { %v2599_v30 = vpop.f32.mrb[16].mxu0 }
 0xcae   : > { %v2600_v31 = vadd.f32 %v2985_v29, %v2599_v30  ;;  %v3202_v32 = vpop.f32.mrb[17].mxu0 }
 0xcb0   : > { %v2603_v33 = vadd.f32 %v2600_v31, %v3759_v63  ;;  %v2635_v63 = vld [vmem:[%s3952_s18 + $0x10] sm:$0xff] }
 0xcb1   : > { %v3267_v43 = vpack.c.bf16 %v2636_v42, %v2635_v63 }
 0xcb2   : > { %v2606_v34 = vsel %vm810_vm1, %v2603_v33, 0.0 }
 0xcb3   : > { %2607 = vadd.xlane.f32.xlu1 %v2606_v34  ;;  %3268 = vmatpush3.bf16.msra.mxu1 %v3267_v43 }
 0xd40   : > { %v2608_v35 = vpop.xlane.xlu1 %2607 }
 0xd41   : > { %v2609_v36 = vmul.f32 0.03125, %v2608_v35 }
 0xd43   : > { %v2610_v37 = vsub.f32 %v2603_v33, %v2609_v36 }
 0xd45   : > { %v2611_v38 = vmul.f32 %v2610_v37, %v2610_v37 }
 0xd47   : > { %v2612_v39 = vsel %vm810_vm1, %v2611_v38, 0.0 }
 0xd48   : > { %2613 = vadd.xlane.f32.xlu0 %v2612_v39 }
 0xdd5   : > { %v2614_v52 = vpop.xlane.xlu0 %2613 }
 0xdd6   : > { %v2615_v53 = vmul.f32 0.03125, %v2614_v52 }
 0xdd8   : > { %v2616_v54 = vadd.f32 1e-05, %v2615_v53 }
 0xdda   : > { %3351 = vrsqrt.f32 %v2616_v54 }
 0xde4   : > { %v3352_v55 = vpop.eup %3351 }
 0xde5   : > { %v2618_v57 = vmul.f32 %v3352_v55, %v2610_v37 }
 0xde7   : > { %v2625_v59 = vmul.f32 %v2987_v56, %v2618_v57 }
 0xde9   : > { %v2632_v60 = vadd.f32 %v2988_v58, %v2625_v59 }
 0xdeb   : > { %3212 = vmatmul.mubr.msk.f32.vlgmr.msra.gmra.mrb[24].mxu1 %vm810_vm1, %v2632_v60 }
 0xebe   : > { %v2713_v3 = vpop.f32.mrb[24].mxu1 }
 0xebf   : > { %v2714_v4 = vadd.f32 %v2989_v2, %v2713_v3  ;;  %v3213_v5 = vpop.f32.mrb[25].mxu1 }
 0xec1   : > { %v2717_v6 = vmax.f32 %v2714_v4, 0.0 }
 0xec3   : > { %3231 = vmatmul.mubr.msk.f32.vlgmr.msra.gmra.mrb[18].mxu0 %vm2733_vm5, %v2717_v6 }
 0xf96   : > { %v2803_v9 = vpop.f32.mrb[18].mxu0 }
 0xf97   : > { %v2804_v10 = vadd.f32 %v2991_v7, %v2803_v9  ;;  %v3232_v11 = vpop.f32.mrb[19].mxu0 }
 0xf99   : > { %v2807_v12 = vadd.f32 %v2804_v10, %v2632_v60 }
 0xf9b   : > { %v2810_v13 = vsel %vm810_vm1, %v2807_v12, 0.0 }
 0xf9c   : > { %2811 = vadd.xlane.f32.xlu0 %v2810_v13 }
0x1029   : > { %v2812_v14 = vpop.xlane.xlu0 %2811 }
0x102a   : > { %v2813_v15 = vmul.f32 0.03125, %v2812_v14 }
0x102c   : > { %v2814_v16 = vsub.f32 %v2807_v12, %v2813_v15 }
0x102e   : > { %v2815_v17 = vmul.f32 %v2814_v16, %v2814_v16 }
0x1030   : > { %v2816_v18 = vsel %vm810_vm1, %v2815_v17, 0.0 }
0x1031   : > { %2817 = vadd.xlane.f32.xlu1 %v2816_v18 }
0x10be   : > { %v2818_v19 = vpop.xlane.xlu1 %2817 }
0x10bf   : > { %v2819_v20 = vmul.f32 0.03125, %v2818_v19 }
0x10c1   : > { %v2820_v21 = vadd.f32 1e-05, %v2819_v20 }
0x10c3   : > { %3353 = vrsqrt.f32 %v2820_v21 }
0x10cd   : > { %v3354_v22 = vpop.eup %3353 }
0x10ce   : > { %v2822_v24 = vmul.f32 %v3354_v22, %v2814_v16 }
0x10d0   : > { %v2829_v26 = vmul.f32 %v2993_v23, %v2822_v24 }
0x10d2   : > { %v2836_v27 = vadd.f32 %v2994_v25, %v2829_v26 }
0x10d4   : > { %2837 = vst.msk [vmem:[%s796_s3] sm:$0xff] %vm810_vm1, %v2836_v27 }
0x10d5 PF: > { %s35_s5 = sadd.s32 1, %s3393_s5  }
0x10d6   : > { %p32_p2 = scmp.ge.s32.totalorder %s35_s5, 4  }
0x10d8   :  { %34 = sbr.rel (!%p32_p2) target bundleno = 11 (0xb), region = 160 }
0x10df   :  { %2857 = vsyncpa [#allocation3], 1 }
0x10e0   :  { %2859 = vsyncpa [#allocation3 + $0x1], 1 }

</bundles_post_ra>
